<compile_context>
chip_gen: v7x
topology: tpu7x:2x2x1
jax: 0.10.0
libtpu: 0.0.40
codegen_flags: <defaults>
</compile_context>

<pallas_src>
import functools

import jax
import jax.numpy as jnp
from jax.experimental import pallas as pl
from jax.experimental.pallas import tpu as pltpu


def _fused_mlp_kernel(*refs, num_layers):
    """Fused MLP forward.

    refs = (x, w1_q, w1_scale, b1, w2, b2, ..., wn, bn, out, acc)

    Grid: (K1 // tk,) -- reduction over the first layer's input features.
    Layer-1 partials accumulate into `acc` (VMEM, f32); the last grid step
    dequantizes (per-column scale), adds bias, applies ReLU, runs the
    remaining tiny VMEM-resident layers and the log_softmax, and writes out.
    """
    x_ref = refs[0]
    w1q_ref = refs[1]
    s1_ref = refs[2]
    b1_ref = refs[3]
    o_ref = refs[2 + 2 * num_layers]
    acc_ref = refs[3 + 2 * num_layers]

    k = pl.program_id(0)

    @pl.when(k == 0)
    def _():
        acc_ref[...] = jnp.zeros_like(acc_ref)

    # Layer-1 partial matmul.  W1 is streamed from HBM as int8 (half the bytes
    # of bf16) and widened to bf16 just before the MXU; f32 accumulation.
    # x is cast in-kernel (callers may also pass bf16 x directly; the cast is
    # then a no-op) -- a wrapper-side cast would only add HBM traffic.
    acc_ref[...] += jnp.dot(
        x_ref[...].astype(jnp.bfloat16),
        w1q_ref[...].astype(jnp.bfloat16),
        preferred_element_type=jnp.float32)

    @pl.when(k == pl.num_programs(0) - 1)
    def _():
        # Dequantize (per-output-column scale), bias, ReLU.
        h = acc_ref[...] * s1_ref[...] + b1_ref[...]
        h = jnp.maximum(h, 0.0)          # ReLU; dropout -> identity (eval)
        for i in range(1, num_layers):
            w_ref = refs[2 + 2 * i]
            b_ref = refs[3 + 2 * i]
            h = jnp.dot(h.astype(jnp.bfloat16), w_ref[...],
                        preferred_element_type=jnp.float32) + b_ref[...]
            if i < num_layers - 1:
                h = jnp.maximum(h, 0.0)  # ReLU (+ identity dropout)
        # log_softmax over the class dimension (max-subtraction trick).
        m = jnp.max(h, axis=1, keepdims=True)
        y = h - m
        lse = jnp.log(jnp.sum(jnp.exp(y), axis=1, keepdims=True))
        o_ref[...] = (y - lse).astype(o_ref.dtype)


def _pick_block_k(K, max_tk=12544):
    """Largest lane-aligned (multiple-of-128) divisor of K that is <= max_tk.

    Falls back to the full K (single grid step, always a legal block) rather
    than an unaligned divisor, so the (8, 128) BlockSpec rule always holds.
    """
    if K <= max_tk:
        return K
    for tk in range(max_tk - (max_tk % 128), 0, -128):
        if K % tk == 0:
            return tk
    return K


def mlp_forward(params, x):
    """params: {"layer1": (W1_q int8 (K,h1), scale f32 (1,h1), b1 f32 (h1,)),
                "tail":  [(W bf16 (in,out), b f32 (out,)), ...]}
       x: (M, K) float -> (M, n_out) float32 log-probabilities."""
    w1_q, w1_scale, b1 = params["layer1"]
    tail = params["tail"]
    M, K = x.shape
    h1 = w1_q.shape[1]
    num_layers = 1 + len(tail)
    n_out = tail[-1][0].shape[1]

    tk = _pick_block_k(K)
    grid = (K // tk,)

    # NOTE: constant-index (grid-invariant) blocks below are not re-DMA'd per
    # step; single-buffering them (pl.Buffered(1)) was considered but skipped
    # -- the saving is ~1-3% and not worth risking lowering differences.
    in_specs = [
        pl.BlockSpec((M, tk), lambda k: (0, k)),       # x: streamed K-slices
        pl.BlockSpec((tk, h1), lambda k: (k, 0)),      # W1 int8: streamed (dominant traffic)
        pl.BlockSpec((1, h1), lambda k: (0, 0)),       # per-column dequant scale, resident
        pl.BlockSpec((1, h1), lambda k: (0, 0)),       # b1, resident
    ]
    inputs = [x, w1_q, w1_scale.reshape(1, h1), b1.reshape(1, h1)]
    for (w, b) in tail:
        kin, kout = w.shape
        in_specs.append(pl.BlockSpec((kin, kout), lambda k: (0, 0)))  # tiny, resident
        in_specs.append(pl.BlockSpec((1, kout), lambda k: (0, 0)))    # bias, resident
        inputs.append(w)
        inputs.append(b.reshape(1, kout))

    # Advisory cost estimate so XLA schedules neighbors around this short call.
    flops = 2 * M * K * h1
    bytes_accessed = (x.size * x.dtype.itemsize + w1_q.size        # int8 = 1 B
                      + (h1 + h1) * 4)                             # scale + b1
    for (w, b) in tail:
        flops += 2 * M * w.shape[0] * w.shape[1]
        bytes_accessed += w.size * w.dtype.itemsize + b.size * 4
    bytes_accessed += M * n_out * 4
    transcendentals = M * (n_out + 1)                              # exp + log

    kernel = functools.partial(_fused_mlp_kernel, num_layers=num_layers)
    return pl.pallas_call(
        kernel,
        out_shape=jax.ShapeDtypeStruct((M, n_out), jnp.float32),
        grid_spec=pltpu.PrefetchScalarGridSpec(
            num_scalar_prefetch=0,
            grid=grid,
            in_specs=in_specs,
            out_specs=pl.BlockSpec((M, n_out), lambda k: (0, 0)),
            scratch_shapes=[pltpu.VMEM((M, h1), jnp.float32)],
        ),
        compiler_params=pltpu.CompilerParams(
            dimension_semantics=("arbitrary",)),
        cost_estimate=pl.CostEstimate(
            flops=flops,
            transcendentals=transcendentals,
            bytes_accessed=bytes_accessed),
    )(*inputs)


model_forward = jax.jit(mlp_forward)


# ----------------------------- parameters ---------------------------------

def init_params(key, input_size, hidden_layers, output_size):
    """Deterministic fp32 init (uniform +-1/sqrt(fan_in), like nn.Linear).

    Weights stored as (in_features, out_features) = PyTorch weight.T.
    """
    dims = [input_size] + list(hidden_layers) + [output_size]
    params = []
    for i in range(len(dims) - 1):
        fan_in, fan_out = dims[i], dims[i + 1]
        key, kw, kb = jax.random.split(key, 3)
        bound = 1.0 / jnp.sqrt(fan_in)
        w = jax.random.uniform(kw, (fan_in, fan_out), jnp.float32, -bound, bound)
        b = jax.random.uniform(kb, (fan_out,), jnp.float32, -bound, bound)
        params.append((w, b))
    return params


def _quantize_per_column_int8(w):
    """Symmetric per-output-column int8 quantization of (in, out) weights."""
    absmax = jnp.max(jnp.abs(w), axis=0, keepdims=True)          # (1, out)
    scale = jnp.maximum(absmax, 1e-12) / 127.0
    q = jnp.clip(jnp.round(w / scale), -127, 127).astype(jnp.int8)
    return q, scale.astype(jnp.float32)


def prepare_kernel_params(params_f32):
    """fp32 param list -> kernel params: int8 W1 (+scale), bf16 tail weights."""
    w1, b1 = params_f32[0]
    w1_q, w1_scale = _quantize_per_column_int8(w1)
    tail = [(w.astype(jnp.bfloat16), b) for (w, b) in params_f32[1:]]
    return {"layer1": (w1_q, w1_scale, b1), "tail": tail}


# ----------------------------- references ---------------------------------

def model_forward_ref(params, x):
    """Pure-JAX reference with the *same* quantized/bf16 numerics as the kernel."""
    w1_q, w1_scale, b1 = params["layer1"]
    h = jnp.dot(x.astype(jnp.bfloat16), w1_q.astype(jnp.bfloat16),
                preferred_element_type=jnp.float32) * w1_scale + b1.reshape(1, -1)
    h = jnp.maximum(h, 0.0)
    tail = params["tail"]
    for i, (w, b) in enumerate(tail):
        h = jnp.dot(h.astype(jnp.bfloat16), w,
                    preferred_element_type=jnp.float32) + b
        if i < len(tail) - 1:
            h = jnp.maximum(h, 0.0)
    return jax.nn.log_softmax(h, axis=1)


def model_forward_fp32(params_f32, x):
    """Full-precision reference (sanity check for the int8/bf16 quantization)."""
    h = x
    for i, (w, b) in enumerate(params_f32):
        h = jnp.dot(h, w, precision=jax.lax.Precision.HIGHEST,
                    preferred_element_type=jnp.float32) + b
        if i < len(params_f32) - 1:
            h = jnp.maximum(h, 0.0)
    return jax.nn.log_softmax(h, axis=1)


# -------------------------------- demo -------------------------------------

if __name__ == "__main__":
    key = jax.random.PRNGKey(0)

    input_size = 25088          # fixed by the module's first Linear
    hidden_layers = [128, 64]   # small hidden sizes
    output_size = 10
    batch = 4

    kp, kx = jax.random.split(key)
    params_f32 = init_params(kp, input_size, hidden_layers, output_size)
    params = prepare_kernel_params(params_f32)
    x = jax.random.normal(kx, (batch, input_size), jnp.float32)

    out = jax.block_until_ready(model_forward(params, x))
    ref_q = jax.block_until_ready(model_forward_ref(params, x))
    ref_fp = jax.block_until_ready(model_forward_fp32(params_f32, x))

    assert out.shape == (batch, output_size)
    # Kernel vs same-numerics JAX reference: tight.
    assert jnp.allclose(out, ref_q, atol=2e-3, rtol=2e-3), "mismatch vs quantized reference"
    # Kernel vs fp32 reference: validates the int8/bf16 quantization is benign.
    assert jnp.allclose(out, ref_fp, atol=3e-2, rtol=3e-2), "mismatch vs fp32 reference"

    print("KERNEL_OK")
</pallas_src>

<mosaic_0001>
module attributes {stable_mosaic.version = 11 : i64} {
  func.func @_fused_mlp_kernel(%arg0: i32, %arg1: memref<4x12544xf32, #tpu.memory_space<vmem>>, %arg2: memref<12544x128xi8, #tpu.memory_space<vmem>>, %arg3: memref<1x128xf32, #tpu.memory_space<vmem>>, %arg4: memref<1x128xf32, #tpu.memory_space<vmem>>, %arg5: memref<128x64xbf16, #tpu.memory_space<vmem>>, %arg6: memref<1x64xf32, #tpu.memory_space<vmem>>, %arg7: memref<64x10xbf16, #tpu.memory_space<vmem>>, %arg8: memref<1x10xf32, #tpu.memory_space<vmem>>, %arg9: memref<4x10xf32, #tpu.memory_space<vmem>>, %arg10: memref<4x128xf32, #tpu.memory_space<vmem>>) attributes {dimension_semantics = [#tpu.dimension_semantics<arbitrary>], iteration_bounds = array<i64: 2>, scalar_prefetch = 0 : i64, scratch_operands = 1 : i64, tpu.core_type = #tpu.core_type<tc>, window_params = [{transform_indices = @transform_0, window_bounds = array<i64: 4, 12544>}, {transform_indices = @transform_1, window_bounds = array<i64: 12544, 128>}, {pipeline_mode = #tpu.pipeline_mode<synchronous>, transform_indices = @transform_2, window_bounds = array<i64: 1, 128>}, {pipeline_mode = #tpu.pipeline_mode<synchronous>, transform_indices = @transform_3, window_bounds = array<i64: 1, 128>}, {pipeline_mode = #tpu.pipeline_mode<synchronous>, transform_indices = @transform_4, window_bounds = array<i64: 128, 64>}, {pipeline_mode = #tpu.pipeline_mode<synchronous>, transform_indices = @transform_5, window_bounds = array<i64: 1, 64>}, {pipeline_mode = #tpu.pipeline_mode<synchronous>, transform_indices = @transform_6, window_bounds = array<i64: 64, 10>}, {pipeline_mode = #tpu.pipeline_mode<synchronous>, transform_indices = @transform_7, window_bounds = array<i64: 1, 10>}, {pipeline_mode = #tpu.pipeline_mode<synchronous>, transform_indices = @transform_8, window_bounds = array<i64: 4, 10>}]} {
    %c0_i32 = arith.constant 0 : i32
    %0 = arith.cmpi eq, %arg0, %c0_i32 : i32
    %1 = arith.extui %0 : i1 to i32
    %c0_i32_0 = arith.constant 0 : i32
    %2 = arith.cmpi ne, %1, %c0_i32_0 : i32
    scf.if %2 {
      %cst_9 = arith.constant 0.000000e+00 : f32
      %14 = vector.broadcast %cst_9 : f32 to vector<4x128xf32>
      %c0_10 = arith.constant 0 : index
      %c0_11 = arith.constant 0 : index
      %15 = vector.load %arg10[%c0_10, %c0_11] : memref<4x128xf32, #tpu.memory_space<vmem>>, vector<4x128xf32>
      tpu.vector_store %arg10[%c0_10, %c0_11], %14 {strides = array<i32>} : memref<4x128xf32, #tpu.memory_space<vmem>>, vector<4x128xf32>,
    } else {
    }
    %c0 = arith.constant 0 : index
    %c0_1 = arith.constant 0 : index
    %3 = vector.load %arg10[%c0, %c0_1] : memref<4x128xf32, #tpu.memory_space<vmem>>, vector<4x128xf32>
    %c0_2 = arith.constant 0 : index
    %c0_3 = arith.constant 0 : index
    %4 = vector.load %arg1[%c0_2, %c0_3] : memref<4x12544xf32, #tpu.memory_space<vmem>>, vector<4x12544xf32>
    %5 = arith.truncf %4 : vector<4x12544xf32> to vector<4x12544xbf16>
    %c0_4 = arith.constant 0 : index
    %c0_5 = arith.constant 0 : index
    %6 = vector.load %arg2[%c0_4, %c0_5] : memref<12544x128xi8, #tpu.memory_space<vmem>>, vector<12544x128xi8>
    %7 = arith.sitofp %6 : vector<12544x128xi8> to vector<12544x128xbf16>
    %cst = arith.constant dense<0.000000e+00> : vector<4x128xf32>
    %8 = tpu.matmul %5, %7, %cst {dimension_numbers = #tpu.dot_dimension_numbers<[1], [0], [0], [1], [0, 0, 1, 1], [], []>} : vector<4x12544xbf16>, vector<12544x128xbf16>, vector<4x128xf32> -> vector<4x128xf32>
    %9 = arith.addf %3, %8 : vector<4x128xf32>
    %c0_6 = arith.constant 0 : index
    %c0_7 = arith.constant 0 : index
    %10 = vector.load %arg10[%c0_6, %c0_7] : memref<4x128xf32, #tpu.memory_space<vmem>>, vector<4x128xf32>
    tpu.vector_store %arg10[%c0_6, %c0_7], %9 {strides = array<i32>} : memref<4x128xf32, #tpu.memory_space<vmem>>, vector<4x128xf32>,
    %c1_i32 = arith.constant 1 : i32
    %11 = arith.cmpi eq, %arg0, %c1_i32 : i32
    %12 = arith.extui %11 : i1 to i32
    %c0_i32_8 = arith.constant 0 : i32
    %13 = arith.cmpi ne, %12, %c0_i32_8 : i32
    scf.if %13 {
      %c0_9 = arith.constant 0 : index
      %c0_10 = arith.constant 0 : index
      %14 = vector.load %arg10[%c0_9, %c0_10] : memref<4x128xf32, #tpu.memory_space<vmem>>, vector<4x128xf32>
      %c0_11 = arith.constant 0 : index
      %c0_12 = arith.constant 0 : index
      %15 = vector.load %arg3[%c0_11, %c0_12] : memref<1x128xf32, #tpu.memory_space<vmem>>, vector<1x128xf32>
      %16 = vector.broadcast %15 : vector<1x128xf32> to vector<4x128xf32>
      %17 = arith.mulf %14, %16 : vector<4x128xf32>
      %c0_13 = arith.constant 0 : index
      %c0_14 = arith.constant 0 : index
      %18 = vector.load %arg4[%c0_13, %c0_14] : memref<1x128xf32, #tpu.memory_space<vmem>>, vector<1x128xf32>
      %19 = vector.broadcast %18 : vector<1x128xf32> to vector<4x128xf32>
      %20 = arith.addf %17, %19 : vector<4x128xf32>
      %cst_15 = arith.constant 0.000000e+00 : f32
      %21 = vector.broadcast %cst_15 : f32 to vector<4x128xf32>
      %22 = arith.maximumf %20, %21 : vector<4x128xf32>
      %23 = arith.truncf %22 : vector<4x128xf32> to vector<4x128xbf16>
      %c0_16 = arith.constant 0 : index
      %c0_17 = arith.constant 0 : index
      %24 = vector.load %arg5[%c0_16, %c0_17] : memref<128x64xbf16, #tpu.memory_space<vmem>>, vector<128x64xbf16>
      %cst_18 = arith.constant dense<0.000000e+00> : vector<4x64xf32>
      %25 = tpu.matmul %23, %24, %cst_18 {dimension_numbers = #tpu.dot_dimension_numbers<[1], [0], [0], [1], [0, 0, 1, 1], [], []>} : vector<4x128xbf16>, vector<128x64xbf16>, vector<4x64xf32> -> vector<4x64xf32>
      %c0_19 = arith.constant 0 : index
      %c0_20 = arith.constant 0 : index
      %26 = vector.load %arg6[%c0_19, %c0_20] : memref<1x64xf32, #tpu.memory_space<vmem>>, vector<1x64xf32>
      %27 = vector.broadcast %26 : vector<1x64xf32> to vector<4x64xf32>
      %28 = arith.addf %25, %27 : vector<4x64xf32>
      %cst_21 = arith.constant 0.000000e+00 : f32
      %29 = vector.broadcast %cst_21 : f32 to vector<4x64xf32>
      %30 = arith.maximumf %28, %29 : vector<4x64xf32>
      %31 = arith.truncf %30 : vector<4x64xf32> to vector<4x64xbf16>
      %c0_22 = arith.constant 0 : index
      %c0_23 = arith.constant 0 : index
      %32 = vector.load %arg7[%c0_22, %c0_23] : memref<64x10xbf16, #tpu.memory_space<vmem>>, vector<64x10xbf16>
      %cst_24 = arith.constant dense<0.000000e+00> : vector<4x10xf32>
      %33 = tpu.matmul %31, %32, %cst_24 {dimension_numbers = #tpu.dot_dimension_numbers<[1], [0], [0], [1], [0, 0, 1, 1], [], []>} : vector<4x64xbf16>, vector<64x10xbf16>, vector<4x10xf32> -> vector<4x10xf32>
      %c0_25 = arith.constant 0 : index
      %c0_26 = arith.constant 0 : index
      %34 = vector.load %arg8[%c0_25, %c0_26] : memref<1x10xf32, #tpu.memory_space<vmem>>, vector<1x10xf32>
      %35 = vector.broadcast %34 : vector<1x10xf32> to vector<4x10xf32>
      %36 = arith.addf %33, %35 : vector<4x10xf32>
      %cst_27 = arith.constant dense<0xFF800000> : vector<4xf32>
      %37 = vector.multi_reduction <maximumf>, %36, %cst_27 [1] : vector<4x10xf32> to vector<4xf32>
      %38 = vector.shape_cast %37 : vector<4xf32> to vector<4x1xf32>
      %39 = vector.broadcast %38 : vector<4x1xf32> to vector<4x10xf32>
      %40 = arith.subf %36, %39 : vector<4x10xf32>
      %41 = math.exp %40 : vector<4x10xf32>
      %cst_28 = arith.constant dense<0.000000e+00> : vector<4xf32>
      %42 = vector.multi_reduction <add>, %41, %cst_28 [1] : vector<4x10xf32> to vector<4xf32>
      %43 = vector.shape_cast %42 : vector<4xf32> to vector<4x1xf32>
      %44 = math.log %43 : vector<4x1xf32>
      %45 = vector.broadcast %44 : vector<4x1xf32> to vector<4x10xf32>
      %46 = arith.subf %40, %45 : vector<4x10xf32>
      %c0_29 = arith.constant 0 : index
      %c0_30 = arith.constant 0 : index
      %47 = vector.load %arg9[%c0_29, %c0_30] : memref<4x10xf32, #tpu.memory_space<vmem>>, vector<4x10xf32>
      tpu.vector_store %arg9[%c0_29, %c0_30], %46 {strides = array<i32>} : memref<4x10xf32, #tpu.memory_space<vmem>>, vector<4x10xf32>,
    } else {
    }
    return
  }
  func.func @transform_0(%arg0: i32) -> (i32, i32) {
    %c0_i32 = arith.constant 0 : i32
    %c0_i32_0 = arith.constant 0 : i32
    return %c0_i32, %arg0 : i32, i32
  }
  func.func @transform_1(%arg0: i32) -> (i32, i32) {
    %c0_i32 = arith.constant 0 : i32
    %c0_i32_0 = arith.constant 0 : i32
    return %arg0, %c0_i32 : i32, i32
  }
  func.func @transform_2(%arg0: i32) -> (i32, i32) {
    %c0_i32 = arith.constant 0 : i32
    %c0_i32_0 = arith.constant 0 : i32
    %c0_i32_1 = arith.constant 0 : i32
    return %c0_i32, %c0_i32_0 : i32, i32
  }
  func.func @transform_3(%arg0: i32) -> (i32, i32) {
    %c0_i32 = arith.constant 0 : i32
    %c0_i32_0 = arith.constant 0 : i32
    %c0_i32_1 = arith.constant 0 : i32
    return %c0_i32, %c0_i32_0 : i32, i32
  }
  func.func @transform_4(%arg0: i32) -> (i32, i32) {
    %c0_i32 = arith.constant 0 : i32
    %c0_i32_0 = arith.constant 0 : i32
    %c0_i32_1 = arith.constant 0 : i32
    return %c0_i32, %c0_i32_0 : i32, i32
  }
  func.func @transform_5(%arg0: i32) -> (i32, i32) {
    %c0_i32 = arith.constant 0 : i32
    %c0_i32_0 = arith.constant 0 : i32
    %c0_i32_1 = arith.constant 0 : i32
    return %c0_i32, %c0_i32_0 : i32, i32
  }
  func.func @transform_6(%arg0: i32) -> (i32, i32) {
    %c0_i32 = arith.constant 0 : i32
    %c0_i32_0 = arith.constant 0 : i32
    %c0_i32_1 = arith.constant 0 : i32
    return %c0_i32, %c0_i32_0 : i32, i32
  }
  func.func @transform_7(%arg0: i32) -> (i32, i32) {
    %c0_i32 = arith.constant 0 : i32
    %c0_i32_0 = arith.constant 0 : i32
    %c0_i32_1 = arith.constant 0 : i32
    return %c0_i32, %c0_i32_0 : i32, i32
  }
  func.func @transform_8(%arg0: i32) -> (i32, i32) {
    %c0_i32 = arith.constant 0 : i32
    %c0_i32_0 = arith.constant 0 : i32
    %c0_i32_1 = arith.constant 0 : i32
    return %c0_i32, %c0_i32_0 : i32, i32
  }
}

</mosaic_0001>

<bundles_post_ra>
// kernel: mlp_forward.1
= control target key start
LH: loop header
LB: loop body
LE: loop exit
PB: predicated region body
PF: predicated region fallthrough
CT: control target
= control target key end

     0   :  { %s6966_s0 = inlined_call_operand.hbm [shape: f32[4,25088], index: 0, kind: input, shape index: {}]   ;;  %s6967_s1 = inlined_call_operand.hbm [shape: s8[25088,128], index: 1, kind: input, shape index: {}]   ;;  %s6968_s2 = inlined_call_operand.hbm [shape: f32[1,128], index: 2, kind: input, shape index: {}]   ;;  %s6969_s3 = inlined_call_operand.hbm [shape: f32[1,128], index: 3, kind: input, shape index: {}]   ;;  %s6970_s4 = inlined_call_operand.vmem [shape: bf16[128,64], index: 4, kind: input, shape index: {}]   ;;  %s6971_s5 = inlined_call_operand.hbm [shape: f32[1,64], index: 5, kind: input, shape index: {}]   ;;  %s6972_s6 = inlined_call_operand.vmem [shape: bf16[64,10], index: 6, kind: input, shape index: {}]   ;;  %s6973_s7 = inlined_call_operand.hbm [shape: f32[1,10], index: 7, kind: input, shape index: {}]   ;;  %s6974_s8 = inlined_call_operand.hbm [shape: f32[4,10], index: 8, kind: output, shape index: {}]  }
   0x1   :  { %6977 = sst [smem:[#allocation21_spill]] %s6966_s0 }
   0x2   :  { %13 = vsyncpa [#allocation4], 0 }
   0x3   :  { %15 = vsyncpa [#allocation4 + $0x1], 0 }
   0x4   :  { %16 = vsyncpa [#allocation7], 0 }
   0x5   :  { %18 = vsyncpa [#allocation7 + $0x1], 0 }
   0x6   :  { %19 = vsyncpa [#allocation10], 0 }
   0x7   :  { %20 = vsyncpa [#allocation13], 0 }
   0x8   :  { %21 = vsyncpa [#allocation5], 0  ;;  %s5832_s27 = smov 0   ;;  %s5834_s28 = smov 0  }
   0x9   :  { %s5836_s29 = smov 0   ;;  %s5838_s30 = smov 0  }
   0xa LB: > { %s5775_s9 = smov [#allocation8]   ;;  %s5853_s11 = sadd.s32 4294967295, %s5773_s30   ;;  %s5773_s30 = sphi %s5838_s30, %s6996_s30   ;;  %s5769_s29 = sphi %s5836_s29, %s6995_s29   ;;  %s5765_s28 = sphi %s5834_s28, %s6994_s28   ;;  %s5761_s27 = sphi %s5832_s27, %s6993_s27  }
   0xb   : > { %s244_s10 = sshll.u32 %s5775_s9, 4  ;;  %p4193_p0 = scmp.ge.s32.totalorder %s5773_s30, 1  ;;  %s5859_s10 = int_to_ptr.vmem [resolvable:$true] %s244_s10 }
   0xc   : > { %p6975_p1 = scmp.eq.s32.totalorder %s5853_s11, 0  ;;  %p231_p2 = scmp.lt.s32.totalorder %s5773_s30, 3 }
   0xd   : > { %s5776_s13 = smov [#allocation9]   ;;  %s5777_s15 = smov [#allocation11]  }
   0xe   : > { %p5861_p4 = pnand %p4193_p0, %p231_p2  ;;  %s255_s14 = sshll.u32 %s5776_s13, 4  ;;  %s5867_s14 = int_to_ptr.vmem [resolvable:$true] %s255_s14 }
   0xf   : > { %s269_s16 = sshll.u32 %s5777_s15, 4  ;;  %s5778_s18 = smov [#allocation12]   ;;  %s5875_s16 = int_to_ptr.vmem [resolvable:$true] %s269_s16 }
  0x10   : > { %s6978_s12 = scalar_select %p5861_p4, 1, 0 }
  0x11   : > { %p5383_p5 = pneg %p5861_p4  ;;  %s5877_s19 = sshll.u32 %s5778_s18, 4  ;;  %s284_s19 = int_to_ptr.vmem [resolvable:$true] %s5877_s19 }
  0x12   : > { %s5521_s22 = scalar_lea.hbm %s6968_s2, 16 }
  0x13   : > { %p5871_p6 = pnand %p5383_p5, %p6975_p1  ;;  %p5522_p7 = scmp.ne.s32.totalorder %s6968_s2, %s5521_s22 }
  0x14   : > { %p5528_p11 = scmp.lt.u32.totalorder %s5521_s22, %s6968_s2 }
  0x15   : > { %p5887_p8 = pneg %p5871_p6 }
  0x17   : > { %p5524_p9 = pnand %p5887_p8, %p5522_p7 }
  0x19   : > { %p5525_p10 = pneg %p5524_p9 }
  0x1b   : > { %p5530_p12 = pnand %p5528_p11, %p5525_p10 }
  0x1d   : > { %5533 = shalt.err (!%p5530_p12)
}
  0x1e   : > { %s5534_s13 = scalar_lea.vmem %s5859_s10, 16  ;;  %s5541_s15 = scalar_lea.vmem %s5859_s10, 32 }
  0x1f   : > { %p5535_p13 = scmp.ne.s32.totalorder %s5859_s10, %s5534_s13  ;;  %p5542_p5 = scmp.lt.s32.totalorder %s5859_s10, %s5859_s10 }
  0x20   : > { %p5543_p7 = scmp.lt.s32.totalorder %s5541_s15, %s5534_s13 }
  0x21   : > { %p5537_p0 = pnand %p5535_p13, %p5887_p8 }
  0x22   : > { %p5544_p9 = por %p5543_p7, %p5542_p5 }
  0x23   : > { %p5538_p2 = pneg %p5537_p0 }
  0x25   : > { %p5545_p3 = pnand %p5544_p9, %p5538_p2 }
  0x27   : > { %5548 = shalt.err (!%p5545_p3)
}
  0x28   : > { %5386 = dma.hbm_to_vmem [thread:$0]  (!%p5871_p6), %s6968_s2, 16, %s5859_s10, [#allocation7]  }
  0x29   : > { %s5549_s23 = scalar_lea.hbm %s6969_s3, 16 }
  0x2a   : > { %p5550_p10 = scmp.ne.s32.totalorder %s6969_s3, %s5549_s23  ;;  %p5556_p3 = scmp.lt.u32.totalorder %s5549_s23, %s6969_s3 }
  0x2c   : > { %p5552_p11 = pnand %p5550_p10, %p5887_p8 }
  0x2e   : > { %p5553_p12 = pneg %p5552_p11 }
  0x30   : > { %p5558_p13 = pnand %p5556_p3, %p5553_p12 }
  0x32   : > { %5561 = shalt.err (!%p5558_p13)
}
  0x33   : > { %s5562_s10 = scalar_lea.vmem %s5867_s14, 16  ;;  %s5569_s15 = scalar_lea.vmem %s5867_s14, 32 }
  0x34   : > { %p5563_p0 = scmp.ne.s32.totalorder %s5867_s14, %s5562_s10  ;;  %p5570_p7 = scmp.lt.s32.totalorder %s5867_s14, %s5867_s14 }
  0x35   : > { %p5571_p9 = scmp.lt.s32.totalorder %s5569_s15, %s5562_s10 }
  0x36   : > { %p5565_p2 = pnand %p5563_p0, %p5887_p8 }
  0x37   : > { %p5572_p10 = por %p5571_p9, %p5570_p7 }
  0x38   : > { %p5566_p5 = pneg %p5565_p2 }
  0x3a   : > { %p5573_p11 = pnand %p5572_p10, %p5566_p5 }
  0x3c   : > { %5576 = shalt.err (!%p5573_p11)
}
  0x3d   : > { %5389 = dma.hbm_to_vmem [thread:$0]  (!%p5871_p6), %s6969_s3, 16, %s5867_s14, [#allocation10]  }
  0x3e   : > { %s5577_s23 = scalar_lea.hbm %s6971_s5, 16 }
  0x3f   : > { %p5578_p12 = scmp.ne.s32.totalorder %s6971_s5, %s5577_s23  ;;  %p5584_p0 = scmp.lt.u32.totalorder %s5577_s23, %s6971_s5 }
  0x41   : > { %p5580_p3 = pnand %p5578_p12, %p5887_p8 }
  0x43   : > { %p5581_p13 = pneg %p5580_p3 }
  0x45   : > { %p5586_p2 = pnand %p5584_p0, %p5581_p13 }
  0x47   : > { %5589 = shalt.err (!%p5586_p2)
}
  0x48   : > { %s5590_s14 = scalar_lea.vmem %s5875_s16, 16  ;;  %s5597_s10 = scalar_lea.vmem %s5875_s16, 32 }
  0x49   : > { %p5591_p5 = scmp.ne.s32.totalorder %s5875_s16, %s5590_s14  ;;  %p5598_p10 = scmp.lt.s32.totalorder %s5875_s16, %s5875_s16 }
  0x4a   : > { %p5599_p11 = scmp.lt.s32.totalorder %s5597_s10, %s5590_s14 }
  0x4b   : > { %p5593_p7 = pnand %p5591_p5, %p5887_p8 }
  0x4c   : > { %p5600_p12 = por %p5599_p11, %p5598_p10 }
  0x4d   : > { %p5594_p9 = pneg %p5593_p7 }
  0x4f   : > { %p5601_p3 = pnand %p5600_p12, %p5594_p9 }
  0x51   : > { %5604 = shalt.err (!%p5601_p3)
}
  0x52   : > { %5392 = dma.hbm_to_vmem [thread:$0]  (!%p5871_p6), %s6971_s5, 16, %s5875_s16, [#allocation10]  }
  0x53   : > { %s5605_s22 = scalar_lea.hbm %s6973_s7, 16 }
  0x54   : > { %p5606_p13 = scmp.ne.s32.totalorder %s6973_s7, %s5605_s22  ;;  %p5612_p5 = scmp.lt.u32.totalorder %s5605_s22, %s6973_s7 }
  0x56   : > { %p5608_p0 = pnand %p5606_p13, %p5887_p8 }
  0x58   : > { %p5609_p2 = pneg %p5608_p0 }
  0x5a   : > { %p5614_p7 = pnand %p5612_p5, %p5609_p2 }
  0x5c   : > { %5617 = shalt.err (!%p5614_p7)
}
  0x5d   : > { %s5618_s13 = scalar_lea.vmem %s284_s19, 16  ;;  %s5625_s16 = scalar_lea.vmem %s284_s19, 32 }
  0x5e   : > { %p5619_p9 = scmp.ne.s32.totalorder %s284_s19, %s5618_s13  ;;  %p5626_p12 = scmp.lt.s32.totalorder %s284_s19, %s284_s19 }
  0x5f   : > { %p5627_p3 = scmp.lt.s32.totalorder %s5625_s16, %s5618_s13 }
  0x60   : > { %p5621_p10 = pnand %p5619_p9, %p5887_p8 }
  0x61   : > { %p5628_p1 = por %p5627_p3, %p5626_p12 }
  0x62   : > { %p5622_p11 = pneg %p5621_p10 }
  0x64   : > { %p5629_p4 = pnand %p5628_p1, %p5622_p11 }
  0x66   : > { %5632 = shalt.err (!%p5629_p4)
}
  0x67   : > { %5395 = dma.hbm_to_vmem [thread:$0]  (!%p5871_p6), %s6973_s7, 16, %s284_s19, [#allocation13]  }
  0x68   : > { %s5977_s25 = sadd.s32 1, %s5773_s30   ;;  %s34_s17 = sadd.s32 1, %s5769_s29 }
  0x69   : > { %s31_s15 = ssub.s32 %s5773_s30, %s5977_s25  ;;  %p41_p1 = scmp.ne.s32.totalorder %s5769_s29, %s5765_s28 }
  0x6a   : > { %p32_p4 = scmp.eq.s32.totalorder %s31_s15, 0  ;;  %p42_p8 = scmp.eq.s32.totalorder %s5773_s30, 0 }
  0x6b   : > { %p47_p13 = scmp.ne.s32.totalorder %s5765_s28, %s5761_s27  ;;  %p5407_p0 = scmp.lt.s32.totalorder %s5773_s30, 2 }
  0x6c   : > { %s5989_s18 = scalar_select %p32_p4, %s5769_s29, %s34_s17  }
  0x6d   : > { %p43_p2 = por %p42_p8, %p41_p1  ;;  %p6981_p5 = scmp.eq.s32.totalorder %s5853_s11, 0 }
  0x6e   : > { %s5998_s21 = sand.u32 1, %s5769_s29   ;;  %s4229_s19 = smul.u32 6272, %s5773_s30 }
  0x6f   : > { %p5993_p7 = por %p6981_p5, %p47_p13  ;;  %s5355_s22 = smul.u32 392, %s5998_s21 }
  0x70   : > { %s6983_s0 = sld [smem:[#allocation21_spill]]  ;;  %p6007_p6 = pnand %p5407_p0, %p43_p2 }
  0x71   : > { %s5356_s9 = smul.u32 3136, %s5998_s21  ;;  %s298_s13 = scalar_lea.vmem [#allocation3], %s5355_s22 }
  0x72   : > { %s306_s16 = sshll.u32 %s298_s13, 4  ;;  %s295_s14 = scalar_lea.sflag [#allocation4], %s5998_s21  ;;  %s6012_s16 = int_to_ptr.vmem [resolvable:$true] %s306_s16 }
  0x73   : > { %p5635_p10 = pneg %p6007_p6 }
  0x76   : > { %s6005_s27 = scalar_lea.hbm %s6983_s0, %s4229_s19  ;;  %s5638_s19 = scalar_lea.hbm %s6983_s0, 12544 }
  0x77   : > { %s5633_s10 = scalar_lea.hbm %s6005_s27, 6272  ;;  %p5639_p3 = scmp.lt.u32.totalorder %s6005_s27, %s6983_s0 }
  0x78   : > { %p5634_p9 = scmp.ne.s32.totalorder %s6005_s27, %s5633_s10  ;;  %p5640_p1 = scmp.lt.u32.totalorder %s5638_s19, %s5633_s10 }
  0x79   : > { %p5642_p8 = scmp.lt.u32.totalorder %s5633_s10, %s6005_s27 }
  0x7a   : > { %p5636_p11 = pnand %p5635_p10, %p5634_p9  ;;  %p5641_p4 = por %p5640_p1, %p5639_p3 }
  0x7c   : > { %p5637_p12 = pneg %p5636_p11  ;;  %p5643_p13 = por %p5642_p8, %p5641_p4 }
  0x7e   : > { %p5644_p0 = pnand %p5643_p13, %p5637_p12 }
  0x80   : > { %5647 = shalt.err (!%p5644_p0)
}
  0x81   : > { %s5648_s22 = scalar_lea.vmem %s6012_s16, 6272  ;;  %s5779_s13 = smov [#allocation3]  }
  0x82   : > { %p5649_p2 = scmp.ne.s32.totalorder %s6012_s16, %s5648_s22  ;;  %s5653_s17 = sshll.u32 %s5779_s13, 4  ;;  %s5654_s17 = int_to_ptr.vmem [resolvable:$false] %s5653_s17 }
  0x83   : > { %s5655_s15 = scalar_lea.vmem %s5654_s17, 12544  ;;  %p5656_p11 = scmp.lt.s32.totalorder %s6012_s16, %s5654_s17 }
  0x84   : > { %p5651_p5 = pnand %p5649_p2, %p5635_p10  ;;  %p5657_p3 = scmp.lt.s32.totalorder %s5655_s15, %s5648_s22 }
  0x86   : > { %p5652_p9 = pneg %p5651_p5  ;;  %p5658_p1 = por %p5657_p3, %p5656_p11 }
  0x88   : > { %p5659_p4 = pnand %p5658_p1, %p5652_p9 }
  0x8a   : > { %5662 = shalt.err (!%p5659_p4)
}
  0x8b   : > { %5399 = dma.hbm_to_vmem [thread:$0]  (!%p6007_p6), %s6005_s27, 6272, %s6012_s16, %s295_s14  }
  0x8c   : > { %s317_s10 = scalar_lea.vmem [#allocation6], %s5356_s9  ;;  %s313_s23 = sand.u32 1, %s5773_s30  }
  0x8d   : > { %s324_s19 = sshll.u32 %s317_s10, 4  ;;  %s4230_s24 = smul.u32 50176, %s5773_s30  ;;  %s6043_s19 = int_to_ptr.vmem [resolvable:$true] %s324_s19 }
  0x8e   : > { %s6051_s15 = scalar_lea.sflag [#allocation7], %s313_s23  ;;  %s5668_s30 = scalar_lea.hbm %s6967_s1, 100352 }
  0x8f   : > { %s6049_s17 = scalar_lea.hbm %s6967_s1, %s4230_s24 }
  0x90   : > { %s5663_s0 = scalar_lea.hbm %s6049_s17, 50176  ;;  %p5669_p0 = scmp.lt.u32.totalorder %s6049_s17, %s6967_s1 }
  0x91   : > { %p5664_p12 = scmp.ne.s32.totalorder %s6049_s17, %s5663_s0  ;;  %p5670_p2 = scmp.lt.u32.totalorder %s5668_s30, %s5663_s0 }
  0x92   : > { %p5672_p9 = scmp.lt.u32.totalorder %s5663_s0, %s6049_s17 }
  0x93   : > { %p5666_p8 = pnand %p5664_p12, %p5635_p10  ;;  %p5671_p5 = por %p5670_p2, %p5669_p0 }
  0x95   : > { %p5667_p13 = pneg %p5666_p8  ;;  %p5673_p11 = por %p5672_p9, %p5671_p5 }
  0x97   : > { %p5674_p3 = pnand %p5673_p11, %p5667_p13 }
  0x99   : > { %5677 = shalt.err (!%p5674_p3)
}
  0x9a   : > { %s5678_s14 = scalar_lea.vmem %s6043_s19, 50176  ;;  %s5780_s10 = smov [#allocation6]  }
  0x9b   : > { %p5679_p1 = scmp.ne.s32.totalorder %s6043_s19, %s5678_s14  ;;  %s5683_s23 = sshll.u32 %s5780_s10, 4  ;;  %s5684_s23 = int_to_ptr.vmem [resolvable:$false] %s5683_s23 }
  0x9c   : > { %s5685_s24 = scalar_lea.vmem %s5684_s23, 100352  ;;  %p5686_p8 = scmp.lt.s32.totalorder %s6043_s19, %s5684_s23 }
  0x9d   : > { %p5681_p4 = pnand %p5679_p1, %p5635_p10  ;;  %p5687_p0 = scmp.lt.s32.totalorder %s5685_s24, %s5678_s14 }
  0x9f   : > { %p5682_p12 = pneg %p5681_p4  ;;  %p5688_p2 = por %p5687_p0, %p5686_p8 }
  0xa1   : > { %p5689_p5 = pnand %p5688_p2, %p5682_p12 }
  0xa3   : > { %5692 = shalt.err (!%p5689_p5)
}
  0xa4   : > { %s5781_s0 = smov 128   ;;  %s5782_s22 = smov 8  }
  0xa5   : > { %5402 = dma.hbm_to_vmem [thread:$0]  (!%p6007_p6), %s6049_s17, 50176, %s6043_s19, %s6051_s15, %s5781_s0, %s5781_s0, %s5782_s22  }
  0xa6   : > { %p6985_p10 = scmp.ne.s32.totalorder %s6978_s12, 0 }
  0xa7   : > { %s338_s13 = sand.u32 (!%p6985_p10), 1, %s5765_s28  }
  0xa8   : > { %336 = sbr.rel (%p6985_p10) target bundleno = 2011 (0x7db), region = 52  ;;  %s339_s27 = scalar_lea.sflag (!%p6985_p10), [#allocation4], %s338_s13 }
  0xa9   : > { %s5357_s21 = smul.u32 (!%p6985_p10), 392, %s338_s13 }
  0xab   : > { %s6080_s30 = scalar_lea.vmem (!%p6985_p10), [#allocation3], %s5357_s21 }
  0xaf   : > { %5736 = dma.done.wait (%p5993_p7), %s339_s27, 6272  }
  0xb0   : > { %5738 = vsyncadd (%p5993_p7), %s339_s27, 4294961024  ;;  %s347_s9 = sand.u32 1, %s5853_s11   ;;  %s5358_s26 = smul.u32 3136, %s338_s13 }
  0xb1   : > { %s348_s19 = scalar_lea.sflag [#allocation7], %s347_s9 }
  0xb2   : > { %s6087_s17 = scalar_lea.vmem [#allocation6], %s5358_s26 }
  0xb3   : > { %5740 = dma.done.wait (%p5993_p7), %s348_s19, 50176  }
  0xb4   : > { %5742 = vsyncadd (%p5993_p7), %s348_s19, 4294917120  ;;  %p6986_p6 = scmp.eq.s32.totalorder %s5853_s11, 0 }
  0xb6   : > { %5744 = dma.done.wait (%p6986_p6), [#allocation7], 16   ;;  %p6987_p13 = pmov %p6986_p6 }
  0xb7   : > { %p6988_p9 = pmov %p6986_p6 }
  0xb8   : > { %5746 = vsyncadd (%p6987_p13), [#allocation7], 4294967280 }
  0xb9   : > { %5748 = dma.done.wait (%p6988_p9), [#allocation10], 32   ;;  %p6989_p11 = pmov %p6986_p6 }
  0xba   : > { %p6990_p3 = pmov %p6986_p6 }
  0xbb   : > { %5750 = vsyncadd (%p6989_p11), [#allocation10], 4294967264 }
  0xbc   : > { %5752 = dma.done.wait (%p6990_p3), [#allocation13], 16   ;;  %p6991_p1 = pmov %p6990_p3 }
  0xbd   : > { %p6992_p7 = scmp.ne.s32.totalorder %s5853_s11, 0 }
  0xbe   : > { %5754 = vsyncadd (%p6991_p1), [#allocation13], 4294967280  ;;  %v5783_v0 = vmov (!%p6992_p7), 0.0  }
  0xbf   : > { %406 = sbr.rel (%p6992_p7) target bundleno = 198 (0xc6), region = 80  ;;  %407 = vst [vmem:[#allocation2] sm:$0xf] (!%p6992_p7), %v5783_v0 }
  0xc6 PF: > { %v707_v1 = vld [vmem:[%s6087_s17 + $0x20] sm:$0xff]  ;;  %v708_v11 = vld [vmem:[%s6087_s17 + $0x28] sm:$0xff]  ;;  %v6116_v19 = vld [vmem:[%s6080_s30] sm:$0xff]  ;;  %p4207_p4 = scmp.ne.s32.totalorder %s5853_s11, 1 }
  0xc7   : > { %v715_v2 = vld [vmem:[%s6087_s17 + $0x60] sm:$0xff]  ;;  %v1103_v4 = vunpack.c.l.s8.bf16 %v707_v1  ;;  %v1104_v5 = vunpack.c.h.s8.bf16 %v707_v1  ;;  %v716_v12 = vld [vmem:[%s6087_s17 + $0x68] sm:$0xff]  ;;  %v1105_v15 = vunpack.c.l.s8.bf16 %v708_v11  ;;  %v1106_v23 = vunpack.c.h.s8.bf16 %v708_v11  ;;  %v709_v27 = vld [vmem:[%s6087_s17 + $0x30] sm:$0xff] }
  0xc8   : > { %v703_v3 = vld [vmem:[%s6087_s17] sm:$0xff]  ;;  %v1119_v6 = vunpack.c.l.s8.bf16 %v715_v2  ;;  %v1120_v7 = vunpack.c.h.s8.bf16 %v715_v2  ;;  %v1121_v16 = vunpack.c.l.s8.bf16 %v716_v12  ;;  %v704_v17 = vld [vmem:[%s6087_s17 + $0x8] sm:$0xff]  ;;  %v1122_v24 = vunpack.c.h.s8.bf16 %v716_v12  ;;  %v717_v28 = vld [vmem:[%s6087_s17 + $0x70] sm:$0xff] }
  0xc9   : > { %v711_v8 = vld [vmem:[%s6087_s17 + $0x40] sm:$0xff]  ;;  %v1095_v9 = vunpack.c.l.s8.bf16 %v703_v3  ;;  %4231 = vmatprep.subr.bf16.mxu0 %v1103_v4  ;;  %v1096_v13 = vunpack.c.h.s8.bf16 %v703_v3  ;;  %v712_v18 = vld [vmem:[%s6087_s17 + $0x48] sm:$0xff]  ;;  %v1097_v21 = vunpack.c.l.s8.bf16 %v704_v17  ;;  %v507_v25 = vcombine.high %v6116_v19, %v6116_v19  ;;  %v705_v35 = vld [vmem:[%s6087_s17 + $0x10] sm:$0xff] }
  0xca   : > { %v1111_v10 = vunpack.c.l.s8.bf16 %v711_v8  ;;  %4253 = vmatprep.subr.bf16.mxu1 %v1119_v6  ;;  %v1112_v14 = vunpack.c.h.s8.bf16 %v711_v8  ;;  %v6119_v20 = vld [vmem:[%s6080_s30 + $0x8] sm:$0xff]  ;;  %v1113_v22 = vunpack.c.l.s8.bf16 %v712_v18  ;;  %v1098_v31 = vunpack.c.h.s8.bf16 %v704_v17  ;;  %v713_v36 = vld [vmem:[%s6087_s17 + $0x50] sm:$0xff]  ;;  %v6136_v55 = vld [vmem:[%s6080_s30 + $0x10] sm:$0xff] }
  0xcb   : > { %4232 = vmatpush3.bf16.msra.mxu0 %v1095_v9  ;;  %v508_v26 = vcombine.high %v6119_v20, %v6119_v20  ;;  %v606_v29 = vpack.c.bf16 %v507_v25, %v507_v25  ;;  %v1114_v32 = vunpack.c.h.s8.bf16 %v712_v18  ;;  %v1107_v33 = vunpack.c.l.s8.bf16 %v709_v27  ;;  %v710_v41 = vld [vmem:[%s6087_s17 + $0x38] sm:$0xff]  ;;  %v723_v53 = vld [vmem:[%s6087_s17 + $0xa0] sm:$0xff]  ;;  %v6139_v56 = vld [vmem:[%s6080_s30 + $0x18] sm:$0xff] }
  0xcc   : > { %4254 = vmatpush3.bf16.msra.mxu1 %v1111_v10  ;;  %4233 = vmatprep.subr.bf16.mxu0 %v1104_v5  ;;  %v1123_v34 = vunpack.c.l.s8.bf16 %v717_v28  ;;  %v1099_v37 = vunpack.c.l.s8.bf16 %v705_v35  ;;  %v1115_v38 = vunpack.c.l.s8.bf16 %v713_v36  ;;  %v1108_v39 = vunpack.c.h.s8.bf16 %v709_v27  ;;  %v718_v42 = vld [vmem:[%s6087_s17 + $0x78] sm:$0xff]  ;;  %v731_v54 = vld [vmem:[%s6087_s17 + $0xe0] sm:$0xff]  ;;  %v732_v8 = vld [vmem:[%s6087_s17 + $0xe8] sm:$0xff] }
  0xcd   : > { %4255 = vmatprep.subr.bf16.mxu1 %v1120_v7  ;;  %v608_v30 = vpack.c.bf16 %v508_v26, %v508_v26  ;;  %1911 = vmatprep.mubr.bf16.mxu0 %v606_v29  ;;  %v1124_v40 = vunpack.c.h.s8.bf16 %v717_v28  ;;  %v1100_v43 = vunpack.c.h.s8.bf16 %v705_v35  ;;  %v1116_v44 = vunpack.c.h.s8.bf16 %v713_v36  ;;  %v706_v47 = vld [vmem:[%s6087_s17 + $0x18] sm:$0xff]  ;;  %v719_v60 = vld [vmem:[%s6087_s17 + $0x80] sm:$0xff]  ;;  %v724_v7 = vld [vmem:[%s6087_s17 + $0xa8] sm:$0xff] }
  0xce   : > { %v1109_v45 = vunpack.c.l.s8.bf16 %v710_v41  ;;  %v1125_v46 = vunpack.c.l.s8.bf16 %v718_v42  ;;  %v714_v48 = vld [vmem:[%s6087_s17 + $0x58] sm:$0xff]  ;;  %v1101_v49 = vunpack.c.l.s8.bf16 %v706_v47  ;;  %v1110_v51 = vunpack.c.h.s8.bf16 %v710_v41  ;;  %v727_v62 = vld [vmem:[%s6087_s17 + $0xc0] sm:$0xff]  ;;  %v721_v26 = vld [vmem:[%s6087_s17 + $0x90] sm:$0xff] }
  0xcf   : > { %4234 = vmatpush3.bf16.msra.mxu0 %v1096_v13  ;;  %1951 = vmatprep.mubr.bf16.mxu1 %v608_v30  ;;  %v1117_v50 = vunpack.c.l.s8.bf16 %v714_v48  ;;  %v1126_v52 = vunpack.c.h.s8.bf16 %v718_v42  ;;  %v1102_v57 = vunpack.c.h.s8.bf16 %v706_v47  ;;  %v1118_v58 = vunpack.c.h.s8.bf16 %v714_v48  ;;  %v729_v28 = vld [vmem:[%s6087_s17 + $0xd0] sm:$0xff]  ;;  %v6169_v48 = vld [vmem:[%s6080_s30 + $0x28] sm:$0xff] }
  0xd0   : > { %4256 = vmatpush3.bf16.msra.mxu1 %v1112_v14  ;;  %4235 = vmatprep.subr.bf16.mxu0 %v1105_v15  ;;  %v1135_v59 = vunpack.c.l.s8.bf16 %v723_v53  ;;  %v1151_v61 = vunpack.c.l.s8.bf16 %v731_v54  ;;  %v509_v63 = vcombine.high %v6136_v55, %v6136_v55  ;;  %v510_v0 = vcombine.high %v6139_v56, %v6139_v56  ;;  %v720_v14 = vld [vmem:[%s6087_s17 + $0x88] sm:$0xff]  ;;  %v6166_v47 = vld [vmem:[%s6080_s30 + $0x20] sm:$0xff] }
  0xd1   : > { %4257 = vmatprep.subr.bf16.mxu1 %v1121_v16  ;;  %v605_v1 = vpack.c.bf16 %v6116_v19, %v6116_v19  ;;  %v607_v2 = vpack.c.bf16 %v6119_v20, %v6119_v20  ;;  %v1127_v3 = vunpack.c.l.s8.bf16 %v719_v60  ;;  %v1143_v4 = vunpack.c.l.s8.bf16 %v727_v62  ;;  %v728_v16 = vld [vmem:[%s6087_s17 + $0xc8] sm:$0xff] }
  0xd2   : > { %v1136_v5 = vunpack.c.h.s8.bf16 %v723_v53  ;;  %v1152_v6 = vunpack.c.h.s8.bf16 %v731_v54  ;;  %v610_v9 = vpack.c.bf16 %v509_v63, %v509_v63  ;;  %v612_v10 = vpack.c.bf16 %v510_v0, %v510_v0  ;;  %v743_v54 = vld [vmem:[%s6087_s17 + $0x140] sm:$0xff] }
  0xd3   : > { %4236 = vmatpush3.bf16.msra.mxu0 %v1097_v21  ;;  %v1128_v11 = vunpack.c.h.s8.bf16 %v719_v60  ;;  %v1144_v12 = vunpack.c.h.s8.bf16 %v727_v62  ;;  %v1137_v13 = vunpack.c.l.s8.bf16 %v724_v7  ;;  %v1153_v15 = vunpack.c.l.s8.bf16 %v732_v8  ;;  %v725_v21 = vld [vmem:[%s6087_s17 + $0xb0] sm:$0xff] }
  0xd4   : > { %4258 = vmatpush3.bf16.msra.mxu1 %v1113_v22  ;;  %4237 = vmatprep.subr.bf16.mxu0 %v1106_v23  ;;  %v1129_v17 = vunpack.c.l.s8.bf16 %v720_v14  ;;  %v1145_v18 = vunpack.c.l.s8.bf16 %v728_v16  ;;  %v1138_v19 = vunpack.c.h.s8.bf16 %v724_v7  ;;  %v1154_v20 = vunpack.c.h.s8.bf16 %v732_v8  ;;  %v733_v22 = vld [vmem:[%s6087_s17 + $0xf0] sm:$0xff]  ;;  %v744_v8 = vld [vmem:[%s6087_s17 + $0x148] sm:$0xff] }
  0xd5   : > { %4259 = vmatprep.subr.bf16.mxu1 %v1122_v24  ;;  %v1130_v23 = vunpack.c.h.s8.bf16 %v720_v14  ;;  %v1146_v24 = vunpack.c.h.s8.bf16 %v728_v16  ;;  %v1139_v25 = vunpack.c.l.s8.bf16 %v725_v21  ;;  %v1155_v27 = vunpack.c.l.s8.bf16 %v733_v22  ;;  %v749_v14 = vld [vmem:[%s6087_s17 + $0x170] sm:$0xff] }
  0xd6   : > { %v1131_v29 = vunpack.c.l.s8.bf16 %v721_v26  ;;  %v1147_v30 = vunpack.c.l.s8.bf16 %v729_v28  ;;  %v1132_v35 = vunpack.c.h.s8.bf16 %v721_v26  ;;  %v1148_v36 = vunpack.c.h.s8.bf16 %v729_v28  ;;  %v750_v26 = vld [vmem:[%s6087_s17 + $0x178] sm:$0xff] }
  0xd7   : > { %4238 = vmatpush3.bf16.msra.mxu0 %v1098_v31  ;;  %v1140_v31 = vunpack.c.h.s8.bf16 %v725_v21  ;;  %v611_v60 = vpack.c.bf16 %v6139_v56, %v6139_v56  ;;  %v1175_v62 = vunpack.c.l.s8.bf16 %v743_v54  ;;  %v1176_v56 = vunpack.c.h.s8.bf16 %v743_v54 }
  0xd8   : > { %4260 = vmatpush3.bf16.msra.mxu1 %v1114_v32  ;;  %4239 = vmatprep.subr.bf16.mxu0 %v1107_v33  ;;  %v1156_v32 = vunpack.c.h.s8.bf16 %v733_v22  ;;  %v726_v33 = vld [vmem:[%s6087_s17 + $0xb8] sm:$0xff]  ;;  %v1178_v16 = vunpack.c.h.s8.bf16 %v744_v8  ;;  %vm5785_vm0 = vmmov (!%p4207_p4), 0   ;;  %vm4016_vm1 = vcmask (!%p4207_p4), 523264  }
  0xd9   : > { %4261 = vmatprep.subr.bf16.mxu1 %v1123_v34  ;;  %v734_v34 = vld [vmem:[%s6087_s17 + $0xf8] sm:$0xff]  ;;  %vm4060_vm2 = vcmask (!%p4207_p4), 76800  }
  0xdb   : > { %4240 = vmatpush3.bf16.msra.mxu0 %v1099_v37  ;;  %v1141_v37 = vunpack.c.l.s8.bf16 %v726_v33 }
  0xdc   : > { %4262 = vmatpush3.bf16.msra.mxu1 %v1115_v38  ;;  %4241 = vmatprep.subr.bf16.mxu0 %v1108_v39  ;;  %v722_v38 = vld [vmem:[%s6087_s17 + $0x98] sm:$0xff]  ;;  %v1157_v39 = vunpack.c.l.s8.bf16 %v734_v34 }
  0xdd   : > { %4263 = vmatprep.subr.bf16.mxu1 %v1124_v40  ;;  %v730_v40 = vld [vmem:[%s6087_s17 + $0xd8] sm:$0xff]  ;;  %v1133_v41 = vunpack.c.l.s8.bf16 %v722_v38 }
  0xde   : > { %v1149_v42 = vunpack.c.l.s8.bf16 %v730_v40 }
  0xdf   : > { %4242 = vmatpush3.bf16.msra.mxu0 %v1100_v43  ;;  %v1142_v43 = vunpack.c.h.s8.bf16 %v726_v33 }
  0xe0   : > { %4264 = vmatpush3.bf16.msra.mxu1 %v1116_v44  ;;  %4243 = vmatprep.subr.bf16.mxu0 %v1109_v45  ;;  %v1158_v44 = vunpack.c.h.s8.bf16 %v734_v34  ;;  %v739_v45 = vld [vmem:[%s6087_s17 + $0x120] sm:$0xff] }
  0xe1   : > { %4265 = vmatprep.subr.bf16.mxu1 %v1125_v46  ;;  %v747_v46 = vld [vmem:[%s6087_s17 + $0x160] sm:$0xff]  ;;  %v1168_v63 = vunpack.c.h.s8.bf16 %v739_v45 }
  0xe2   : > { %v1183_v53 = vunpack.c.l.s8.bf16 %v747_v46  ;;  %v1184_v0 = vunpack.c.h.s8.bf16 %v747_v46  ;;  %v759_v46 = vld [vmem:[%s6087_s17 + $0x1c0] sm:$0xff] }
  0xe3   : > { %4244 = vmatpush3.bf16.msra.mxu0 %v1101_v49  ;;  %v1134_v49 = vunpack.c.h.s8.bf16 %v722_v38  ;;  %v763_v38 = vld [vmem:[%s6087_s17 + $0x1e0] sm:$0xff]  ;;  %v1207_v54 = vunpack.c.l.s8.bf16 %v759_v46 }
  0xe4   : > { %4266 = vmatpush3.bf16.msra.mxu1 %v1117_v50  ;;  %4245 = vmatprep.subr.bf16.mxu0 %v1110_v51  ;;  %v1150_v50 = vunpack.c.h.s8.bf16 %v730_v40  ;;  %v1167_v51 = vunpack.c.l.s8.bf16 %v739_v45  ;;  %v6199_v40 = vld [vmem:[%s6080_s30 + $0x38] sm:$0xff]  ;;  %v1215_v45 = vunpack.c.l.s8.bf16 %v763_v38 }
  0xe5   : > { %4267 = vmatprep.subr.bf16.mxu1 %v1126_v52  ;;  %v735_v52 = vld [vmem:[%s6087_s17 + $0x100] sm:$0xff] }
  0xe7   : > { %4246 = vmatpush3.bf16.msra.mxu0 %v1102_v57  ;;  %v511_v57 = vcombine.high %v6166_v47, %v6166_v47 }
  0xe8   : > { %4268 = vmatpush3.bf16.msra.mxu1 %v1118_v58  ;;  %4275 = vmatprep.subr.bf16.mxu0 %v1135_v59  ;;  %v512_v58 = vcombine.high %v6169_v48, %v6169_v48  ;;  %v609_v59 = vpack.c.bf16 %v6136_v55, %v6136_v55  ;;  %v1160_v55 = vunpack.c.h.s8.bf16 %v735_v52 }
  0xe9   : > { %4297 = vmatprep.subr.bf16.mxu1 %v1151_v61  ;;  %v1159_v61 = vunpack.c.l.s8.bf16 %v735_v52  ;;  %v615_v52 = vpack.c.bf16 %v6169_v48, %v6169_v48  ;;  %v1208_v48 = vunpack.c.h.s8.bf16 %v759_v46 }
  0xea   : > { %1912 = vmatmul.mubr.bf16.vlgmr.msra.gmra.mrb[0].mxu0 %v605_v1  ;;  %v740_v1 = vld [vmem:[%s6087_s17 + $0x128] sm:$0xff] }
  0xeb   : > { %1952 = vmatmul.mubr.bf16.vlgmr.msra.gmra.mrb[0].mxu1 %v607_v2  ;;  %4276 = vmatpush3.bf16.msra.mxu0 %v1127_v3  ;;  %v748_v2 = vld [vmem:[%s6087_s17 + $0x168] sm:$0xff]  ;;  %v614_v3 = vpack.c.bf16 %v511_v57, %v511_v57 }
  0xec   : > { %4298 = vmatpush3.bf16.msra.mxu1 %v1143_v4  ;;  %4277 = vmatprep.subr.bf16.mxu0 %v1136_v5  ;;  %v616_v4 = vpack.c.bf16 %v512_v58, %v512_v58  ;;  %v1169_v5 = vunpack.c.l.s8.bf16 %v740_v1  ;;  %v1185_v7 = vunpack.c.l.s8.bf16 %v748_v2  ;;  %v1216_v58 = vunpack.c.h.s8.bf16 %v763_v38  ;;  %v775_v38 = vld [vmem:[%s6087_s17 + $0x240] sm:$0xff] }
  0xed   : > { %4299 = vmatprep.subr.bf16.mxu1 %v1152_v6  ;;  %1991 = vmatprep.mubr.bf16.mxu0 %v610_v9  ;;  %v736_v6 = vld [vmem:[%s6087_s17 + $0x108] sm:$0xff]  ;;  %v1239_v46 = vunpack.c.l.s8.bf16 %v775_v38 }
  0xee   : > { %2031 = vmatprep.mubr.bf16.mxu1 %v612_v10  ;;  %v1161_v9 = vunpack.c.l.s8.bf16 %v736_v6  ;;  %v1177_v10 = vunpack.c.l.s8.bf16 %v744_v8 }
  0xef   : > { %4278 = vmatpush3.bf16.msra.mxu0 %v1128_v11  ;;  %v1170_v11 = vunpack.c.h.s8.bf16 %v740_v1 }
  0xf0   : > { %4300 = vmatpush3.bf16.msra.mxu1 %v1144_v12  ;;  %4279 = vmatprep.subr.bf16.mxu0 %v1137_v13  ;;  %v1186_v12 = vunpack.c.h.s8.bf16 %v748_v2  ;;  %v741_v13 = vld [vmem:[%s6087_s17 + $0x130] sm:$0xff]  ;;  %v760_v2 = vld [vmem:[%s6087_s17 + $0x1c8] sm:$0xff] }
  0xf1   : > { %4301 = vmatprep.subr.bf16.mxu1 %v1153_v15  ;;  %v1162_v15 = vunpack.c.h.s8.bf16 %v736_v6  ;;  %v765_v6 = vld [vmem:[%s6087_s17 + $0x1f0] sm:$0xff]  ;;  %v1210_v8 = vunpack.c.h.s8.bf16 %v760_v2 }
  0xf3   : > { %4280 = vmatpush3.bf16.msra.mxu0 %v1129_v17  ;;  %v1171_v17 = vunpack.c.l.s8.bf16 %v741_v13 }
  0xf4   : > { %4302 = vmatpush3.bf16.msra.mxu1 %v1145_v18  ;;  %4281 = vmatprep.subr.bf16.mxu0 %v1138_v19  ;;  %v737_v18 = vld [vmem:[%s6087_s17 + $0x110] sm:$0xff]  ;;  %v1187_v19 = vunpack.c.l.s8.bf16 %v749_v14 }
  0xf5   : > { %4303 = vmatprep.subr.bf16.mxu1 %v1154_v20  ;;  %v745_v20 = vld [vmem:[%s6087_s17 + $0x150] sm:$0xff]  ;;  %v1163_v21 = vunpack.c.l.s8.bf16 %v737_v18 }
  0xf6   : > { %v1179_v22 = vunpack.c.l.s8.bf16 %v745_v20  ;;  %v1180_v28 = vunpack.c.h.s8.bf16 %v745_v20 }
  0xf7   : > { %4282 = vmatpush3.bf16.msra.mxu0 %v1130_v23  ;;  %v1172_v23 = vunpack.c.h.s8.bf16 %v741_v13 }
  0xf8   : > { %4304 = vmatpush3.bf16.msra.mxu1 %v1146_v24  ;;  %4283 = vmatprep.subr.bf16.mxu0 %v1139_v25  ;;  %v1188_v24 = vunpack.c.h.s8.bf16 %v749_v14  ;;  %v742_v25 = vld [vmem:[%s6087_s17 + $0x138] sm:$0xff] }
  0xf9   : > { %4305 = vmatprep.subr.bf16.mxu1 %v1155_v27  ;;  %v1164_v27 = vunpack.c.h.s8.bf16 %v737_v18  ;;  %v766_v18 = vld [vmem:[%s6087_s17 + $0x1f8] sm:$0xff] }
  0xfb   : > { %4284 = vmatpush3.bf16.msra.mxu0 %v1131_v29  ;;  %v1173_v29 = vunpack.c.l.s8.bf16 %v742_v25 }
  0xfc   : > { %4306 = vmatpush3.bf16.msra.mxu1 %v1147_v30  ;;  %4285 = vmatprep.subr.bf16.mxu0 %v1140_v31  ;;  %v738_v30 = vld [vmem:[%s6087_s17 + $0x118] sm:$0xff]  ;;  %v1189_v31 = vunpack.c.l.s8.bf16 %v750_v26 }
  0xfd   : > { %4307 = vmatprep.subr.bf16.mxu1 %v1156_v32  ;;  %v746_v32 = vld [vmem:[%s6087_s17 + $0x158] sm:$0xff]  ;;  %v1165_v33 = vunpack.c.l.s8.bf16 %v738_v30 }
  0xfe   : > { %v1181_v34 = vunpack.c.l.s8.bf16 %v746_v32 }
  0xff   : > { %4286 = vmatpush3.bf16.msra.mxu0 %v1132_v35  ;;  %v1174_v35 = vunpack.c.h.s8.bf16 %v742_v25 }
 0x100   : > { %4308 = vmatpush3.bf16.msra.mxu1 %v1148_v36  ;;  %4287 = vmatprep.subr.bf16.mxu0 %v1141_v37  ;;  %v1190_v36 = vunpack.c.h.s8.bf16 %v750_v26  ;;  %v755_v37 = vld [vmem:[%s6087_s17 + $0x1a0] sm:$0xff] }
 0x101   : > { %4309 = vmatprep.subr.bf16.mxu1 %v1157_v39  ;;  %v6196_v39 = vld [vmem:[%s6080_s30 + $0x30] sm:$0xff]  ;;  %v1200_v57 = vunpack.c.h.s8.bf16 %v755_v37 }
 0x103   : > { %4288 = vmatpush3.bf16.msra.mxu0 %v1133_v41  ;;  %v1166_v41 = vunpack.c.h.s8.bf16 %v738_v30  ;;  %v779_v30 = vld [vmem:[%s6087_s17 + $0x260] sm:$0xff] }
 0x104   : > { %4310 = vmatpush3.bf16.msra.mxu1 %v1149_v42  ;;  %4289 = vmatprep.subr.bf16.mxu0 %v1142_v43  ;;  %v1182_v42 = vunpack.c.h.s8.bf16 %v746_v32  ;;  %v1199_v43 = vunpack.c.l.s8.bf16 %v755_v37  ;;  %v6229_v32 = vld [vmem:[%s6080_s30 + $0x48] sm:$0xff]  ;;  %v1247_v37 = vunpack.c.l.s8.bf16 %v779_v30 }
 0x105   : > { %4311 = vmatprep.subr.bf16.mxu1 %v1158_v44  ;;  %v751_v44 = vld [vmem:[%s6087_s17 + $0x180] sm:$0xff] }
 0x107   : > { %4290 = vmatpush3.bf16.msra.mxu0 %v1134_v49  ;;  %v513_v49 = vcombine.high %v6196_v39, %v6196_v39 }
 0x108   : > { %4312 = vmatpush3.bf16.msra.mxu1 %v1150_v50  ;;  %4319 = vmatprep.subr.bf16.mxu0 %v1167_v51  ;;  %v514_v50 = vcombine.high %v6199_v40, %v6199_v40  ;;  %v613_v51 = vpack.c.bf16 %v6166_v47, %v6166_v47  ;;  %v1192_v47 = vunpack.c.h.s8.bf16 %v751_v44 }
 0x109   : > { %4341 = vmatprep.subr.bf16.mxu1 %v1183_v53  ;;  %v1191_v53 = vunpack.c.l.s8.bf16 %v751_v44  ;;  %v619_v44 = vpack.c.bf16 %v6199_v40, %v6199_v40  ;;  %v1240_v40 = vunpack.c.h.s8.bf16 %v775_v38 }
 0x10a   : > { %1992 = vmatmul.mubr.bf16.vlgmr.msra.gmra.mrb[4].mxu0 %v609_v59  ;;  %v756_v59 = vld [vmem:[%s6087_s17 + $0x1a8] sm:$0xff] }
 0x10b   : > { %2032 = vmatmul.mubr.bf16.vlgmr.msra.gmra.mrb[4].mxu1 %v611_v60  ;;  %4320 = vmatpush3.bf16.msra.mxu0 %v1159_v61  ;;  %v764_v60 = vld [vmem:[%s6087_s17 + $0x1e8] sm:$0xff]  ;;  %v618_v61 = vpack.c.bf16 %v513_v49, %v513_v49 }
 0x10c   : > { %4342 = vmatpush3.bf16.msra.mxu1 %v1175_v62  ;;  %4321 = vmatprep.subr.bf16.mxu0 %v1168_v63  ;;  %v620_v62 = vpack.c.bf16 %v514_v50, %v514_v50  ;;  %v1201_v63 = vunpack.c.l.s8.bf16 %v756_v59  ;;  %v1217_v1 = vunpack.c.l.s8.bf16 %v764_v60  ;;  %v1248_v50 = vunpack.c.h.s8.bf16 %v779_v30  ;;  %v791_v30 = vld [vmem:[%s6087_s17 + $0x2c0] sm:$0xff] }
 0x10d   : > { %4343 = vmatprep.subr.bf16.mxu1 %v1184_v0  ;;  %2071 = vmatprep.mubr.bf16.mxu0 %v614_v3  ;;  %v752_v0 = vld [vmem:[%s6087_s17 + $0x188] sm:$0xff]  ;;  %v1271_v38 = vunpack.c.l.s8.bf16 %v791_v30 }
 0x10e   : > { %2111 = vmatprep.mubr.bf16.mxu1 %v616_v4  ;;  %v1193_v3 = vunpack.c.l.s8.bf16 %v752_v0  ;;  %v1209_v4 = vunpack.c.l.s8.bf16 %v760_v2 }
 0x10f   : > { %4322 = vmatpush3.bf16.msra.mxu0 %v1160_v55  ;;  %v1202_v55 = vunpack.c.h.s8.bf16 %v756_v59 }
 0x110   : > { %4344 = vmatpush3.bf16.msra.mxu1 %v1176_v56  ;;  %4323 = vmatprep.subr.bf16.mxu0 %v1169_v5  ;;  %v1218_v56 = vunpack.c.h.s8.bf16 %v764_v60  ;;  %v757_v5 = vld [vmem:[%s6087_s17 + $0x1b0] sm:$0xff]  ;;  %v776_v60 = vld [vmem:[%s6087_s17 + $0x248] sm:$0xff] }
 0x111   : > { %4345 = vmatprep.subr.bf16.mxu1 %v1185_v7  ;;  %v1194_v7 = vunpack.c.h.s8.bf16 %v752_v0  ;;  %v781_v0 = vld [vmem:[%s6087_s17 + $0x270] sm:$0xff]  ;;  %v1242_v2 = vunpack.c.h.s8.bf16 %v776_v60 }
 0x113   : > { %4324 = vmatpush3.bf16.msra.mxu0 %v1161_v9  ;;  %v1203_v9 = vunpack.c.l.s8.bf16 %v757_v5 }
 0x114   : > { %4346 = vmatpush3.bf16.msra.mxu1 %v1177_v10  ;;  %4325 = vmatprep.subr.bf16.mxu0 %v1170_v11  ;;  %v753_v10 = vld [vmem:[%s6087_s17 + $0x190] sm:$0xff]  ;;  %v1219_v11 = vunpack.c.l.s8.bf16 %v765_v6 }
 0x115   : > { %4347 = vmatprep.subr.bf16.mxu1 %v1186_v12  ;;  %v761_v12 = vld [vmem:[%s6087_s17 + $0x1d0] sm:$0xff]  ;;  %v1195_v13 = vunpack.c.l.s8.bf16 %v753_v10 }
 0x116   : > { %v1211_v14 = vunpack.c.l.s8.bf16 %v761_v12  ;;  %v1212_v20 = vunpack.c.h.s8.bf16 %v761_v12 }
 0x117   : > { %4326 = vmatpush3.bf16.msra.mxu0 %v1162_v15  ;;  %v1204_v15 = vunpack.c.h.s8.bf16 %v757_v5 }
 0x118   : > { %4348 = vmatpush3.bf16.msra.mxu1 %v1178_v16  ;;  %4327 = vmatprep.subr.bf16.mxu0 %v1171_v17  ;;  %v1220_v16 = vunpack.c.h.s8.bf16 %v765_v6  ;;  %v758_v17 = vld [vmem:[%s6087_s17 + $0x1b8] sm:$0xff] }
 0x119   : > { %4349 = vmatprep.subr.bf16.mxu1 %v1187_v19  ;;  %v1196_v19 = vunpack.c.h.s8.bf16 %v753_v10  ;;  %v782_v10 = vld [vmem:[%s6087_s17 + $0x278] sm:$0xff] }
 0x11b   : > { %4328 = vmatpush3.bf16.msra.mxu0 %v1163_v21  ;;  %v1205_v21 = vunpack.c.l.s8.bf16 %v758_v17 }
 0x11c   : > { %4350 = vmatpush3.bf16.msra.mxu1 %v1179_v22  ;;  %4329 = vmatprep.subr.bf16.mxu0 %v1172_v23  ;;  %v754_v22 = vld [vmem:[%s6087_s17 + $0x198] sm:$0xff]  ;;  %v1221_v23 = vunpack.c.l.s8.bf16 %v766_v18 }
 0x11d   : > { %4351 = vmatprep.subr.bf16.mxu1 %v1188_v24  ;;  %v762_v24 = vld [vmem:[%s6087_s17 + $0x1d8] sm:$0xff]  ;;  %v1197_v25 = vunpack.c.l.s8.bf16 %v754_v22 }
 0x11e   : > { %v1213_v26 = vunpack.c.l.s8.bf16 %v762_v24 }
 0x11f   : > { %4330 = vmatpush3.bf16.msra.mxu0 %v1164_v27  ;;  %v1206_v27 = vunpack.c.h.s8.bf16 %v758_v17 }
 0x120   : > { %4352 = vmatpush3.bf16.msra.mxu1 %v1180_v28  ;;  %4331 = vmatprep.subr.bf16.mxu0 %v1173_v29  ;;  %v1222_v28 = vunpack.c.h.s8.bf16 %v766_v18  ;;  %v771_v29 = vld [vmem:[%s6087_s17 + $0x220] sm:$0xff] }
 0x121   : > { %4353 = vmatprep.subr.bf16.mxu1 %v1189_v31  ;;  %v6226_v31 = vld [vmem:[%s6080_s30 + $0x40] sm:$0xff]  ;;  %v1232_v49 = vunpack.c.h.s8.bf16 %v771_v29 }
 0x123   : > { %4332 = vmatpush3.bf16.msra.mxu0 %v1165_v33  ;;  %v1198_v33 = vunpack.c.h.s8.bf16 %v754_v22  ;;  %v795_v22 = vld [vmem:[%s6087_s17 + $0x2e0] sm:$0xff] }
 0x124   : > { %4354 = vmatpush3.bf16.msra.mxu1 %v1181_v34  ;;  %4333 = vmatprep.subr.bf16.mxu0 %v1174_v35  ;;  %v1214_v34 = vunpack.c.h.s8.bf16 %v762_v24  ;;  %v1231_v35 = vunpack.c.l.s8.bf16 %v771_v29  ;;  %v6259_v24 = vld [vmem:[%s6080_s30 + $0x58] sm:$0xff]  ;;  %v1279_v29 = vunpack.c.l.s8.bf16 %v795_v22 }
 0x125   : > { %4355 = vmatprep.subr.bf16.mxu1 %v1190_v36  ;;  %v767_v36 = vld [vmem:[%s6087_s17 + $0x200] sm:$0xff] }
 0x127   : > { %4334 = vmatpush3.bf16.msra.mxu0 %v1166_v41  ;;  %v515_v41 = vcombine.high %v6226_v31, %v6226_v31 }
 0x128   : > { %4356 = vmatpush3.bf16.msra.mxu1 %v1182_v42  ;;  %4363 = vmatprep.subr.bf16.mxu0 %v1199_v43  ;;  %v516_v42 = vcombine.high %v6229_v32, %v6229_v32  ;;  %v617_v43 = vpack.c.bf16 %v6196_v39, %v6196_v39  ;;  %v1224_v39 = vunpack.c.h.s8.bf16 %v767_v36 }
 0x129   : > { %4385 = vmatprep.subr.bf16.mxu1 %v1215_v45  ;;  %v1223_v45 = vunpack.c.l.s8.bf16 %v767_v36  ;;  %v623_v36 = vpack.c.bf16 %v6229_v32, %v6229_v32  ;;  %v1272_v32 = vunpack.c.h.s8.bf16 %v791_v30 }
 0x12a   : > { %2072 = vmatmul.mubr.bf16.vlgmr.msra.gmra.mrb[8].mxu0 %v613_v51  ;;  %v772_v51 = vld [vmem:[%s6087_s17 + $0x228] sm:$0xff] }
 0x12b   : > { %2112 = vmatmul.mubr.bf16.vlgmr.msra.gmra.mrb[8].mxu1 %v615_v52  ;;  %4364 = vmatpush3.bf16.msra.mxu0 %v1191_v53  ;;  %v780_v52 = vld [vmem:[%s6087_s17 + $0x268] sm:$0xff]  ;;  %v622_v53 = vpack.c.bf16 %v515_v41, %v515_v41 }
 0x12c   : > { %4386 = vmatpush3.bf16.msra.mxu1 %v1207_v54  ;;  %4365 = vmatprep.subr.bf16.mxu0 %v1200_v57  ;;  %v624_v54 = vpack.c.bf16 %v516_v42, %v516_v42  ;;  %v1233_v57 = vunpack.c.l.s8.bf16 %v772_v51  ;;  %v1249_v59 = vunpack.c.l.s8.bf16 %v780_v52  ;;  %v1280_v42 = vunpack.c.h.s8.bf16 %v795_v22  ;;  %v807_v22 = vld [vmem:[%s6087_s17 + $0x340] sm:$0xff] }
 0x12d   : > { %4387 = vmatprep.subr.bf16.mxu1 %v1216_v58  ;;  %2151 = vmatprep.mubr.bf16.mxu0 %v618_v61  ;;  %v768_v58 = vld [vmem:[%s6087_s17 + $0x208] sm:$0xff]  ;;  %v1303_v30 = vunpack.c.l.s8.bf16 %v807_v22 }
 0x12e   : > { %2191 = vmatprep.mubr.bf16.mxu1 %v620_v62  ;;  %v1225_v61 = vunpack.c.l.s8.bf16 %v768_v58  ;;  %v1241_v62 = vunpack.c.l.s8.bf16 %v776_v60 }
 0x12f   : > { %4366 = vmatpush3.bf16.msra.mxu0 %v1192_v47  ;;  %v1234_v47 = vunpack.c.h.s8.bf16 %v772_v51 }
 0x130   : > { %4388 = vmatpush3.bf16.msra.mxu1 %v1208_v48  ;;  %4367 = vmatprep.subr.bf16.mxu0 %v1201_v63  ;;  %v1250_v48 = vunpack.c.h.s8.bf16 %v780_v52  ;;  %v773_v63 = vld [vmem:[%s6087_s17 + $0x230] sm:$0xff]  ;;  %v792_v52 = vld [vmem:[%s6087_s17 + $0x2c8] sm:$0xff] }
 0x131   : > { %4389 = vmatprep.subr.bf16.mxu1 %v1217_v1  ;;  %v1226_v1 = vunpack.c.h.s8.bf16 %v768_v58  ;;  %v797_v58 = vld [vmem:[%s6087_s17 + $0x2f0] sm:$0xff]  ;;  %v1274_v60 = vunpack.c.h.s8.bf16 %v792_v52 }
 0x133   : > { %4368 = vmatpush3.bf16.msra.mxu0 %v1193_v3  ;;  %v1235_v3 = vunpack.c.l.s8.bf16 %v773_v63 }
 0x134   : > { %4390 = vmatpush3.bf16.msra.mxu1 %v1209_v4  ;;  %4369 = vmatprep.subr.bf16.mxu0 %v1202_v55  ;;  %v769_v4 = vld [vmem:[%s6087_s17 + $0x210] sm:$0xff]  ;;  %v1251_v55 = vunpack.c.l.s8.bf16 %v781_v0 }
 0x135   : > { %4391 = vmatprep.subr.bf16.mxu1 %v1218_v56  ;;  %v777_v56 = vld [vmem:[%s6087_s17 + $0x250] sm:$0xff]  ;;  %v1227_v5 = vunpack.c.l.s8.bf16 %v769_v4 }
 0x136   : > { %v1243_v6 = vunpack.c.l.s8.bf16 %v777_v56  ;;  %v1244_v12 = vunpack.c.h.s8.bf16 %v777_v56 }
 0x137   : > { %4370 = vmatpush3.bf16.msra.mxu0 %v1194_v7  ;;  %v1236_v7 = vunpack.c.h.s8.bf16 %v773_v63 }
 0x138   : > { %4392 = vmatpush3.bf16.msra.mxu1 %v1210_v8  ;;  %4371 = vmatprep.subr.bf16.mxu0 %v1203_v9  ;;  %v1252_v8 = vunpack.c.h.s8.bf16 %v781_v0  ;;  %v774_v9 = vld [vmem:[%s6087_s17 + $0x238] sm:$0xff] }
 0x139   : > { %4393 = vmatprep.subr.bf16.mxu1 %v1219_v11  ;;  %v1228_v11 = vunpack.c.h.s8.bf16 %v769_v4  ;;  %v798_v4 = vld [vmem:[%s6087_s17 + $0x2f8] sm:$0xff] }
 0x13b   : > { %4372 = vmatpush3.bf16.msra.mxu0 %v1195_v13  ;;  %v1237_v13 = vunpack.c.l.s8.bf16 %v774_v9 }
 0x13c   : > { %4394 = vmatpush3.bf16.msra.mxu1 %v1211_v14  ;;  %4373 = vmatprep.subr.bf16.mxu0 %v1204_v15  ;;  %v770_v14 = vld [vmem:[%s6087_s17 + $0x218] sm:$0xff]  ;;  %v1253_v15 = vunpack.c.l.s8.bf16 %v782_v10 }
 0x13d   : > { %4395 = vmatprep.subr.bf16.mxu1 %v1220_v16  ;;  %v778_v16 = vld [vmem:[%s6087_s17 + $0x258] sm:$0xff]  ;;  %v1229_v17 = vunpack.c.l.s8.bf16 %v770_v14 }
 0x13e   : > { %v1245_v18 = vunpack.c.l.s8.bf16 %v778_v16 }
 0x13f   : > { %4374 = vmatpush3.bf16.msra.mxu0 %v1196_v19  ;;  %v1238_v19 = vunpack.c.h.s8.bf16 %v774_v9 }
 0x140   : > { %4396 = vmatpush3.bf16.msra.mxu1 %v1212_v20  ;;  %4375 = vmatprep.subr.bf16.mxu0 %v1205_v21  ;;  %v1254_v20 = vunpack.c.h.s8.bf16 %v782_v10  ;;  %v787_v21 = vld [vmem:[%s6087_s17 + $0x2a0] sm:$0xff] }
 0x141   : > { %4397 = vmatprep.subr.bf16.mxu1 %v1221_v23  ;;  %v6256_v23 = vld [vmem:[%s6080_s30 + $0x50] sm:$0xff]  ;;  %v1264_v41 = vunpack.c.h.s8.bf16 %v787_v21 }
 0x143   : > { %4376 = vmatpush3.bf16.msra.mxu0 %v1197_v25  ;;  %v1230_v25 = vunpack.c.h.s8.bf16 %v770_v14  ;;  %v811_v14 = vld [vmem:[%s6087_s17 + $0x360] sm:$0xff] }
 0x144   : > { %4398 = vmatpush3.bf16.msra.mxu1 %v1213_v26  ;;  %4377 = vmatprep.subr.bf16.mxu0 %v1206_v27  ;;  %v1246_v26 = vunpack.c.h.s8.bf16 %v778_v16  ;;  %v1263_v27 = vunpack.c.l.s8.bf16 %v787_v21  ;;  %v6289_v16 = vld [vmem:[%s6080_s30 + $0x68] sm:$0xff]  ;;  %v1311_v21 = vunpack.c.l.s8.bf16 %v811_v14 }
 0x145   : > { %4399 = vmatprep.subr.bf16.mxu1 %v1222_v28  ;;  %v783_v28 = vld [vmem:[%s6087_s17 + $0x280] sm:$0xff] }
 0x147   : > { %4378 = vmatpush3.bf16.msra.mxu0 %v1198_v33  ;;  %v517_v33 = vcombine.high %v6256_v23, %v6256_v23 }
 0x148   : > { %4400 = vmatpush3.bf16.msra.mxu1 %v1214_v34  ;;  %4407 = vmatprep.subr.bf16.mxu0 %v1231_v35  ;;  %v518_v34 = vcombine.high %v6259_v24, %v6259_v24  ;;  %v621_v35 = vpack.c.bf16 %v6226_v31, %v6226_v31  ;;  %v1256_v31 = vunpack.c.h.s8.bf16 %v783_v28 }
 0x149   : > { %4429 = vmatprep.subr.bf16.mxu1 %v1247_v37  ;;  %v1255_v37 = vunpack.c.l.s8.bf16 %v783_v28  ;;  %v627_v28 = vpack.c.bf16 %v6259_v24, %v6259_v24  ;;  %v1304_v24 = vunpack.c.h.s8.bf16 %v807_v22 }
 0x14a   : > { %2152 = vmatmul.mubr.bf16.vlgmr.msra.gmra.mrb[12].mxu0 %v617_v43  ;;  %v788_v43 = vld [vmem:[%s6087_s17 + $0x2a8] sm:$0xff] }
 0x14b   : > { %2192 = vmatmul.mubr.bf16.vlgmr.msra.gmra.mrb[12].mxu1 %v619_v44  ;;  %4408 = vmatpush3.bf16.msra.mxu0 %v1223_v45  ;;  %v796_v44 = vld [vmem:[%s6087_s17 + $0x2e8] sm:$0xff]  ;;  %v626_v45 = vpack.c.bf16 %v517_v33, %v517_v33 }
 0x14c   : > { %4430 = vmatpush3.bf16.msra.mxu1 %v1239_v46  ;;  %4409 = vmatprep.subr.bf16.mxu0 %v1232_v49  ;;  %v628_v46 = vpack.c.bf16 %v518_v34, %v518_v34  ;;  %v1265_v49 = vunpack.c.l.s8.bf16 %v788_v43  ;;  %v1281_v51 = vunpack.c.l.s8.bf16 %v796_v44  ;;  %v1312_v34 = vunpack.c.h.s8.bf16 %v811_v14  ;;  %v823_v14 = vld [vmem:[%s6087_s17 + $0x3c0] sm:$0xff] }
 0x14d   : > { %4431 = vmatprep.subr.bf16.mxu1 %v1248_v50  ;;  %2231 = vmatprep.mubr.bf16.mxu0 %v622_v53  ;;  %v784_v50 = vld [vmem:[%s6087_s17 + $0x288] sm:$0xff]  ;;  %v1335_v22 = vunpack.c.l.s8.bf16 %v823_v14 }
 0x14e   : > { %2271 = vmatprep.mubr.bf16.mxu1 %v624_v54  ;;  %v1257_v53 = vunpack.c.l.s8.bf16 %v784_v50  ;;  %v1273_v54 = vunpack.c.l.s8.bf16 %v792_v52 }
 0x14f   : > { %4410 = vmatpush3.bf16.msra.mxu0 %v1224_v39  ;;  %v1266_v39 = vunpack.c.h.s8.bf16 %v788_v43 }
 0x150   : > { %4432 = vmatpush3.bf16.msra.mxu1 %v1240_v40  ;;  %4411 = vmatprep.subr.bf16.mxu0 %v1233_v57  ;;  %v1282_v40 = vunpack.c.h.s8.bf16 %v796_v44  ;;  %v789_v57 = vld [vmem:[%s6087_s17 + $0x2b0] sm:$0xff]  ;;  %v808_v44 = vld [vmem:[%s6087_s17 + $0x348] sm:$0xff] }
 0x151   : > { %4433 = vmatprep.subr.bf16.mxu1 %v1249_v59  ;;  %v1258_v59 = vunpack.c.h.s8.bf16 %v784_v50  ;;  %v813_v50 = vld [vmem:[%s6087_s17 + $0x370] sm:$0xff]  ;;  %v1306_v52 = vunpack.c.h.s8.bf16 %v808_v44 }
 0x153   : > { %4412 = vmatpush3.bf16.msra.mxu0 %v1225_v61  ;;  %v1267_v61 = vunpack.c.l.s8.bf16 %v789_v57 }
 0x154   : > { %4434 = vmatpush3.bf16.msra.mxu1 %v1241_v62  ;;  %4413 = vmatprep.subr.bf16.mxu0 %v1234_v47  ;;  %v785_v62 = vld [vmem:[%s6087_s17 + $0x290] sm:$0xff]  ;;  %v1283_v47 = vunpack.c.l.s8.bf16 %v797_v58 }
 0x155   : > { %4435 = vmatprep.subr.bf16.mxu1 %v1250_v48  ;;  %v793_v48 = vld [vmem:[%s6087_s17 + $0x2d0] sm:$0xff]  ;;  %v1259_v63 = vunpack.c.l.s8.bf16 %v785_v62 }
 0x156   : > { %v1275_v0 = vunpack.c.l.s8.bf16 %v793_v48  ;;  %v1276_v56 = vunpack.c.h.s8.bf16 %v793_v48 }
 0x157   : > { %4414 = vmatpush3.bf16.msra.mxu0 %v1226_v1  ;;  %v1268_v1 = vunpack.c.h.s8.bf16 %v789_v57 }
 0x158   : > { %4436 = vmatpush3.bf16.msra.mxu1 %v1242_v2  ;;  %4415 = vmatprep.subr.bf16.mxu0 %v1235_v3  ;;  %v1284_v2 = vunpack.c.h.s8.bf16 %v797_v58  ;;  %v790_v3 = vld [vmem:[%s6087_s17 + $0x2b8] sm:$0xff] }
 0x159   : > { %4437 = vmatprep.subr.bf16.mxu1 %v1251_v55  ;;  %v1260_v55 = vunpack.c.h.s8.bf16 %v785_v62  ;;  %v814_v62 = vld [vmem:[%s6087_s17 + $0x378] sm:$0xff] }
 0x15b   : > { %4416 = vmatpush3.bf16.msra.mxu0 %v1227_v5  ;;  %v1269_v5 = vunpack.c.l.s8.bf16 %v790_v3 }
 0x15c   : > { %4438 = vmatpush3.bf16.msra.mxu1 %v1243_v6  ;;  %4417 = vmatprep.subr.bf16.mxu0 %v1236_v7  ;;  %v786_v6 = vld [vmem:[%s6087_s17 + $0x298] sm:$0xff]  ;;  %v1285_v7 = vunpack.c.l.s8.bf16 %v798_v4 }
 0x15d   : > { %4439 = vmatprep.subr.bf16.mxu1 %v1252_v8  ;;  %v794_v8 = vld [vmem:[%s6087_s17 + $0x2d8] sm:$0xff]  ;;  %v1261_v9 = vunpack.c.l.s8.bf16 %v786_v6 }
 0x15e   : > { %v1277_v10 = vunpack.c.l.s8.bf16 %v794_v8 }
 0x15f   : > { %4418 = vmatpush3.bf16.msra.mxu0 %v1228_v11  ;;  %v1270_v11 = vunpack.c.h.s8.bf16 %v790_v3 }
 0x160   : > { %4440 = vmatpush3.bf16.msra.mxu1 %v1244_v12  ;;  %4419 = vmatprep.subr.bf16.mxu0 %v1237_v13  ;;  %v1286_v12 = vunpack.c.h.s8.bf16 %v798_v4  ;;  %v803_v13 = vld [vmem:[%s6087_s17 + $0x320] sm:$0xff] }
 0x161   : > { %4441 = vmatprep.subr.bf16.mxu1 %v1253_v15  ;;  %v6286_v15 = vld [vmem:[%s6080_s30 + $0x60] sm:$0xff]  ;;  %v1296_v33 = vunpack.c.h.s8.bf16 %v803_v13 }
 0x163   : > { %4420 = vmatpush3.bf16.msra.mxu0 %v1229_v17  ;;  %v1262_v17 = vunpack.c.h.s8.bf16 %v786_v6  ;;  %v827_v6 = vld [vmem:[%s6087_s17 + $0x3e0] sm:$0xff] }
 0x164   : > { %4442 = vmatpush3.bf16.msra.mxu1 %v1245_v18  ;;  %4421 = vmatprep.subr.bf16.mxu0 %v1238_v19  ;;  %v1278_v18 = vunpack.c.h.s8.bf16 %v794_v8  ;;  %v1295_v19 = vunpack.c.l.s8.bf16 %v803_v13  ;;  %v6319_v8 = vld [vmem:[%s6080_s30 + $0x78] sm:$0xff]  ;;  %v1343_v13 = vunpack.c.l.s8.bf16 %v827_v6 }
 0x165   : > { %4443 = vmatprep.subr.bf16.mxu1 %v1254_v20  ;;  %v799_v20 = vld [vmem:[%s6087_s17 + $0x300] sm:$0xff] }
 0x167   : > { %4422 = vmatpush3.bf16.msra.mxu0 %v1230_v25  ;;  %v519_v25 = vcombine.high %v6286_v15, %v6286_v15 }
 0x168   : > { %4444 = vmatpush3.bf16.msra.mxu1 %v1246_v26  ;;  %4451 = vmatprep.subr.bf16.mxu0 %v1263_v27  ;;  %v520_v26 = vcombine.high %v6289_v16, %v6289_v16  ;;  %v625_v27 = vpack.c.bf16 %v6256_v23, %v6256_v23  ;;  %v1288_v23 = vunpack.c.h.s8.bf16 %v799_v20 }
 0x169   : > { %4473 = vmatprep.subr.bf16.mxu1 %v1279_v29  ;;  %v1287_v29 = vunpack.c.l.s8.bf16 %v799_v20  ;;  %v631_v20 = vpack.c.bf16 %v6289_v16, %v6289_v16  ;;  %v1336_v16 = vunpack.c.h.s8.bf16 %v823_v14 }
 0x16a   : > { %2232 = vmatmul.mubr.bf16.vlgmr.msra.gmra.mrb[16].mxu0 %v621_v35  ;;  %v804_v35 = vld [vmem:[%s6087_s17 + $0x328] sm:$0xff] }
 0x16b   : > { %2272 = vmatmul.mubr.bf16.vlgmr.msra.gmra.mrb[16].mxu1 %v623_v36  ;;  %4452 = vmatpush3.bf16.msra.mxu0 %v1255_v37  ;;  %v812_v36 = vld [vmem:[%s6087_s17 + $0x368] sm:$0xff]  ;;  %v630_v37 = vpack.c.bf16 %v519_v25, %v519_v25 }
 0x16c   : > { %4474 = vmatpush3.bf16.msra.mxu1 %v1271_v38  ;;  %4453 = vmatprep.subr.bf16.mxu0 %v1264_v41  ;;  %v632_v38 = vpack.c.bf16 %v520_v26, %v520_v26  ;;  %v1297_v41 = vunpack.c.l.s8.bf16 %v804_v35  ;;  %v1313_v43 = vunpack.c.l.s8.bf16 %v812_v36  ;;  %v1344_v26 = vunpack.c.h.s8.bf16 %v827_v6 }
 0x16d   : > { %4475 = vmatprep.subr.bf16.mxu1 %v1280_v42  ;;  %2311 = vmatprep.mubr.bf16.mxu0 %v626_v45  ;;  %v800_v42 = vld [vmem:[%s6087_s17 + $0x308] sm:$0xff] }
 0x16e   : > { %2351 = vmatprep.mubr.bf16.mxu1 %v628_v46  ;;  %v1289_v45 = vunpack.c.l.s8.bf16 %v800_v42  ;;  %v1305_v46 = vunpack.c.l.s8.bf16 %v808_v44 }
 0x16f   : > { %4454 = vmatpush3.bf16.msra.mxu0 %v1256_v31  ;;  %v1298_v31 = vunpack.c.h.s8.bf16 %v804_v35 }
 0x170   : > { %4476 = vmatpush3.bf16.msra.mxu1 %v1272_v32  ;;  %4455 = vmatprep.subr.bf16.mxu0 %v1265_v49  ;;  %v1314_v32 = vunpack.c.h.s8.bf16 %v812_v36  ;;  %v805_v49 = vld [vmem:[%s6087_s17 + $0x330] sm:$0xff]  ;;  %v824_v36 = vld [vmem:[%s6087_s17 + $0x3c8] sm:$0xff] }
 0x171   : > { %4477 = vmatprep.subr.bf16.mxu1 %v1281_v51  ;;  %v1290_v51 = vunpack.c.h.s8.bf16 %v800_v42  ;;  %v829_v42 = vld [vmem:[%s6087_s17 + $0x3f0] sm:$0xff]  ;;  %v1338_v44 = vunpack.c.h.s8.bf16 %v824_v36 }
 0x173   : > { %4456 = vmatpush3.bf16.msra.mxu0 %v1257_v53  ;;  %v1299_v53 = vunpack.c.l.s8.bf16 %v805_v49 }
 0x174   : > { %4478 = vmatpush3.bf16.msra.mxu1 %v1273_v54  ;;  %4457 = vmatprep.subr.bf16.mxu0 %v1266_v39  ;;  %v801_v54 = vld [vmem:[%s6087_s17 + $0x310] sm:$0xff]  ;;  %v1315_v39 = vunpack.c.l.s8.bf16 %v813_v50 }
 0x175   : > { %4479 = vmatprep.subr.bf16.mxu1 %v1282_v40  ;;  %v809_v40 = vld [vmem:[%s6087_s17 + $0x350] sm:$0xff]  ;;  %v1291_v57 = vunpack.c.l.s8.bf16 %v801_v54 }
 0x176   : > { %v1307_v58 = vunpack.c.l.s8.bf16 %v809_v40  ;;  %v1308_v48 = vunpack.c.h.s8.bf16 %v809_v40 }
 0x177   : > { %4458 = vmatpush3.bf16.msra.mxu0 %v1258_v59  ;;  %v1300_v59 = vunpack.c.h.s8.bf16 %v805_v49 }
 0x178   : > { %4480 = vmatpush3.bf16.msra.mxu1 %v1274_v60  ;;  %4459 = vmatprep.subr.bf16.mxu0 %v1267_v61  ;;  %v1316_v60 = vunpack.c.h.s8.bf16 %v813_v50  ;;  %v806_v61 = vld [vmem:[%s6087_s17 + $0x338] sm:$0xff] }
 0x179   : > { %4481 = vmatprep.subr.bf16.mxu1 %v1283_v47  ;;  %v1292_v47 = vunpack.c.h.s8.bf16 %v801_v54  ;;  %v830_v54 = vld [vmem:[%s6087_s17 + $0x3f8] sm:$0xff] }
 0x17b   : > { %4460 = vmatpush3.bf16.msra.mxu0 %v1259_v63  ;;  %v1301_v63 = vunpack.c.l.s8.bf16 %v806_v61 }
 0x17c   : > { %4482 = vmatpush3.bf16.msra.mxu1 %v1275_v0  ;;  %4461 = vmatprep.subr.bf16.mxu0 %v1268_v1  ;;  %v802_v0 = vld [vmem:[%s6087_s17 + $0x318] sm:$0xff]  ;;  %v1317_v1 = vunpack.c.l.s8.bf16 %v814_v62 }
 0x17d   : > { %4483 = vmatprep.subr.bf16.mxu1 %v1284_v2  ;;  %v810_v2 = vld [vmem:[%s6087_s17 + $0x358] sm:$0xff]  ;;  %v1293_v3 = vunpack.c.l.s8.bf16 %v802_v0 }
 0x17e   : > { %v1309_v4 = vunpack.c.l.s8.bf16 %v810_v2 }
 0x17f   : > { %4462 = vmatpush3.bf16.msra.mxu0 %v1260_v55  ;;  %v1302_v55 = vunpack.c.h.s8.bf16 %v806_v61 }
 0x180   : > { %4484 = vmatpush3.bf16.msra.mxu1 %v1276_v56  ;;  %4463 = vmatprep.subr.bf16.mxu0 %v1269_v5  ;;  %v1318_v56 = vunpack.c.h.s8.bf16 %v814_v62  ;;  %v819_v5 = vld [vmem:[%s6087_s17 + $0x3a0] sm:$0xff] }
 0x181   : > { %4485 = vmatprep.subr.bf16.mxu1 %v1285_v7  ;;  %v6316_v7 = vld [vmem:[%s6080_s30 + $0x70] sm:$0xff]  ;;  %v1328_v25 = vunpack.c.h.s8.bf16 %v819_v5 }
 0x183   : > { %4464 = vmatpush3.bf16.msra.mxu0 %v1261_v9  ;;  %v1294_v9 = vunpack.c.h.s8.bf16 %v802_v0 }
 0x184   : > { %4486 = vmatpush3.bf16.msra.mxu1 %v1277_v10  ;;  %4465 = vmatprep.subr.bf16.mxu0 %v1270_v11  ;;  %v1310_v10 = vunpack.c.h.s8.bf16 %v810_v2  ;;  %v1327_v11 = vunpack.c.l.s8.bf16 %v819_v5  ;;  %v1350_v5 = vunpack.c.h.s8.bf16 %v830_v54 }
 0x185   : > { %4487 = vmatprep.subr.bf16.mxu1 %v1286_v12  ;;  %v815_v12 = vld [vmem:[%s6087_s17 + $0x380] sm:$0xff] }
 0x187   : > { %4466 = vmatpush3.bf16.msra.mxu0 %v1262_v17  ;;  %v521_v17 = vcombine.high %v6316_v7, %v6316_v7 }
 0x188   : > { %4488 = vmatpush3.bf16.msra.mxu1 %v1278_v18  ;;  %4495 = vmatprep.subr.bf16.mxu0 %v1295_v19  ;;  %v522_v18 = vcombine.high %v6319_v8, %v6319_v8  ;;  %v629_v19 = vpack.c.bf16 %v6286_v15, %v6286_v15  ;;  %v1320_v15 = vunpack.c.h.s8.bf16 %v815_v12 }
 0x189   : > { %4517 = vmatprep.subr.bf16.mxu1 %v1311_v21  ;;  %v1319_v21 = vunpack.c.l.s8.bf16 %v815_v12  ;;  %v6348_v12 = vld [vmem:[%s6080_s30 + $0x80] sm:$0xff] }
 0x18a   : > { %2312 = vmatmul.mubr.bf16.vlgmr.msra.gmra.mrb[20].mxu0 %v625_v27  ;;  %v820_v27 = vld [vmem:[%s6087_s17 + $0x3a8] sm:$0xff] }
 0x18b   : > { %2352 = vmatmul.mubr.bf16.vlgmr.msra.gmra.mrb[20].mxu1 %v627_v28  ;;  %4496 = vmatpush3.bf16.msra.mxu0 %v1287_v29  ;;  %v828_v28 = vld [vmem:[%s6087_s17 + $0x3e8] sm:$0xff]  ;;  %v634_v29 = vpack.c.bf16 %v521_v17, %v521_v17 }
 0x18c   : > { %4518 = vmatpush3.bf16.msra.mxu1 %v1303_v30  ;;  %4497 = vmatprep.subr.bf16.mxu0 %v1296_v33  ;;  %v636_v30 = vpack.c.bf16 %v522_v18, %v522_v18  ;;  %v1329_v33 = vunpack.c.l.s8.bf16 %v820_v27  ;;  %v1345_v35 = vunpack.c.l.s8.bf16 %v828_v28 }
 0x18d   : > { %4519 = vmatprep.subr.bf16.mxu1 %v1312_v34  ;;  %2391 = vmatprep.mubr.bf16.mxu0 %v630_v37  ;;  %v816_v34 = vld [vmem:[%s6087_s17 + $0x388] sm:$0xff] }
 0x18e   : > { %2431 = vmatprep.mubr.bf16.mxu1 %v632_v38  ;;  %v1321_v37 = vunpack.c.l.s8.bf16 %v816_v34  ;;  %v1337_v38 = vunpack.c.l.s8.bf16 %v824_v36 }
 0x18f   : > { %4498 = vmatpush3.bf16.msra.mxu0 %v1288_v23  ;;  %v1330_v23 = vunpack.c.h.s8.bf16 %v820_v27  ;;  %v635_v27 = vpack.c.bf16 %v6319_v8, %v6319_v8 }
 0x190   : > { %4520 = vmatpush3.bf16.msra.mxu1 %v1304_v24  ;;  %4499 = vmatprep.subr.bf16.mxu0 %v1297_v41  ;;  %v1346_v24 = vunpack.c.h.s8.bf16 %v828_v28  ;;  %v821_v41 = vld [vmem:[%s6087_s17 + $0x3b0] sm:$0xff] }
 0x191   : > { %4521 = vmatprep.subr.bf16.mxu1 %v1313_v43  ;;  %v1322_v43 = vunpack.c.h.s8.bf16 %v816_v34 }
 0x193   : > { %4500 = vmatpush3.bf16.msra.mxu0 %v1289_v45  ;;  %v1331_v45 = vunpack.c.l.s8.bf16 %v821_v41 }
 0x194   : > { %4522 = vmatpush3.bf16.msra.mxu1 %v1305_v46  ;;  %4501 = vmatprep.subr.bf16.mxu0 %v1298_v31  ;;  %v817_v46 = vld [vmem:[%s6087_s17 + $0x390] sm:$0xff]  ;;  %v1347_v31 = vunpack.c.l.s8.bf16 %v829_v42 }
 0x195   : > { %4523 = vmatprep.subr.bf16.mxu1 %v1314_v32  ;;  %v825_v32 = vld [vmem:[%s6087_s17 + $0x3d0] sm:$0xff]  ;;  %v1323_v49 = vunpack.c.l.s8.bf16 %v817_v46 }
 0x196   : > { %v1339_v50 = vunpack.c.l.s8.bf16 %v825_v32  ;;  %v1340_v40 = vunpack.c.h.s8.bf16 %v825_v32 }
 0x197   : > { %4502 = vmatpush3.bf16.msra.mxu0 %v1290_v51  ;;  %v1332_v51 = vunpack.c.h.s8.bf16 %v821_v41 }
 0x198   : > { %4524 = vmatpush3.bf16.msra.mxu1 %v1306_v52  ;;  %4503 = vmatprep.subr.bf16.mxu0 %v1299_v53  ;;  %v1348_v52 = vunpack.c.h.s8.bf16 %v829_v42  ;;  %v822_v53 = vld [vmem:[%s6087_s17 + $0x3b8] sm:$0xff] }
 0x199   : > { %4525 = vmatprep.subr.bf16.mxu1 %v1315_v39  ;;  %v1324_v39 = vunpack.c.h.s8.bf16 %v817_v46 }
 0x19b   : > { %4504 = vmatpush3.bf16.msra.mxu0 %v1291_v57  ;;  %v1333_v57 = vunpack.c.l.s8.bf16 %v822_v53 }
 0x19c   : > { %4526 = vmatpush3.bf16.msra.mxu1 %v1307_v58  ;;  %4505 = vmatprep.subr.bf16.mxu0 %v1300_v59  ;;  %v818_v58 = vld [vmem:[%s6087_s17 + $0x398] sm:$0xff]  ;;  %v1349_v59 = vunpack.c.l.s8.bf16 %v830_v54 }
 0x19d   : > { %4527 = vmatprep.subr.bf16.mxu1 %v1316_v60  ;;  %v826_v60 = vld [vmem:[%s6087_s17 + $0x3d8] sm:$0xff]  ;;  %v1325_v2 = vunpack.c.l.s8.bf16 %v818_v58  ;;  %v1326_v14 = vunpack.c.h.s8.bf16 %v818_v58 }
 0x19e   : > { %v1342_v17 = vunpack.c.h.s8.bf16 %v826_v60 }
 0x19f   : > { %4506 = vmatpush3.bf16.msra.mxu0 %v1292_v47 }
 0x1a0   : > { %4528 = vmatpush3.bf16.msra.mxu1 %v1308_v48  ;;  %4507 = vmatprep.subr.bf16.mxu0 %v1301_v63 }
 0x1a1   : > { %4529 = vmatprep.subr.bf16.mxu1 %v1317_v1 }
 0x1a3   : > { %4508 = vmatpush3.bf16.msra.mxu0 %v1293_v3  ;;  %v1341_v3 = vunpack.c.l.s8.bf16 %v826_v60 }
 0x1a4   : > { %4530 = vmatpush3.bf16.msra.mxu1 %v1309_v4  ;;  %4509 = vmatprep.subr.bf16.mxu0 %v1302_v55 }
 0x1a5   : > { %4531 = vmatprep.subr.bf16.mxu1 %v1318_v56  ;;  %v1334_v56 = vunpack.c.h.s8.bf16 %v822_v53 }
 0x1a7   : > { %4510 = vmatpush3.bf16.msra.mxu0 %v1294_v9 }
 0x1a8   : > { %4532 = vmatpush3.bf16.msra.mxu1 %v1310_v10  ;;  %4539 = vmatprep.subr.bf16.mxu0 %v1327_v11  ;;  %v835_v10 = vld [vmem:[%s6087_s17 + $0x420] sm:$0xff] }
 0x1a9   : > { %4561 = vmatprep.subr.bf16.mxu1 %v1343_v13  ;;  %v843_v11 = vld [vmem:[%s6087_s17 + $0x460] sm:$0xff]  ;;  %v1359_v18 = vunpack.c.l.s8.bf16 %v835_v10 }
 0x1aa   : > { %2392 = vmatmul.mubr.bf16.vlgmr.msra.gmra.mrb[24].mxu0 %v629_v19  ;;  %v6351_v13 = vld [vmem:[%s6080_s30 + $0x88] sm:$0xff] }
 0x1ab   : > { %2432 = vmatmul.mubr.bf16.vlgmr.msra.gmra.mrb[24].mxu1 %v631_v20  ;;  %4540 = vmatpush3.bf16.msra.mxu0 %v1319_v21  ;;  %v831_v19 = vld [vmem:[%s6087_s17 + $0x400] sm:$0xff]  ;;  %v1375_v20 = vunpack.c.l.s8.bf16 %v843_v11 }
 0x1ac   : > { %4562 = vmatpush3.bf16.msra.mxu1 %v1335_v22  ;;  %4541 = vmatprep.subr.bf16.mxu0 %v1328_v25  ;;  %v839_v21 = vld [vmem:[%s6087_s17 + $0x440] sm:$0xff]  ;;  %v523_v22 = vcombine.high %v6348_v12, %v6348_v12  ;;  %v524_v25 = vcombine.high %v6351_v13, %v6351_v13  ;;  %v1351_v28 = vunpack.c.l.s8.bf16 %v831_v19 }
 0x1ad   : > { %4563 = vmatprep.subr.bf16.mxu1 %v1344_v26  ;;  %2471 = vmatprep.mubr.bf16.mxu0 %v634_v29  ;;  %v633_v26 = vpack.c.bf16 %v6316_v7, %v6316_v7  ;;  %v1367_v29 = vunpack.c.l.s8.bf16 %v839_v21  ;;  %v1352_v7 = vunpack.c.h.s8.bf16 %v831_v19  ;;  %v1368_v8 = vunpack.c.h.s8.bf16 %v839_v21  ;;  %v859_v19 = vld [vmem:[%s6087_s17 + $0x4e0] sm:$0xff]  ;;  %v6382_v21 = vld [vmem:[%s6080_s30 + $0x98] sm:$0xff] }
 0x1ae   : > { %2511 = vmatprep.mubr.bf16.mxu1 %v636_v30  ;;  %v1360_v30 = vunpack.c.h.s8.bf16 %v835_v10  ;;  %v638_v34 = vpack.c.bf16 %v523_v22, %v523_v22 }
 0x1af   : > { %4542 = vmatpush3.bf16.msra.mxu0 %v1320_v15  ;;  %v1376_v15 = vunpack.c.h.s8.bf16 %v843_v11 }
 0x1b0   : > { %4564 = vmatpush3.bf16.msra.mxu1 %v1336_v16  ;;  %4543 = vmatprep.subr.bf16.mxu0 %v1329_v33  ;;  %v836_v16 = vld [vmem:[%s6087_s17 + $0x428] sm:$0xff] }
 0x1b1   : > { %4565 = vmatprep.subr.bf16.mxu1 %v1345_v35  ;;  %v844_v33 = vld [vmem:[%s6087_s17 + $0x468] sm:$0xff]  ;;  %v640_v35 = vpack.c.bf16 %v524_v25, %v524_v25  ;;  %v1361_v36 = vunpack.c.l.s8.bf16 %v836_v16  ;;  %v1362_v42 = vunpack.c.h.s8.bf16 %v836_v16  ;;  %v637_v16 = vpack.c.bf16 %v6348_v12, %v6348_v12 }
 0x1b3   : > { %4544 = vmatpush3.bf16.msra.mxu0 %v1321_v37  ;;  %v832_v37 = vld [vmem:[%s6087_s17 + $0x408] sm:$0xff] }
 0x1b4   : > { %4566 = vmatpush3.bf16.msra.mxu1 %v1337_v38  ;;  %4545 = vmatprep.subr.bf16.mxu0 %v1330_v23  ;;  %v1377_v38 = vunpack.c.l.s8.bf16 %v844_v33  ;;  %v840_v23 = vld [vmem:[%s6087_s17 + $0x448] sm:$0xff]  ;;  %v1354_v46 = vunpack.c.h.s8.bf16 %v832_v37 }
 0x1b5   : > { %4567 = vmatprep.subr.bf16.mxu1 %v1346_v24  ;;  %v1353_v24 = vunpack.c.l.s8.bf16 %v832_v37  ;;  %v1369_v41 = vunpack.c.l.s8.bf16 %v840_v23  ;;  %v860_v37 = vld [vmem:[%s6087_s17 + $0x4e8] sm:$0xff] }
 0x1b7   : > { %4546 = vmatpush3.bf16.msra.mxu0 %v1322_v43  ;;  %v1378_v43 = vunpack.c.h.s8.bf16 %v844_v33  ;;  %v639_v33 = vpack.c.bf16 %v6351_v13, %v6351_v13 }
 0x1b8   : > { %4568 = vmatpush3.bf16.msra.mxu1 %v1338_v44  ;;  %4547 = vmatprep.subr.bf16.mxu0 %v1331_v45  ;;  %v837_v44 = vld [vmem:[%s6087_s17 + $0x430] sm:$0xff] }
 0x1b9   : > { %4569 = vmatprep.subr.bf16.mxu1 %v1347_v31  ;;  %v845_v45 = vld [vmem:[%s6087_s17 + $0x470] sm:$0xff]  ;;  %v1370_v31 = vunpack.c.h.s8.bf16 %v840_v23  ;;  %v1363_v32 = vunpack.c.l.s8.bf16 %v837_v44  ;;  %v1364_v54 = vunpack.c.h.s8.bf16 %v837_v44 }
 0x1bb   : > { %4548 = vmatpush3.bf16.msra.mxu0 %v1323_v49  ;;  %v833_v49 = vld [vmem:[%s6087_s17 + $0x410] sm:$0xff] }
 0x1bc   : > { %4570 = vmatpush3.bf16.msra.mxu1 %v1339_v50  ;;  %4549 = vmatprep.subr.bf16.mxu0 %v1332_v51  ;;  %v1379_v50 = vunpack.c.l.s8.bf16 %v845_v45  ;;  %v841_v51 = vld [vmem:[%s6087_s17 + $0x450] sm:$0xff]  ;;  %v1356_v58 = vunpack.c.h.s8.bf16 %v833_v49 }
 0x1bd   : > { %4571 = vmatprep.subr.bf16.mxu1 %v1348_v52  ;;  %v4247_v61 = vpop.f32.mrb[0].mxu0  ;;  %v1355_v52 = vunpack.c.l.s8.bf16 %v833_v49  ;;  %v1371_v53 = vunpack.c.l.s8.bf16 %v841_v51  ;;  %v861_v49 = vld [vmem:[%s6087_s17 + $0x4f0] sm:$0xff] }
 0x1be   : > { %v4269_v62 = vpop.f32.mrb[0].mxu1  ;;  %v4248_v47 = vpop.f32.mrb[1].mxu0 }
 0x1bf   : > { %v4270_v48 = vpop.f32.mrb[1].mxu1  ;;  %v4249_v63 = vadd.f32 %v4248_v47, %v4247_v61  ;;  %v4250_v1 = vpop.f32.mrb[2].mxu0  ;;  %4550 = vmatpush3.bf16.msra.mxu0 %v1324_v39  ;;  %v1380_v39 = vunpack.c.h.s8.bf16 %v845_v45  ;;  %v834_v61 = vld [vmem:[%s6087_s17 + $0x418] sm:$0xff] }
 0x1c0   : > { %v4271_v0 = vadd.f32 %v4270_v48, %v4269_v62  ;;  %4572 = vmatpush3.bf16.msra.mxu1 %v1340_v40  ;;  %v4272_v4 = vpop.f32.mrb[2].mxu1  ;;  %v4251_v55 = vpop.f32.mrb[3].mxu0  ;;  %4551 = vmatprep.subr.bf16.mxu0 %v1333_v57  ;;  %v838_v40 = vld [vmem:[%s6087_s17 + $0x438] sm:$0xff]  ;;  %v1358_v25 = vunpack.c.h.s8.bf16 %v834_v61 }
 0x1c1   : > { %4573 = vmatprep.subr.bf16.mxu1 %v1349_v59  ;;  %v4273_v6 = vpop.f32.mrb[3].mxu1  ;;  %v846_v57 = vld [vmem:[%s6087_s17 + $0x478] sm:$0xff]  ;;  %v1372_v59 = vunpack.c.h.s8.bf16 %v841_v51  ;;  %v1365_v60 = vunpack.c.l.s8.bf16 %v838_v40  ;;  %v1357_v55 = vunpack.c.l.s8.bf16 %v834_v61  ;;  %v1366_v10 = vunpack.c.h.s8.bf16 %v838_v40 }
 0x1c2   : > { %v6343_v9 = vadd.f32 %v4271_v0, %v4249_v63  ;;  %v1381_v62 = vunpack.c.l.s8.bf16 %v846_v57  ;;  %v842_v47 = vld [vmem:[%s6087_s17 + $0x458] sm:$0xff]  ;;  %v1382_v11 = vunpack.c.h.s8.bf16 %v846_v57 }
 0x1c3   : > { %4552 = vmatpush3.bf16.msra.mxu0 %v1325_v2  ;;  %v862_v61 = vld [vmem:[%s6087_s17 + $0x4f8] sm:$0xff] }
 0x1c4   : > { %4574 = vmatpush3.bf16.msra.mxu1 %v1341_v3  ;;  %4553 = vmatprep.subr.bf16.mxu0 %v1334_v56  ;;  %v1373_v56 = vunpack.c.l.s8.bf16 %v842_v47 }
 0x1c5   : > { %4575 = vmatprep.subr.bf16.mxu1 %v1350_v5 }
 0x1c7   : > { %4554 = vmatpush3.bf16.msra.mxu0 %v1326_v14 }
 0x1c8   : > { %4576 = vmatpush3.bf16.msra.mxu1 %v1342_v17  ;;  %4583 = vmatprep.subr.bf16.mxu0 %v1359_v18  ;;  %v851_v18 = vld [vmem:[%s6087_s17 + $0x4a0] sm:$0xff] }
 0x1c9   : > { %4605 = vmatprep.subr.bf16.mxu1 %v1375_v20  ;;  %v6379_v20 = vld [vmem:[%s6080_s30 + $0x90] sm:$0xff] }
 0x1ca   : > { %2472 = vmatmul.mubr.bf16.vlgmr.msra.gmra.mrb[28].mxu0 %v633_v26  ;;  %v1374_v26 = vunpack.c.h.s8.bf16 %v842_v47 }
 0x1cb   : > { %2512 = vmatmul.mubr.bf16.vlgmr.msra.gmra.mrb[28].mxu1 %v635_v27  ;;  %4584 = vmatpush3.bf16.msra.mxu0 %v1351_v28  ;;  %v1391_v27 = vunpack.c.l.s8.bf16 %v851_v18  ;;  %v847_v28 = vld [vmem:[%s6087_s17 + $0x480] sm:$0xff] }
 0x1cc   : > { %4606 = vmatpush3.bf16.msra.mxu1 %v1367_v29  ;;  %4585 = vmatprep.subr.bf16.mxu0 %v1360_v30  ;;  %v1407_v29 = vunpack.c.l.s8.bf16 %v859_v19  ;;  %v525_v30 = vcombine.high %v6379_v20, %v6379_v20  ;;  %v1384_v12 = vunpack.c.h.s8.bf16 %v847_v28 }
 0x1cd   : > { %4607 = vmatprep.subr.bf16.mxu1 %v1376_v15  ;;  %2551 = vmatprep.mubr.bf16.mxu0 %v638_v34  ;;  %v526_v15 = vcombine.high %v6382_v21, %v6382_v21  ;;  %v1383_v34 = vunpack.c.l.s8.bf16 %v847_v28  ;;  %v875_v28 = vld [vmem:[%s6087_s17 + $0x560] sm:$0xff] }
 0x1ce   : > { %2591 = vmatprep.mubr.bf16.mxu1 %v640_v35 }
 0x1cf   : > { %4586 = vmatpush3.bf16.msra.mxu0 %v1352_v7  ;;  %v1392_v7 = vunpack.c.h.s8.bf16 %v851_v18  ;;  %v644_v23 = vpack.c.bf16 %v526_v15, %v526_v15 }
 0x1d0   : > { %4608 = vmatpush3.bf16.msra.mxu1 %v1368_v8  ;;  %4587 = vmatprep.subr.bf16.mxu0 %v1361_v36  ;;  %v1408_v8 = vunpack.c.h.s8.bf16 %v859_v19  ;;  %v852_v36 = vld [vmem:[%s6087_s17 + $0x4a8] sm:$0xff]  ;;  %v1414_v19 = vunpack.c.h.s8.bf16 %v862_v61 }
 0x1d1   : > { %4609 = vmatprep.subr.bf16.mxu1 %v1377_v38  ;;  %v642_v38 = vpack.c.bf16 %v525_v30, %v525_v30 }
 0x1d3   : > { %4588 = vmatpush3.bf16.msra.mxu0 %v1353_v24  ;;  %v1393_v24 = vunpack.c.l.s8.bf16 %v852_v36 }
 0x1d4   : > { %4610 = vmatpush3.bf16.msra.mxu1 %v1369_v41  ;;  %4589 = vmatprep.subr.bf16.mxu0 %v1362_v42  ;;  %v848_v41 = vld [vmem:[%s6087_s17 + $0x488] sm:$0xff]  ;;  %v1409_v42 = vunpack.c.l.s8.bf16 %v860_v37 }
 0x1d5   : > { %4611 = vmatprep.subr.bf16.mxu1 %v1378_v43  ;;  %v856_v43 = vld [vmem:[%s6087_s17 + $0x4c8] sm:$0xff]  ;;  %v1385_v44 = vunpack.c.l.s8.bf16 %v848_v41 }
 0x1d6   : > { %v1401_v45 = vunpack.c.l.s8.bf16 %v856_v43  ;;  %v1402_v51 = vunpack.c.h.s8.bf16 %v856_v43 }
 0x1d7   : > { %4590 = vmatpush3.bf16.msra.mxu0 %v1354_v46  ;;  %v1394_v46 = vunpack.c.h.s8.bf16 %v852_v36  ;;  %v641_v36 = vpack.c.bf16 %v6379_v20, %v6379_v20 }
 0x1d8   : > { %4612 = vmatpush3.bf16.msra.mxu1 %v1370_v31  ;;  %4591 = vmatprep.subr.bf16.mxu0 %v1363_v32  ;;  %v1410_v31 = vunpack.c.h.s8.bf16 %v860_v37  ;;  %v853_v32 = vld [vmem:[%s6087_s17 + $0x4b0] sm:$0xff]  ;;  %v643_v37 = vpack.c.bf16 %v6382_v21, %v6382_v21 }
 0x1d9   : > { %4613 = vmatprep.subr.bf16.mxu1 %v1379_v50  ;;  %v1386_v50 = vunpack.c.h.s8.bf16 %v848_v41  ;;  %v876_v41 = vld [vmem:[%s6087_s17 + $0x568] sm:$0xff] }
 0x1db   : > { %4592 = vmatpush3.bf16.msra.mxu0 %v1355_v52  ;;  %v1395_v52 = vunpack.c.l.s8.bf16 %v853_v32 }
 0x1dc   : > { %4614 = vmatpush3.bf16.msra.mxu1 %v1371_v53  ;;  %4593 = vmatprep.subr.bf16.mxu0 %v1364_v54  ;;  %v849_v53 = vld [vmem:[%s6087_s17 + $0x490] sm:$0xff]  ;;  %v1411_v54 = vunpack.c.l.s8.bf16 %v861_v49 }
 0x1dd   : > { %4615 = vmatprep.subr.bf16.mxu1 %v1380_v39  ;;  %v4291_v48 = vpop.f32.mrb[4].mxu0  ;;  %v857_v39 = vld [vmem:[%s6087_s17 + $0x4d0] sm:$0xff]  ;;  %v1387_v40 = vunpack.c.l.s8.bf16 %v849_v53 }
 0x1de   : > { %v4313_v63 = vpop.f32.mrb[4].mxu1  ;;  %v4292_v0 = vpop.f32.mrb[5].mxu0  ;;  %v1403_v57 = vunpack.c.l.s8.bf16 %v857_v39  ;;  %v1404_v47 = vunpack.c.h.s8.bf16 %v857_v39 }
 0x1df   : > { %v4314_v1 = vpop.f32.mrb[5].mxu1  ;;  %v4293_v2 = vadd.f32 %v4292_v0, %v4291_v48  ;;  %v4294_v3 = vpop.f32.mrb[6].mxu0  ;;  %4594 = vmatpush3.bf16.msra.mxu0 %v1356_v58  ;;  %v1396_v58 = vunpack.c.h.s8.bf16 %v853_v32  ;;  %v1413_v0 = vunpack.c.l.s8.bf16 %v862_v61 }
 0x1e0   : > { %v4315_v4 = vadd.f32 %v4314_v1, %v4313_v63  ;;  %4616 = vmatpush3.bf16.msra.mxu1 %v1372_v59  ;;  %v4316_v5 = vpop.f32.mrb[6].mxu1  ;;  %v4295_v6 = vpop.f32.mrb[7].mxu0  ;;  %4595 = vmatprep.subr.bf16.mxu0 %v1365_v60  ;;  %v1412_v59 = vunpack.c.h.s8.bf16 %v861_v49  ;;  %v854_v60 = vld [vmem:[%s6087_s17 + $0x4b8] sm:$0xff] }
 0x1e1   : > { %4617 = vmatprep.subr.bf16.mxu1 %v1381_v62  ;;  %v4317_v14 = vpop.f32.mrb[7].mxu1  ;;  %v1994_v17 = vadd.f32 %v4293_v2, %v6343_v9  ;;  %v855_v9 = vld [vmem:[%s6087_s17 + $0x4c0] sm:$0xff]  ;;  %v1388_v62 = vunpack.c.h.s8.bf16 %v849_v53  ;;  %v1397_v48 = vunpack.c.l.s8.bf16 %v854_v60  ;;  %v850_v63 = vld [vmem:[%s6087_s17 + $0x498] sm:$0xff]  ;;  %v1398_v18 = vunpack.c.h.s8.bf16 %v854_v60  ;;  %v877_v53 = vld [vmem:[%s6087_s17 + $0x570] sm:$0xff] }
 0x1e2   : > { %v1399_v35 = vunpack.c.l.s8.bf16 %v855_v9  ;;  %v1400_v13 = vunpack.c.h.s8.bf16 %v855_v9  ;;  %v858_v1 = vld [vmem:[%s6087_s17 + $0x4d8] sm:$0xff]  ;;  %v1390_v15 = vunpack.c.h.s8.bf16 %v850_v63 }
 0x1e3   : > { %v6384_v22 = vadd.f32 %v4315_v4, %v1994_v17  ;;  %4596 = vmatpush3.bf16.msra.mxu0 %v1357_v55  ;;  %v6415_v9 = vld [vmem:[%s6080_s30 + $0xa8] sm:$0xff] }
 0x1e4   : > { %4618 = vmatpush3.bf16.msra.mxu1 %v1373_v56  ;;  %4597 = vmatprep.subr.bf16.mxu0 %v1366_v10  ;;  %v1389_v10 = vunpack.c.l.s8.bf16 %v850_v63  ;;  %v878_v63 = vld [vmem:[%s6087_s17 + $0x578] sm:$0xff] }
 0x1e5   : > { %4619 = vmatprep.subr.bf16.mxu1 %v1382_v11  ;;  %v1405_v11 = vunpack.c.l.s8.bf16 %v858_v1 }
 0x1e7   : > { %4598 = vmatpush3.bf16.msra.mxu0 %v1358_v25 }
 0x1e8   : > { %4620 = vmatpush3.bf16.msra.mxu1 %v1374_v26  ;;  %4627 = vmatprep.subr.bf16.mxu0 %v1391_v27  ;;  %v867_v27 = vld [vmem:[%s6087_s17 + $0x520] sm:$0xff] }
 0x1e9   : > { %4649 = vmatprep.subr.bf16.mxu1 %v1407_v29  ;;  %v6412_v29 = vld [vmem:[%s6080_s30 + $0xa0] sm:$0xff] }
 0x1ea   : > { %2552 = vmatmul.mubr.bf16.vlgmr.msra.gmra.mrb[32].mxu0 %v637_v16  ;;  %v1406_v16 = vunpack.c.h.s8.bf16 %v858_v1 }
 0x1eb   : > { %2592 = vmatmul.mubr.bf16.vlgmr.msra.gmra.mrb[32].mxu1 %v639_v33  ;;  %4628 = vmatpush3.bf16.msra.mxu0 %v1383_v34  ;;  %v1423_v33 = vunpack.c.l.s8.bf16 %v867_v27  ;;  %v863_v34 = vld [vmem:[%s6087_s17 + $0x500] sm:$0xff] }
 0x1ec   : > { %4650 = vmatpush3.bf16.msra.mxu1 %v1399_v35  ;;  %4629 = vmatprep.subr.bf16.mxu0 %v1392_v7  ;;  %v1439_v35 = vunpack.c.l.s8.bf16 %v875_v28  ;;  %v527_v7 = vcombine.high %v6412_v29, %v6412_v29  ;;  %v1416_v20 = vunpack.c.h.s8.bf16 %v863_v34 }
 0x1ed   : > { %4651 = vmatprep.subr.bf16.mxu1 %v1408_v8  ;;  %2631 = vmatprep.mubr.bf16.mxu0 %v642_v38  ;;  %v528_v8 = vcombine.high %v6415_v9, %v6415_v9  ;;  %v1415_v38 = vunpack.c.l.s8.bf16 %v863_v34  ;;  %v891_v34 = vld [vmem:[%s6087_s17 + $0x5e0] sm:$0xff] }
 0x1ee   : > { %2671 = vmatprep.mubr.bf16.mxu1 %v644_v23 }
 0x1ef   : > { %4630 = vmatpush3.bf16.msra.mxu0 %v1384_v12  ;;  %v1424_v12 = vunpack.c.h.s8.bf16 %v867_v27  ;;  %v648_v43 = vpack.c.bf16 %v528_v8, %v528_v8 }
 0x1f0   : > { %4652 = vmatpush3.bf16.msra.mxu1 %v1400_v13  ;;  %4631 = vmatprep.subr.bf16.mxu0 %v1393_v24  ;;  %v1440_v13 = vunpack.c.h.s8.bf16 %v875_v28  ;;  %v868_v24 = vld [vmem:[%s6087_s17 + $0x528] sm:$0xff]  ;;  %v1446_v28 = vunpack.c.h.s8.bf16 %v878_v63 }
 0x1f1   : > { %4653 = vmatprep.subr.bf16.mxu1 %v1409_v42  ;;  %v646_v42 = vpack.c.bf16 %v527_v7, %v527_v7 }
 0x1f3   : > { %4632 = vmatpush3.bf16.msra.mxu0 %v1385_v44  ;;  %v1425_v44 = vunpack.c.l.s8.bf16 %v868_v24 }
 0x1f4   : > { %4654 = vmatpush3.bf16.msra.mxu1 %v1401_v45  ;;  %4633 = vmatprep.subr.bf16.mxu0 %v1394_v46  ;;  %v864_v45 = vld [vmem:[%s6087_s17 + $0x508] sm:$0xff]  ;;  %v1441_v46 = vunpack.c.l.s8.bf16 %v876_v41 }
 0x1f5   : > { %4655 = vmatprep.subr.bf16.mxu1 %v1410_v31  ;;  %v872_v31 = vld [vmem:[%s6087_s17 + $0x548] sm:$0xff]  ;;  %v1417_v32 = vunpack.c.l.s8.bf16 %v864_v45 }
 0x1f6   : > { %v1433_v49 = vunpack.c.l.s8.bf16 %v872_v31  ;;  %v1434_v39 = vunpack.c.h.s8.bf16 %v872_v31 }
 0x1f7   : > { %4634 = vmatpush3.bf16.msra.mxu0 %v1386_v50  ;;  %v1426_v50 = vunpack.c.h.s8.bf16 %v868_v24  ;;  %v645_v24 = vpack.c.bf16 %v6412_v29, %v6412_v29 }
 0x1f8   : > { %4656 = vmatpush3.bf16.msra.mxu1 %v1402_v51  ;;  %4635 = vmatprep.subr.bf16.mxu0 %v1395_v52  ;;  %v1442_v51 = vunpack.c.h.s8.bf16 %v876_v41  ;;  %v869_v52 = vld [vmem:[%s6087_s17 + $0x530] sm:$0xff]  ;;  %v647_v41 = vpack.c.bf16 %v6415_v9, %v6415_v9 }
 0x1f9   : > { %4657 = vmatprep.subr.bf16.mxu1 %v1411_v54  ;;  %v1418_v54 = vunpack.c.h.s8.bf16 %v864_v45  ;;  %v892_v45 = vld [vmem:[%s6087_s17 + $0x5e8] sm:$0xff] }
 0x1fb   : > { %4636 = vmatpush3.bf16.msra.mxu0 %v1387_v40  ;;  %v1427_v40 = vunpack.c.l.s8.bf16 %v869_v52 }
 0x1fc   : > { %4658 = vmatpush3.bf16.msra.mxu1 %v1403_v57  ;;  %4637 = vmatprep.subr.bf16.mxu0 %v1396_v58  ;;  %v865_v57 = vld [vmem:[%s6087_s17 + $0x510] sm:$0xff]  ;;  %v1443_v58 = vunpack.c.l.s8.bf16 %v877_v53 }
 0x1fd   : > { %4659 = vmatprep.subr.bf16.mxu1 %v1412_v59  ;;  %v4335_v2 = vpop.f32.mrb[8].mxu0  ;;  %v873_v59 = vld [vmem:[%s6087_s17 + $0x550] sm:$0xff]  ;;  %v1419_v60 = vunpack.c.l.s8.bf16 %v865_v57 }
 0x1fe   : > { %v4357_v3 = vpop.f32.mrb[8].mxu1  ;;  %v4336_v4 = vpop.f32.mrb[9].mxu0  ;;  %v1435_v61 = vunpack.c.l.s8.bf16 %v873_v59  ;;  %v1436_v1 = vunpack.c.h.s8.bf16 %v873_v59 }
 0x1ff   : > { %v4358_v55 = vpop.f32.mrb[9].mxu1  ;;  %v4337_v56 = vadd.f32 %v4336_v4, %v4335_v2  ;;  %v4338_v5 = vpop.f32.mrb[10].mxu0  ;;  %4638 = vmatpush3.bf16.msra.mxu0 %v1388_v62  ;;  %v1428_v62 = vunpack.c.h.s8.bf16 %v869_v52  ;;  %v1445_v4 = vunpack.c.l.s8.bf16 %v878_v63 }
 0x200   : > { %v4359_v6 = vadd.f32 %v4358_v55, %v4357_v3  ;;  %4660 = vmatpush3.bf16.msra.mxu1 %v1404_v47  ;;  %v4360_v14 = vpop.f32.mrb[10].mxu1  ;;  %v4339_v17 = vpop.f32.mrb[11].mxu0  ;;  %4639 = vmatprep.subr.bf16.mxu0 %v1397_v48  ;;  %v1444_v47 = vunpack.c.h.s8.bf16 %v877_v53  ;;  %v870_v48 = vld [vmem:[%s6087_s17 + $0x538] sm:$0xff] }
 0x201   : > { %4661 = vmatprep.subr.bf16.mxu1 %v1413_v0  ;;  %v4361_v25 = vpop.f32.mrb[11].mxu1  ;;  %v2074_v26 = vadd.f32 %v4337_v56, %v6384_v22  ;;  %v871_v22 = vld [vmem:[%s6087_s17 + $0x540] sm:$0xff]  ;;  %v1420_v0 = vunpack.c.h.s8.bf16 %v865_v57  ;;  %v1429_v2 = vunpack.c.l.s8.bf16 %v870_v48  ;;  %v866_v3 = vld [vmem:[%s6087_s17 + $0x518] sm:$0xff]  ;;  %v1430_v27 = vunpack.c.h.s8.bf16 %v870_v48  ;;  %v893_v57 = vld [vmem:[%s6087_s17 + $0x5f0] sm:$0xff] }
 0x202   : > { %v1431_v23 = vunpack.c.l.s8.bf16 %v871_v22  ;;  %v1432_v21 = vunpack.c.h.s8.bf16 %v871_v22  ;;  %v874_v55 = vld [vmem:[%s6087_s17 + $0x558] sm:$0xff]  ;;  %v6448_v22 = vld [vmem:[%s6080_s30 + $0xb8] sm:$0xff]  ;;  %v1422_v8 = vunpack.c.h.s8.bf16 %v866_v3 }
 0x203   : > { %v6417_v30 = vadd.f32 %v4359_v6, %v2074_v26  ;;  %4640 = vmatpush3.bf16.msra.mxu0 %v1389_v10 }
 0x204   : > { %4662 = vmatpush3.bf16.msra.mxu1 %v1405_v11  ;;  %4641 = vmatprep.subr.bf16.mxu0 %v1398_v18  ;;  %v1421_v18 = vunpack.c.l.s8.bf16 %v866_v3  ;;  %v894_v3 = vld [vmem:[%s6087_s17 + $0x5f8] sm:$0xff] }
 0x205   : > { %4663 = vmatprep.subr.bf16.mxu1 %v1414_v19  ;;  %v1437_v19 = vunpack.c.l.s8.bf16 %v874_v55 }
 0x207   : > { %4642 = vmatpush3.bf16.msra.mxu0 %v1390_v15 }
 0x208   : > { %4664 = vmatpush3.bf16.msra.mxu1 %v1406_v16  ;;  %4671 = vmatprep.subr.bf16.mxu0 %v1423_v33  ;;  %v883_v33 = vld [vmem:[%s6087_s17 + $0x5a0] sm:$0xff] }
 0x209   : > { %4693 = vmatprep.subr.bf16.mxu1 %v1439_v35  ;;  %v6445_v35 = vld [vmem:[%s6080_s30 + $0xb0] sm:$0xff] }
 0x20a   : > { %2632 = vmatmul.mubr.bf16.vlgmr.msra.gmra.mrb[36].mxu0 %v641_v36  ;;  %v1438_v36 = vunpack.c.h.s8.bf16 %v874_v55 }
 0x20b   : > { %2672 = vmatmul.mubr.bf16.vlgmr.msra.gmra.mrb[36].mxu1 %v643_v37  ;;  %4672 = vmatpush3.bf16.msra.mxu0 %v1415_v38  ;;  %v1455_v37 = vunpack.c.l.s8.bf16 %v883_v33  ;;  %v879_v38 = vld [vmem:[%s6087_s17 + $0x580] sm:$0xff] }
 0x20c   : > { %4694 = vmatpush3.bf16.msra.mxu1 %v1431_v23  ;;  %4673 = vmatprep.subr.bf16.mxu0 %v1424_v12  ;;  %v1471_v23 = vunpack.c.l.s8.bf16 %v891_v34  ;;  %v529_v12 = vcombine.high %v6445_v35, %v6445_v35  ;;  %v1448_v29 = vunpack.c.h.s8.bf16 %v879_v38 }
 0x20d   : > { %4695 = vmatprep.subr.bf16.mxu1 %v1440_v13  ;;  %2711 = vmatprep.mubr.bf16.mxu0 %v646_v42  ;;  %v530_v13 = vcombine.high %v6448_v22, %v6448_v22  ;;  %v1447_v42 = vunpack.c.l.s8.bf16 %v879_v38  ;;  %v907_v38 = vld [vmem:[%s6087_s17 + $0x660] sm:$0xff] }
 0x20e   : > { %2751 = vmatprep.mubr.bf16.mxu1 %v648_v43 }
 0x20f   : > { %4674 = vmatpush3.bf16.msra.mxu0 %v1416_v20  ;;  %v1456_v20 = vunpack.c.h.s8.bf16 %v883_v33  ;;  %v652_v31 = vpack.c.bf16 %v530_v13, %v530_v13 }
 0x210   : > { %4696 = vmatpush3.bf16.msra.mxu1 %v1432_v21  ;;  %4675 = vmatprep.subr.bf16.mxu0 %v1425_v44  ;;  %v1472_v21 = vunpack.c.h.s8.bf16 %v891_v34  ;;  %v884_v44 = vld [vmem:[%s6087_s17 + $0x5a8] sm:$0xff]  ;;  %v1478_v34 = vunpack.c.h.s8.bf16 %v894_v3 }
 0x211   : > { %4697 = vmatprep.subr.bf16.mxu1 %v1441_v46  ;;  %v650_v46 = vpack.c.bf16 %v529_v12, %v529_v12 }
 0x213   : > { %4676 = vmatpush3.bf16.msra.mxu0 %v1417_v32  ;;  %v1457_v32 = vunpack.c.l.s8.bf16 %v884_v44 }
 0x214   : > { %4698 = vmatpush3.bf16.msra.mxu1 %v1433_v49  ;;  %4677 = vmatprep.subr.bf16.mxu0 %v1426_v50  ;;  %v880_v49 = vld [vmem:[%s6087_s17 + $0x588] sm:$0xff]  ;;  %v1473_v50 = vunpack.c.l.s8.bf16 %v892_v45 }
 0x215   : > { %4699 = vmatprep.subr.bf16.mxu1 %v1442_v51  ;;  %v888_v51 = vld [vmem:[%s6087_s17 + $0x5c8] sm:$0xff]  ;;  %v1449_v52 = vunpack.c.l.s8.bf16 %v880_v49 }
 0x216   : > { %v1465_v53 = vunpack.c.l.s8.bf16 %v888_v51  ;;  %v1466_v59 = vunpack.c.h.s8.bf16 %v888_v51 }
 0x217   : > { %4678 = vmatpush3.bf16.msra.mxu0 %v1418_v54  ;;  %v1458_v54 = vunpack.c.h.s8.bf16 %v884_v44  ;;  %v649_v44 = vpack.c.bf16 %v6445_v35, %v6445_v35 }
 0x218   : > { %4700 = vmatpush3.bf16.msra.mxu1 %v1434_v39  ;;  %4679 = vmatprep.subr.bf16.mxu0 %v1427_v40  ;;  %v1474_v39 = vunpack.c.h.s8.bf16 %v892_v45  ;;  %v885_v40 = vld [vmem:[%s6087_s17 + $0x5b0] sm:$0xff]  ;;  %v651_v45 = vpack.c.bf16 %v6448_v22, %v6448_v22 }
 0x219   : > { %4701 = vmatprep.subr.bf16.mxu1 %v1443_v58  ;;  %v1450_v58 = vunpack.c.h.s8.bf16 %v880_v49  ;;  %v908_v49 = vld [vmem:[%s6087_s17 + $0x668] sm:$0xff] }
 0x21b   : > { %4680 = vmatpush3.bf16.msra.mxu0 %v1419_v60  ;;  %v1459_v60 = vunpack.c.l.s8.bf16 %v885_v40 }
 0x21c   : > { %4702 = vmatpush3.bf16.msra.mxu1 %v1435_v61  ;;  %4681 = vmatprep.subr.bf16.mxu0 %v1428_v62  ;;  %v881_v61 = vld [vmem:[%s6087_s17 + $0x590] sm:$0xff]  ;;  %v1475_v62 = vunpack.c.l.s8.bf16 %v893_v57 }
 0x21d   : > { %4703 = vmatprep.subr.bf16.mxu1 %v1444_v47  ;;  %v4379_v56 = vpop.f32.mrb[12].mxu0  ;;  %v889_v47 = vld [vmem:[%s6087_s17 + $0x5d0] sm:$0xff]  ;;  %v1451_v48 = vunpack.c.l.s8.bf16 %v881_v61 }
 0x21e   : > { %v4401_v5 = vpop.f32.mrb[12].mxu1  ;;  %v4380_v6 = vpop.f32.mrb[13].mxu0  ;;  %v1467_v63 = vunpack.c.l.s8.bf16 %v889_v47  ;;  %v1468_v55 = vunpack.c.h.s8.bf16 %v889_v47 }
 0x21f   : > { %v4402_v10 = vpop.f32.mrb[13].mxu1  ;;  %v4381_v11 = vadd.f32 %v4380_v6, %v4379_v56  ;;  %v4382_v14 = vpop.f32.mrb[14].mxu0  ;;  %4682 = vmatpush3.bf16.msra.mxu0 %v1420_v0  ;;  %v1460_v0 = vunpack.c.h.s8.bf16 %v885_v40  ;;  %v1477_v6 = vunpack.c.l.s8.bf16 %v894_v3 }
 0x220   : > { %v4403_v17 = vadd.f32 %v4402_v10, %v4401_v5  ;;  %4704 = vmatpush3.bf16.msra.mxu1 %v1436_v1  ;;  %v4404_v25 = vpop.f32.mrb[14].mxu1  ;;  %v4383_v26 = vpop.f32.mrb[15].mxu0  ;;  %4683 = vmatprep.subr.bf16.mxu0 %v1429_v2  ;;  %v1476_v1 = vunpack.c.h.s8.bf16 %v893_v57  ;;  %v886_v2 = vld [vmem:[%s6087_s17 + $0x5b8] sm:$0xff] }
 0x221   : > { %4705 = vmatprep.subr.bf16.mxu1 %v1445_v4  ;;  %v4405_v15 = vpop.f32.mrb[15].mxu1  ;;  %v2154_v16 = vadd.f32 %v4381_v11, %v6417_v30  ;;  %v887_v30 = vld [vmem:[%s6087_s17 + $0x5c0] sm:$0xff]  ;;  %v1452_v4 = vunpack.c.h.s8.bf16 %v881_v61  ;;  %v1461_v56 = vunpack.c.l.s8.bf16 %v886_v2  ;;  %v882_v5 = vld [vmem:[%s6087_s17 + $0x598] sm:$0xff]  ;;  %v1462_v33 = vunpack.c.h.s8.bf16 %v886_v2  ;;  %v909_v61 = vld [vmem:[%s6087_s17 + $0x670] sm:$0xff] }
 0x222   : > { %v1463_v43 = vunpack.c.l.s8.bf16 %v887_v30  ;;  %v1464_v9 = vunpack.c.h.s8.bf16 %v887_v30  ;;  %v890_v10 = vld [vmem:[%s6087_s17 + $0x5d8] sm:$0xff]  ;;  %v1454_v13 = vunpack.c.h.s8.bf16 %v882_v5 }
 0x223   : > { %v6450_v7 = vadd.f32 %v4403_v17, %v2154_v16  ;;  %4684 = vmatpush3.bf16.msra.mxu0 %v1421_v18  ;;  %v6481_v30 = vld [vmem:[%s6080_s30 + $0xc8] sm:$0xff] }
 0x224   : > { %4706 = vmatpush3.bf16.msra.mxu1 %v1437_v19  ;;  %4685 = vmatprep.subr.bf16.mxu0 %v1430_v27  ;;  %v1453_v27 = vunpack.c.l.s8.bf16 %v882_v5  ;;  %v910_v5 = vld [vmem:[%s6087_s17 + $0x678] sm:$0xff] }
 0x225   : > { %4707 = vmatprep.subr.bf16.mxu1 %v1446_v28  ;;  %v1469_v28 = vunpack.c.l.s8.bf16 %v890_v10 }
 0x227   : > { %4686 = vmatpush3.bf16.msra.mxu0 %v1422_v8 }
 0x228   : > { %4708 = vmatpush3.bf16.msra.mxu1 %v1438_v36  ;;  %4715 = vmatprep.subr.bf16.mxu0 %v1455_v37  ;;  %v899_v37 = vld [vmem:[%s6087_s17 + $0x620] sm:$0xff] }
 0x229   : > { %4737 = vmatprep.subr.bf16.mxu1 %v1471_v23  ;;  %v6478_v23 = vld [vmem:[%s6080_s30 + $0xc0] sm:$0xff] }
 0x22a   : > { %2712 = vmatmul.mubr.bf16.vlgmr.msra.gmra.mrb[40].mxu0 %v645_v24  ;;  %v1470_v24 = vunpack.c.h.s8.bf16 %v890_v10 }
 0x22b   : > { %2752 = vmatmul.mubr.bf16.vlgmr.msra.gmra.mrb[40].mxu1 %v647_v41  ;;  %4716 = vmatpush3.bf16.msra.mxu0 %v1447_v42  ;;  %v1487_v41 = vunpack.c.l.s8.bf16 %v899_v37  ;;  %v895_v42 = vld [vmem:[%s6087_s17 + $0x600] sm:$0xff] }
 0x22c   : > { %4738 = vmatpush3.bf16.msra.mxu1 %v1463_v43  ;;  %4717 = vmatprep.subr.bf16.mxu0 %v1456_v20  ;;  %v1503_v43 = vunpack.c.l.s8.bf16 %v907_v38  ;;  %v531_v20 = vcombine.high %v6478_v23, %v6478_v23  ;;  %v1480_v35 = vunpack.c.h.s8.bf16 %v895_v42 }
 0x22d   : > { %4739 = vmatprep.subr.bf16.mxu1 %v1472_v21  ;;  %2791 = vmatprep.mubr.bf16.mxu0 %v650_v46  ;;  %v532_v21 = vcombine.high %v6481_v30, %v6481_v30  ;;  %v1479_v46 = vunpack.c.l.s8.bf16 %v895_v42  ;;  %v923_v42 = vld [vmem:[%s6087_s17 + $0x6e0] sm:$0xff] }
 0x22e   : > { %2831 = vmatprep.mubr.bf16.mxu1 %v652_v31 }
 0x22f   : > { %4718 = vmatpush3.bf16.msra.mxu0 %v1448_v29  ;;  %v1488_v29 = vunpack.c.h.s8.bf16 %v899_v37  ;;  %v656_v51 = vpack.c.bf16 %v532_v21, %v532_v21 }
 0x230   : > { %4740 = vmatpush3.bf16.msra.mxu1 %v1464_v9  ;;  %4719 = vmatprep.subr.bf16.mxu0 %v1457_v32  ;;  %v1504_v9 = vunpack.c.h.s8.bf16 %v907_v38  ;;  %v900_v32 = vld [vmem:[%s6087_s17 + $0x628] sm:$0xff]  ;;  %v1510_v38 = vunpack.c.h.s8.bf16 %v910_v5 }
 0x231   : > { %4741 = vmatprep.subr.bf16.mxu1 %v1473_v50  ;;  %v654_v50 = vpack.c.bf16 %v531_v20, %v531_v20 }
 0x233   : > { %4720 = vmatpush3.bf16.msra.mxu0 %v1449_v52  ;;  %v1489_v52 = vunpack.c.l.s8.bf16 %v900_v32 }
 0x234   : > { %4742 = vmatpush3.bf16.msra.mxu1 %v1465_v53  ;;  %4721 = vmatprep.subr.bf16.mxu0 %v1458_v54  ;;  %v896_v53 = vld [vmem:[%s6087_s17 + $0x608] sm:$0xff]  ;;  %v1505_v54 = vunpack.c.l.s8.bf16 %v908_v49 }
 0x235   : > { %4743 = vmatprep.subr.bf16.mxu1 %v1474_v39  ;;  %v904_v39 = vld [vmem:[%s6087_s17 + $0x648] sm:$0xff]  ;;  %v1481_v40 = vunpack.c.l.s8.bf16 %v896_v53 }
 0x236   : > { %v1497_v57 = vunpack.c.l.s8.bf16 %v904_v39  ;;  %v1498_v47 = vunpack.c.h.s8.bf16 %v904_v39 }
 0x237   : > { %4722 = vmatpush3.bf16.msra.mxu0 %v1450_v58  ;;  %v1490_v58 = vunpack.c.h.s8.bf16 %v900_v32  ;;  %v653_v32 = vpack.c.bf16 %v6478_v23, %v6478_v23 }
 0x238   : > { %4744 = vmatpush3.bf16.msra.mxu1 %v1466_v59  ;;  %4723 = vmatprep.subr.bf16.mxu0 %v1459_v60  ;;  %v1506_v59 = vunpack.c.h.s8.bf16 %v908_v49  ;;  %v901_v60 = vld [vmem:[%s6087_s17 + $0x630] sm:$0xff]  ;;  %v655_v49 = vpack.c.bf16 %v6481_v30, %v6481_v30 }
 0x239   : > { %4745 = vmatprep.subr.bf16.mxu1 %v1475_v62  ;;  %v1482_v62 = vunpack.c.h.s8.bf16 %v896_v53  ;;  %v924_v53 = vld [vmem:[%s6087_s17 + $0x6e8] sm:$0xff] }
 0x23b   : > { %4724 = vmatpush3.bf16.msra.mxu0 %v1451_v48  ;;  %v1491_v48 = vunpack.c.l.s8.bf16 %v901_v60 }
 0x23c   : > { %4746 = vmatpush3.bf16.msra.mxu1 %v1467_v63  ;;  %4725 = vmatprep.subr.bf16.mxu0 %v1460_v0  ;;  %v897_v63 = vld [vmem:[%s6087_s17 + $0x610] sm:$0xff]  ;;  %v1507_v0 = vunpack.c.l.s8.bf16 %v909_v61 }
 0x23d   : > { %4747 = vmatprep.subr.bf16.mxu1 %v1476_v1  ;;  %v4423_v11 = vpop.f32.mrb[16].mxu0  ;;  %v905_v1 = vld [vmem:[%s6087_s17 + $0x650] sm:$0xff]  ;;  %v1483_v2 = vunpack.c.l.s8.bf16 %v897_v63 }
 0x23e   : > { %v4445_v14 = vpop.f32.mrb[16].mxu1  ;;  %v4424_v17 = vpop.f32.mrb[17].mxu0  ;;  %v1499_v3 = vunpack.c.l.s8.bf16 %v905_v1  ;;  %v1500_v10 = vunpack.c.h.s8.bf16 %v905_v1 }
 0x23f   : > { %v4446_v18 = vpop.f32.mrb[17].mxu1  ;;  %v4425_v19 = vadd.f32 %v4424_v17, %v4423_v11  ;;  %v4426_v25 = vpop.f32.mrb[18].mxu0  ;;  %4726 = vmatpush3.bf16.msra.mxu0 %v1452_v4  ;;  %v1492_v4 = vunpack.c.h.s8.bf16 %v901_v60  ;;  %v1509_v17 = vunpack.c.l.s8.bf16 %v910_v5 }
 0x240   : > { %v4447_v26 = vadd.f32 %v4446_v18, %v4445_v14  ;;  %4748 = vmatpush3.bf16.msra.mxu1 %v1468_v55  ;;  %v4448_v15 = vpop.f32.mrb[18].mxu1  ;;  %v4427_v16 = vpop.f32.mrb[19].mxu0  ;;  %4727 = vmatprep.subr.bf16.mxu0 %v1461_v56  ;;  %v1508_v55 = vunpack.c.h.s8.bf16 %v909_v61  ;;  %v902_v56 = vld [vmem:[%s6087_s17 + $0x638] sm:$0xff] }
 0x241   : > { %4749 = vmatprep.subr.bf16.mxu1 %v1477_v6  ;;  %v4449_v8 = vpop.f32.mrb[19].mxu1  ;;  %v2234_v36 = vadd.f32 %v4425_v19, %v6450_v7  ;;  %v903_v7 = vld [vmem:[%s6087_s17 + $0x640] sm:$0xff]  ;;  %v1484_v6 = vunpack.c.h.s8.bf16 %v897_v63  ;;  %v1493_v11 = vunpack.c.l.s8.bf16 %v902_v56  ;;  %v898_v14 = vld [vmem:[%s6087_s17 + $0x618] sm:$0xff]  ;;  %v1494_v37 = vunpack.c.h.s8.bf16 %v902_v56  ;;  %v925_v63 = vld [vmem:[%s6087_s17 + $0x6f0] sm:$0xff] }
 0x242   : > { %v1495_v31 = vunpack.c.l.s8.bf16 %v903_v7  ;;  %v1496_v22 = vunpack.c.h.s8.bf16 %v903_v7  ;;  %v906_v18 = vld [vmem:[%s6087_s17 + $0x658] sm:$0xff]  ;;  %v6514_v7 = vld [vmem:[%s6080_s30 + $0xd8] sm:$0xff]  ;;  %v1486_v21 = vunpack.c.h.s8.bf16 %v898_v14 }
 0x243   : > { %v6483_v12 = vadd.f32 %v4447_v26, %v2234_v36  ;;  %4728 = vmatpush3.bf16.msra.mxu0 %v1453_v27 }
 0x244   : > { %4750 = vmatpush3.bf16.msra.mxu1 %v1469_v28  ;;  %4729 = vmatprep.subr.bf16.mxu0 %v1462_v33  ;;  %v1485_v33 = vunpack.c.l.s8.bf16 %v898_v14  ;;  %v926_v14 = vld [vmem:[%s6087_s17 + $0x6f8] sm:$0xff] }
 0x245   : > { %4751 = vmatprep.subr.bf16.mxu1 %v1478_v34  ;;  %v1501_v34 = vunpack.c.l.s8.bf16 %v906_v18 }
 0x247   : > { %4730 = vmatpush3.bf16.msra.mxu0 %v1454_v13 }
 0x248   : > { %4752 = vmatpush3.bf16.msra.mxu1 %v1470_v24  ;;  %4759 = vmatprep.subr.bf16.mxu0 %v1487_v41  ;;  %v915_v41 = vld [vmem:[%s6087_s17 + $0x6a0] sm:$0xff] }
 0x249   : > { %4781 = vmatprep.subr.bf16.mxu1 %v1503_v43  ;;  %v6511_v43 = vld [vmem:[%s6080_s30 + $0xd0] sm:$0xff] }
 0x24a   : > { %2792 = vmatmul.mubr.bf16.vlgmr.msra.gmra.mrb[44].mxu0 %v649_v44  ;;  %v1502_v44 = vunpack.c.h.s8.bf16 %v906_v18 }
 0x24b   : > { %2832 = vmatmul.mubr.bf16.vlgmr.msra.gmra.mrb[44].mxu1 %v651_v45  ;;  %4760 = vmatpush3.bf16.msra.mxu0 %v1479_v46  ;;  %v1519_v45 = vunpack.c.l.s8.bf16 %v915_v41  ;;  %v911_v46 = vld [vmem:[%s6087_s17 + $0x680] sm:$0xff] }
 0x24c   : > { %4782 = vmatpush3.bf16.msra.mxu1 %v1495_v31  ;;  %4761 = vmatprep.subr.bf16.mxu0 %v1488_v29  ;;  %v1535_v31 = vunpack.c.l.s8.bf16 %v923_v42  ;;  %v533_v29 = vcombine.high %v6511_v43, %v6511_v43  ;;  %v1512_v23 = vunpack.c.h.s8.bf16 %v911_v46 }
 0x24d   : > { %4783 = vmatprep.subr.bf16.mxu1 %v1504_v9  ;;  %2871 = vmatprep.mubr.bf16.mxu0 %v654_v50  ;;  %v534_v9 = vcombine.high %v6514_v7, %v6514_v7  ;;  %v1511_v50 = vunpack.c.l.s8.bf16 %v911_v46  ;;  %v939_v46 = vld [vmem:[%s6087_s17 + $0x760] sm:$0xff] }
 0x24e   : > { %2911 = vmatprep.mubr.bf16.mxu1 %v656_v51 }
 0x24f   : > { %4762 = vmatpush3.bf16.msra.mxu0 %v1480_v35  ;;  %v1520_v35 = vunpack.c.h.s8.bf16 %v915_v41  ;;  %v660_v39 = vpack.c.bf16 %v534_v9, %v534_v9 }
 0x250   : > { %4784 = vmatpush3.bf16.msra.mxu1 %v1496_v22  ;;  %4763 = vmatprep.subr.bf16.mxu0 %v1489_v52  ;;  %v1536_v22 = vunpack.c.h.s8.bf16 %v923_v42  ;;  %v916_v52 = vld [vmem:[%s6087_s17 + $0x6a8] sm:$0xff]  ;;  %v1542_v42 = vunpack.c.h.s8.bf16 %v926_v14 }
 0x251   : > { %4785 = vmatprep.subr.bf16.mxu1 %v1505_v54  ;;  %v658_v54 = vpack.c.bf16 %v533_v29, %v533_v29 }
 0x253   : > { %4764 = vmatpush3.bf16.msra.mxu0 %v1481_v40  ;;  %v1521_v40 = vunpack.c.l.s8.bf16 %v916_v52 }
 0x254   : > { %4786 = vmatpush3.bf16.msra.mxu1 %v1497_v57  ;;  %4765 = vmatprep.subr.bf16.mxu0 %v1490_v58  ;;  %v912_v57 = vld [vmem:[%s6087_s17 + $0x688] sm:$0xff]  ;;  %v1537_v58 = vunpack.c.l.s8.bf16 %v924_v53 }
 0x255   : > { %4787 = vmatprep.subr.bf16.mxu1 %v1506_v59  ;;  %v920_v59 = vld [vmem:[%s6087_s17 + $0x6c8] sm:$0xff]  ;;  %v1513_v60 = vunpack.c.l.s8.bf16 %v912_v57 }
 0x256   : > { %v1529_v61 = vunpack.c.l.s8.bf16 %v920_v59  ;;  %v1530_v1 = vunpack.c.h.s8.bf16 %v920_v59 }
 0x257   : > { %4766 = vmatpush3.bf16.msra.mxu0 %v1482_v62  ;;  %v1522_v62 = vunpack.c.h.s8.bf16 %v916_v52  ;;  %v657_v52 = vpack.c.bf16 %v6511_v43, %v6511_v43 }
 0x258   : > { %4788 = vmatpush3.bf16.msra.mxu1 %v1498_v47  ;;  %4767 = vmatprep.subr.bf16.mxu0 %v1491_v48  ;;  %v1538_v47 = vunpack.c.h.s8.bf16 %v924_v53  ;;  %v917_v48 = vld [vmem:[%s6087_s17 + $0x6b0] sm:$0xff]  ;;  %v659_v53 = vpack.c.bf16 %v6514_v7, %v6514_v7 }
 0x259   : > { %4789 = vmatprep.subr.bf16.mxu1 %v1507_v0  ;;  %v1514_v0 = vunpack.c.h.s8.bf16 %v912_v57  ;;  %v940_v57 = vld [vmem:[%s6087_s17 + $0x768] sm:$0xff] }
 0x25b   : > { %4768 = vmatpush3.bf16.msra.mxu0 %v1483_v2  ;;  %v1523_v2 = vunpack.c.l.s8.bf16 %v917_v48 }
 0x25c   : > { %4790 = vmatpush3.bf16.msra.mxu1 %v1499_v3  ;;  %4769 = vmatprep.subr.bf16.mxu0 %v1492_v4  ;;  %v913_v3 = vld [vmem:[%s6087_s17 + $0x690] sm:$0xff]  ;;  %v1539_v4 = vunpack.c.l.s8.bf16 %v925_v63 }
 0x25d   : > { %4791 = vmatprep.subr.bf16.mxu1 %v1508_v55  ;;  %v4467_v19 = vpop.f32.mrb[20].mxu0  ;;  %v921_v55 = vld [vmem:[%s6087_s17 + $0x6d0] sm:$0xff]  ;;  %v1515_v56 = vunpack.c.l.s8.bf16 %v913_v3 }
 0x25e   : > { %v4489_v25 = vpop.f32.mrb[20].mxu1  ;;  %v4468_v26 = vpop.f32.mrb[21].mxu0  ;;  %v1531_v5 = vunpack.c.l.s8.bf16 %v921_v55  ;;  %v1532_v18 = vunpack.c.h.s8.bf16 %v921_v55 }
 0x25f   : > { %v4490_v27 = vpop.f32.mrb[21].mxu1  ;;  %v4469_v28 = vadd.f32 %v4468_v26, %v4467_v19  ;;  %v4470_v15 = vpop.f32.mrb[22].mxu0  ;;  %4770 = vmatpush3.bf16.msra.mxu0 %v1484_v6  ;;  %v1524_v6 = vunpack.c.h.s8.bf16 %v917_v48  ;;  %v1541_v26 = vunpack.c.l.s8.bf16 %v926_v14 }
 0x260   : > { %v4491_v16 = vadd.f32 %v4490_v27, %v4489_v25  ;;  %4792 = vmatpush3.bf16.msra.mxu1 %v1500_v10  ;;  %v4492_v8 = vpop.f32.mrb[22].mxu1  ;;  %v4471_v36 = vpop.f32.mrb[23].mxu0  ;;  %4771 = vmatprep.subr.bf16.mxu0 %v1493_v11  ;;  %v1540_v10 = vunpack.c.h.s8.bf16 %v925_v63  ;;  %v918_v11 = vld [vmem:[%s6087_s17 + $0x6b8] sm:$0xff] }
 0x261   : > { %4793 = vmatprep.subr.bf16.mxu1 %v1509_v17  ;;  %v4493_v13 = vpop.f32.mrb[23].mxu1  ;;  %v2314_v24 = vadd.f32 %v4469_v28, %v6483_v12  ;;  %v919_v12 = vld [vmem:[%s6087_s17 + $0x6c0] sm:$0xff]  ;;  %v1516_v17 = vunpack.c.h.s8.bf16 %v913_v3  ;;  %v1525_v19 = vunpack.c.l.s8.bf16 %v918_v11  ;;  %v914_v25 = vld [vmem:[%s6087_s17 + $0x698] sm:$0xff]  ;;  %v1526_v41 = vunpack.c.h.s8.bf16 %v918_v11  ;;  %v941_v3 = vld [vmem:[%s6087_s17 + $0x770] sm:$0xff] }
 0x262   : > { %v1527_v51 = vunpack.c.l.s8.bf16 %v919_v12  ;;  %v1528_v30 = vunpack.c.h.s8.bf16 %v919_v12  ;;  %v922_v27 = vld [vmem:[%s6087_s17 + $0x6d8] sm:$0xff]  ;;  %v1518_v9 = vunpack.c.h.s8.bf16 %v914_v25 }
 0x263   : > { %v6516_v20 = vadd.f32 %v4491_v16, %v2314_v24  ;;  %4772 = vmatpush3.bf16.msra.mxu0 %v1485_v33  ;;  %v6547_v12 = vld [vmem:[%s6080_s30 + $0xe8] sm:$0xff] }
 0x264   : > { %4794 = vmatpush3.bf16.msra.mxu1 %v1501_v34  ;;  %4773 = vmatprep.subr.bf16.mxu0 %v1494_v37  ;;  %v1517_v37 = vunpack.c.l.s8.bf16 %v914_v25  ;;  %v942_v25 = vld [vmem:[%s6087_s17 + $0x778] sm:$0xff] }
 0x265   : > { %4795 = vmatprep.subr.bf16.mxu1 %v1510_v38  ;;  %v1533_v38 = vunpack.c.l.s8.bf16 %v922_v27 }
 0x267   : > { %4774 = vmatpush3.bf16.msra.mxu0 %v1486_v21 }
 0x268   : > { %4796 = vmatpush3.bf16.msra.mxu1 %v1502_v44  ;;  %4803 = vmatprep.subr.bf16.mxu0 %v1519_v45  ;;  %v931_v45 = vld [vmem:[%s6087_s17 + $0x720] sm:$0xff] }
 0x269   : > { %4825 = vmatprep.subr.bf16.mxu1 %v1535_v31  ;;  %v6544_v31 = vld [vmem:[%s6080_s30 + $0xe0] sm:$0xff] }
 0x26a   : > { %2872 = vmatmul.mubr.bf16.vlgmr.msra.gmra.mrb[48].mxu0 %v653_v32  ;;  %v1534_v32 = vunpack.c.h.s8.bf16 %v922_v27 }
 0x26b   : > { %2912 = vmatmul.mubr.bf16.vlgmr.msra.gmra.mrb[48].mxu1 %v655_v49  ;;  %4804 = vmatpush3.bf16.msra.mxu0 %v1511_v50  ;;  %v1551_v49 = vunpack.c.l.s8.bf16 %v931_v45  ;;  %v927_v50 = vld [vmem:[%s6087_s17 + $0x700] sm:$0xff] }
 0x26c   : > { %4826 = vmatpush3.bf16.msra.mxu1 %v1527_v51  ;;  %4805 = vmatprep.subr.bf16.mxu0 %v1520_v35  ;;  %v1567_v51 = vunpack.c.l.s8.bf16 %v939_v46  ;;  %v535_v35 = vcombine.high %v6544_v31, %v6544_v31  ;;  %v1544_v43 = vunpack.c.h.s8.bf16 %v927_v50 }
 0x26d   : > { %4827 = vmatprep.subr.bf16.mxu1 %v1536_v22  ;;  %2951 = vmatprep.mubr.bf16.mxu0 %v658_v54  ;;  %v536_v22 = vcombine.high %v6547_v12, %v6547_v12  ;;  %v1543_v54 = vunpack.c.l.s8.bf16 %v927_v50  ;;  %v955_v50 = vld [vmem:[%s6087_s17 + $0x7e0] sm:$0xff] }
 0x26e   : > { %2991 = vmatprep.mubr.bf16.mxu1 %v660_v39 }
 0x26f   : > { %4806 = vmatpush3.bf16.msra.mxu0 %v1512_v23  ;;  %v1552_v23 = vunpack.c.h.s8.bf16 %v931_v45  ;;  %v664_v59 = vpack.c.bf16 %v536_v22, %v536_v22 }
 0x270   : > { %4828 = vmatpush3.bf16.msra.mxu1 %v1528_v30  ;;  %4807 = vmatprep.subr.bf16.mxu0 %v1521_v40  ;;  %v1568_v30 = vunpack.c.h.s8.bf16 %v939_v46  ;;  %v932_v40 = vld [vmem:[%s6087_s17 + $0x728] sm:$0xff]  ;;  %v1574_v46 = vunpack.c.h.s8.bf16 %v942_v25 }
 0x271   : > { %4829 = vmatprep.subr.bf16.mxu1 %v1537_v58  ;;  %v662_v58 = vpack.c.bf16 %v535_v35, %v535_v35 }
 0x273   : > { %4808 = vmatpush3.bf16.msra.mxu0 %v1513_v60  ;;  %v1553_v60 = vunpack.c.l.s8.bf16 %v932_v40 }
 0x274   : > { %4830 = vmatpush3.bf16.msra.mxu1 %v1529_v61  ;;  %4809 = vmatprep.subr.bf16.mxu0 %v1522_v62  ;;  %v928_v61 = vld [vmem:[%s6087_s17 + $0x708] sm:$0xff]  ;;  %v1569_v62 = vunpack.c.l.s8.bf16 %v940_v57 }
 0x275   : > { %4831 = vmatprep.subr.bf16.mxu1 %v1538_v47  ;;  %v936_v47 = vld [vmem:[%s6087_s17 + $0x748] sm:$0xff]  ;;  %v1545_v48 = vunpack.c.l.s8.bf16 %v928_v61 }
 0x276   : > { %v1561_v63 = vunpack.c.l.s8.bf16 %v936_v47  ;;  %v1562_v55 = vunpack.c.h.s8.bf16 %v936_v47 }
 0x277   : > { %4810 = vmatpush3.bf16.msra.mxu0 %v1514_v0  ;;  %v1554_v0 = vunpack.c.h.s8.bf16 %v932_v40  ;;  %v661_v40 = vpack.c.bf16 %v6544_v31, %v6544_v31 }
 0x278   : > { %4832 = vmatpush3.bf16.msra.mxu1 %v1530_v1  ;;  %4811 = vmatprep.subr.bf16.mxu0 %v1523_v2  ;;  %v1570_v1 = vunpack.c.h.s8.bf16 %v940_v57  ;;  %v933_v2 = vld [vmem:[%s6087_s17 + $0x730] sm:$0xff]  ;;  %v663_v57 = vpack.c.bf16 %v6547_v12, %v6547_v12 }
 0x279   : > { %4833 = vmatprep.subr.bf16.mxu1 %v1539_v4  ;;  %v1546_v4 = vunpack.c.h.s8.bf16 %v928_v61  ;;  %v956_v61 = vld [vmem:[%s6087_s17 + $0x7e8] sm:$0xff] }
 0x27b   : > { %4812 = vmatpush3.bf16.msra.mxu0 %v1515_v56  ;;  %v1555_v56 = vunpack.c.l.s8.bf16 %v933_v2 }
 0x27c   : > { %4834 = vmatpush3.bf16.msra.mxu1 %v1531_v5  ;;  %4813 = vmatprep.subr.bf16.mxu0 %v1524_v6  ;;  %v929_v5 = vld [vmem:[%s6087_s17 + $0x710] sm:$0xff]  ;;  %v1571_v6 = vunpack.c.l.s8.bf16 %v941_v3 }
 0x27d   : > { %4835 = vmatprep.subr.bf16.mxu1 %v1540_v10  ;;  %v4511_v28 = vpop.f32.mrb[24].mxu0  ;;  %v937_v10 = vld [vmem:[%s6087_s17 + $0x750] sm:$0xff]  ;;  %v1547_v11 = vunpack.c.l.s8.bf16 %v929_v5 }
 0x27e   : > { %v4533_v15 = vpop.f32.mrb[24].mxu1  ;;  %v4512_v16 = vpop.f32.mrb[25].mxu0  ;;  %v1563_v14 = vunpack.c.l.s8.bf16 %v937_v10  ;;  %v1564_v27 = vunpack.c.h.s8.bf16 %v937_v10 }
 0x27f   : > { %v4534_v33 = vpop.f32.mrb[25].mxu1  ;;  %v4513_v34 = vadd.f32 %v4512_v16, %v4511_v28  ;;  %v4514_v8 = vpop.f32.mrb[26].mxu0  ;;  %4814 = vmatpush3.bf16.msra.mxu0 %v1516_v17  ;;  %v1556_v17 = vunpack.c.h.s8.bf16 %v933_v2  ;;  %v1573_v16 = vunpack.c.l.s8.bf16 %v942_v25 }
 0x280   : > { %v4535_v36 = vadd.f32 %v4534_v33, %v4533_v15  ;;  %4836 = vmatpush3.bf16.msra.mxu1 %v1532_v18  ;;  %v4536_v13 = vpop.f32.mrb[26].mxu1  ;;  %v4515_v24 = vpop.f32.mrb[27].mxu0  ;;  %4815 = vmatprep.subr.bf16.mxu0 %v1525_v19  ;;  %v1572_v18 = vunpack.c.h.s8.bf16 %v941_v3  ;;  %v934_v19 = vld [vmem:[%s6087_s17 + $0x738] sm:$0xff] }
 0x281   : > { %4837 = vmatprep.subr.bf16.mxu1 %v1541_v26  ;;  %v4537_v21 = vpop.f32.mrb[27].mxu1  ;;  %v2394_v44 = vadd.f32 %v4513_v34, %v6516_v20  ;;  %v935_v20 = vld [vmem:[%s6087_s17 + $0x740] sm:$0xff]  ;;  %v1548_v26 = vunpack.c.h.s8.bf16 %v929_v5  ;;  %v1557_v28 = vunpack.c.l.s8.bf16 %v934_v19  ;;  %v930_v15 = vld [vmem:[%s6087_s17 + $0x718] sm:$0xff]  ;;  %v1558_v45 = vunpack.c.h.s8.bf16 %v934_v19  ;;  %v957_v5 = vld [vmem:[%s6087_s17 + $0x7f0] sm:$0xff] }
 0x282   : > { %v1559_v39 = vunpack.c.l.s8.bf16 %v935_v20  ;;  %v1560_v7 = vunpack.c.h.s8.bf16 %v935_v20  ;;  %v938_v33 = vld [vmem:[%s6087_s17 + $0x758] sm:$0xff]  ;;  %v6580_v20 = vld [vmem:[%s6080_s30 + $0xf8] sm:$0xff]  ;;  %v1550_v22 = vunpack.c.h.s8.bf16 %v930_v15 }
 0x283   : > { %v6549_v29 = vadd.f32 %v4535_v36, %v2394_v44  ;;  %4816 = vmatpush3.bf16.msra.mxu0 %v1517_v37 }
 0x284   : > { %4838 = vmatpush3.bf16.msra.mxu1 %v1533_v38  ;;  %4817 = vmatprep.subr.bf16.mxu0 %v1526_v41  ;;  %v1549_v41 = vunpack.c.l.s8.bf16 %v930_v15  ;;  %v958_v15 = vld [vmem:[%s6087_s17 + $0x7f8] sm:$0xff] }
 0x285   : > { %4839 = vmatprep.subr.bf16.mxu1 %v1542_v42  ;;  %v1565_v42 = vunpack.c.l.s8.bf16 %v938_v33 }
 0x287   : > { %4818 = vmatpush3.bf16.msra.mxu0 %v1518_v9 }
 0x288   : > { %4840 = vmatpush3.bf16.msra.mxu1 %v1534_v32  ;;  %4847 = vmatprep.subr.bf16.mxu0 %v1551_v49  ;;  %v947_v49 = vld [vmem:[%s6087_s17 + $0x7a0] sm:$0xff] }
 0x289   : > { %4869 = vmatprep.subr.bf16.mxu1 %v1567_v51  ;;  %v6577_v51 = vld [vmem:[%s6080_s30 + $0xf0] sm:$0xff] }
 0x28a   : > { %2952 = vmatmul.mubr.bf16.vlgmr.msra.gmra.mrb[52].mxu0 %v657_v52  ;;  %v1566_v52 = vunpack.c.h.s8.bf16 %v938_v33 }
 0x28b   : > { %2992 = vmatmul.mubr.bf16.vlgmr.msra.gmra.mrb[52].mxu1 %v659_v53  ;;  %4848 = vmatpush3.bf16.msra.mxu0 %v1543_v54  ;;  %v1583_v53 = vunpack.c.l.s8.bf16 %v947_v49  ;;  %v943_v54 = vld [vmem:[%s6087_s17 + $0x780] sm:$0xff] }
 0x28c   : > { %4870 = vmatpush3.bf16.msra.mxu1 %v1559_v39  ;;  %4849 = vmatprep.subr.bf16.mxu0 %v1552_v23  ;;  %v1599_v39 = vunpack.c.l.s8.bf16 %v955_v50  ;;  %v537_v23 = vcombine.high %v6577_v51, %v6577_v51  ;;  %v1576_v31 = vunpack.c.h.s8.bf16 %v943_v54 }
 0x28d   : > { %4871 = vmatprep.subr.bf16.mxu1 %v1568_v30  ;;  %3031 = vmatprep.mubr.bf16.mxu0 %v662_v58  ;;  %v538_v30 = vcombine.high %v6580_v20, %v6580_v20  ;;  %v1575_v58 = vunpack.c.l.s8.bf16 %v943_v54  ;;  %v971_v54 = vld [vmem:[%s6087_s17 + $0x860] sm:$0xff] }
 0x28e   : > { %3071 = vmatprep.mubr.bf16.mxu1 %v664_v59 }
 0x28f   : > { %4850 = vmatpush3.bf16.msra.mxu0 %v1544_v43  ;;  %v1584_v43 = vunpack.c.h.s8.bf16 %v947_v49  ;;  %v668_v47 = vpack.c.bf16 %v538_v30, %v538_v30 }
 0x290   : > { %4872 = vmatpush3.bf16.msra.mxu1 %v1560_v7  ;;  %4851 = vmatprep.subr.bf16.mxu0 %v1553_v60  ;;  %v1600_v7 = vunpack.c.h.s8.bf16 %v955_v50  ;;  %v948_v60 = vld [vmem:[%s6087_s17 + $0x7a8] sm:$0xff]  ;;  %v1606_v50 = vunpack.c.h.s8.bf16 %v958_v15 }
 0x291   : > { %4873 = vmatprep.subr.bf16.mxu1 %v1569_v62  ;;  %v666_v62 = vpack.c.bf16 %v537_v23, %v537_v23 }
 0x293   : > { %4852 = vmatpush3.bf16.msra.mxu0 %v1545_v48  ;;  %v1585_v48 = vunpack.c.l.s8.bf16 %v948_v60 }
 0x294   : > { %4874 = vmatpush3.bf16.msra.mxu1 %v1561_v63  ;;  %4853 = vmatprep.subr.bf16.mxu0 %v1554_v0  ;;  %v944_v63 = vld [vmem:[%s6087_s17 + $0x788] sm:$0xff]  ;;  %v1601_v0 = vunpack.c.l.s8.bf16 %v956_v61 }
 0x295   : > { %4875 = vmatprep.subr.bf16.mxu1 %v1570_v1  ;;  %v952_v1 = vld [vmem:[%s6087_s17 + $0x7c8] sm:$0xff]  ;;  %v1577_v2 = vunpack.c.l.s8.bf16 %v944_v63 }
 0x296   : > { %v1593_v3 = vunpack.c.l.s8.bf16 %v952_v1  ;;  %v1594_v10 = vunpack.c.h.s8.bf16 %v952_v1 }
 0x297   : > { %4854 = vmatpush3.bf16.msra.mxu0 %v1546_v4  ;;  %v1586_v4 = vunpack.c.h.s8.bf16 %v948_v60  ;;  %v665_v60 = vpack.c.bf16 %v6577_v51, %v6577_v51 }
 0x298   : > { %4876 = vmatpush3.bf16.msra.mxu1 %v1562_v55  ;;  %4855 = vmatprep.subr.bf16.mxu0 %v1555_v56  ;;  %v1602_v55 = vunpack.c.h.s8.bf16 %v956_v61  ;;  %v949_v56 = vld [vmem:[%s6087_s17 + $0x7b0] sm:$0xff]  ;;  %v667_v61 = vpack.c.bf16 %v6580_v20, %v6580_v20 }
 0x299   : > { %4877 = vmatprep.subr.bf16.mxu1 %v1571_v6  ;;  %v1578_v6 = vunpack.c.h.s8.bf16 %v944_v63  ;;  %v972_v63 = vld [vmem:[%s6087_s17 + $0x868] sm:$0xff] }
 0x29b   : > { %4856 = vmatpush3.bf16.msra.mxu0 %v1547_v11  ;;  %v1587_v11 = vunpack.c.l.s8.bf16 %v949_v56 }
 0x29c   : > { %4878 = vmatpush3.bf16.msra.mxu1 %v1563_v14  ;;  %4857 = vmatprep.subr.bf16.mxu0 %v1556_v17  ;;  %v945_v14 = vld [vmem:[%s6087_s17 + $0x790] sm:$0xff]  ;;  %v1603_v17 = vunpack.c.l.s8.bf16 %v957_v5 }
 0x29d   : > { %4879 = vmatprep.subr.bf16.mxu1 %v1572_v18  ;;  %v4555_v34 = vpop.f32.mrb[28].mxu0  ;;  %v953_v18 = vld [vmem:[%s6087_s17 + $0x7d0] sm:$0xff]  ;;  %v1579_v19 = vunpack.c.l.s8.bf16 %v945_v14 }
 0x29e   : > { %v4577_v8 = vpop.f32.mrb[28].mxu1  ;;  %v4556_v36 = vpop.f32.mrb[29].mxu0  ;;  %v1595_v25 = vunpack.c.l.s8.bf16 %v953_v18  ;;  %v1596_v33 = vunpack.c.h.s8.bf16 %v953_v18 }
 0x29f   : > { %v4578_v37 = vpop.f32.mrb[29].mxu1  ;;  %v4557_v38 = vadd.f32 %v4556_v36, %v4555_v34  ;;  %v4558_v13 = vpop.f32.mrb[30].mxu0  ;;  %4858 = vmatpush3.bf16.msra.mxu0 %v1548_v26  ;;  %v1588_v26 = vunpack.c.h.s8.bf16 %v949_v56  ;;  %v1605_v36 = vunpack.c.l.s8.bf16 %v958_v15 }
 0x2a0   : > { %v4579_v24 = vadd.f32 %v4578_v37, %v4577_v8  ;;  %4880 = vmatpush3.bf16.msra.mxu1 %v1564_v27  ;;  %v4580_v21 = vpop.f32.mrb[30].mxu1  ;;  %v4559_v44 = vpop.f32.mrb[31].mxu0  ;;  %4859 = vmatprep.subr.bf16.mxu0 %v1557_v28  ;;  %v1604_v27 = vunpack.c.h.s8.bf16 %v957_v5  ;;  %v950_v28 = vld [vmem:[%s6087_s17 + $0x7b8] sm:$0xff] }
 0x2a1   : > { %4881 = vmatprep.subr.bf16.mxu1 %v1573_v16  ;;  %v4581_v9 = vpop.f32.mrb[31].mxu1  ;;  %v2474_v32 = vadd.f32 %v4557_v38, %v6549_v29  ;;  %v951_v29 = vld [vmem:[%s6087_s17 + $0x7c0] sm:$0xff]  ;;  %v1580_v16 = vunpack.c.h.s8.bf16 %v945_v14  ;;  %v1589_v34 = vunpack.c.l.s8.bf16 %v950_v28  ;;  %v946_v8 = vld [vmem:[%s6087_s17 + $0x798] sm:$0xff]  ;;  %v1590_v49 = vunpack.c.h.s8.bf16 %v950_v28  ;;  %v973_v14 = vld [vmem:[%s6087_s17 + $0x870] sm:$0xff] }
 0x2a2   : > { %v1591_v59 = vunpack.c.l.s8.bf16 %v951_v29  ;;  %v1592_v12 = vunpack.c.h.s8.bf16 %v951_v29  ;;  %v954_v37 = vld [vmem:[%s6087_s17 + $0x7d8] sm:$0xff]  ;;  %v1582_v30 = vunpack.c.h.s8.bf16 %v946_v8 }
 0x2a3   : > { %v6582_v35 = vadd.f32 %v4579_v24, %v2474_v32  ;;  %4860 = vmatpush3.bf16.msra.mxu0 %v1549_v41  ;;  %v6613_v29 = vld [vmem:[%s6080_s30 + $0x108] sm:$0xff] }
 0x2a4   : > { %4882 = vmatpush3.bf16.msra.mxu1 %v1565_v42  ;;  %4861 = vmatprep.subr.bf16.mxu0 %v1558_v45  ;;  %v1581_v45 = vunpack.c.l.s8.bf16 %v946_v8  ;;  %v974_v8 = vld [vmem:[%s6087_s17 + $0x878] sm:$0xff] }
 0x2a5   : > { %4883 = vmatprep.subr.bf16.mxu1 %v1574_v46  ;;  %v1597_v46 = vunpack.c.l.s8.bf16 %v954_v37 }
 0x2a7   : > { %4862 = vmatpush3.bf16.msra.mxu0 %v1550_v22 }
 0x2a8   : > { %4884 = vmatpush3.bf16.msra.mxu1 %v1566_v52  ;;  %4891 = vmatprep.subr.bf16.mxu0 %v1583_v53  ;;  %v963_v53 = vld [vmem:[%s6087_s17 + $0x820] sm:$0xff] }
 0x2a9   : > { %4913 = vmatprep.subr.bf16.mxu1 %v1599_v39  ;;  %v6610_v39 = vld [vmem:[%s6080_s30 + $0x100] sm:$0xff] }
 0x2aa   : > { %3032 = vmatmul.mubr.bf16.vlgmr.msra.gmra.mrb[56].mxu0 %v661_v40  ;;  %v1598_v40 = vunpack.c.h.s8.bf16 %v954_v37 }
 0x2ab   : > { %3072 = vmatmul.mubr.bf16.vlgmr.msra.gmra.mrb[56].mxu1 %v663_v57  ;;  %4892 = vmatpush3.bf16.msra.mxu0 %v1575_v58  ;;  %v1615_v57 = vunpack.c.l.s8.bf16 %v963_v53  ;;  %v959_v58 = vld [vmem:[%s6087_s17 + $0x800] sm:$0xff] }
 0x2ac   : > { %4914 = vmatpush3.bf16.msra.mxu1 %v1591_v59  ;;  %4893 = vmatprep.subr.bf16.mxu0 %v1584_v43  ;;  %v1631_v59 = vunpack.c.l.s8.bf16 %v971_v54  ;;  %v539_v43 = vcombine.high %v6610_v39, %v6610_v39  ;;  %v1608_v51 = vunpack.c.h.s8.bf16 %v959_v58 }
 0x2ad   : > { %4915 = vmatprep.subr.bf16.mxu1 %v1600_v7  ;;  %3111 = vmatprep.mubr.bf16.mxu0 %v666_v62  ;;  %v540_v7 = vcombine.high %v6613_v29, %v6613_v29  ;;  %v1607_v62 = vunpack.c.l.s8.bf16 %v959_v58  ;;  %v987_v58 = vld [vmem:[%s6087_s17 + $0x8e0] sm:$0xff] }
 0x2ae   : > { %3151 = vmatprep.mubr.bf16.mxu1 %v668_v47 }
 0x2af   : > { %4894 = vmatpush3.bf16.msra.mxu0 %v1576_v31  ;;  %v1616_v31 = vunpack.c.h.s8.bf16 %v963_v53  ;;  %v672_v1 = vpack.c.bf16 %v540_v7, %v540_v7 }
 0x2b0   : > { %4916 = vmatpush3.bf16.msra.mxu1 %v1592_v12  ;;  %4895 = vmatprep.subr.bf16.mxu0 %v1585_v48  ;;  %v1632_v12 = vunpack.c.h.s8.bf16 %v971_v54  ;;  %v964_v48 = vld [vmem:[%s6087_s17 + $0x828] sm:$0xff]  ;;  %v1638_v54 = vunpack.c.h.s8.bf16 %v974_v8 }
 0x2b1   : > { %4917 = vmatprep.subr.bf16.mxu1 %v1601_v0  ;;  %v670_v0 = vpack.c.bf16 %v539_v43, %v539_v43 }
 0x2b3   : > { %4896 = vmatpush3.bf16.msra.mxu0 %v1577_v2  ;;  %v1617_v2 = vunpack.c.l.s8.bf16 %v964_v48 }
 0x2b4   : > { %4918 = vmatpush3.bf16.msra.mxu1 %v1593_v3  ;;  %4897 = vmatprep.subr.bf16.mxu0 %v1586_v4  ;;  %v960_v3 = vld [vmem:[%s6087_s17 + $0x808] sm:$0xff]  ;;  %v1633_v4 = vunpack.c.l.s8.bf16 %v972_v63 }
 0x2b5   : > { %4919 = vmatprep.subr.bf16.mxu1 %v1602_v55  ;;  %v968_v55 = vld [vmem:[%s6087_s17 + $0x848] sm:$0xff]  ;;  %v1609_v56 = vunpack.c.l.s8.bf16 %v960_v3 }
 0x2b6   : > { %v1625_v5 = vunpack.c.l.s8.bf16 %v968_v55  ;;  %v1626_v18 = vunpack.c.h.s8.bf16 %v968_v55 }
 0x2b7   : > { %4898 = vmatpush3.bf16.msra.mxu0 %v1578_v6  ;;  %v1618_v6 = vunpack.c.h.s8.bf16 %v964_v48  ;;  %v669_v48 = vpack.c.bf16 %v6610_v39, %v6610_v39 }
 0x2b8   : > { %4920 = vmatpush3.bf16.msra.mxu1 %v1594_v10  ;;  %4899 = vmatprep.subr.bf16.mxu0 %v1587_v11  ;;  %v1634_v10 = vunpack.c.h.s8.bf16 %v972_v63  ;;  %v965_v11 = vld [vmem:[%s6087_s17 + $0x830] sm:$0xff]  ;;  %v671_v63 = vpack.c.bf16 %v6613_v29, %v6613_v29 }
 0x2b9   : > { %4921 = vmatprep.subr.bf16.mxu1 %v1603_v17  ;;  %v1610_v17 = vunpack.c.h.s8.bf16 %v960_v3  ;;  %v988_v3 = vld [vmem:[%s6087_s17 + $0x8e8] sm:$0xff] }
 0x2bb   : > { %4900 = vmatpush3.bf16.msra.mxu0 %v1579_v19  ;;  %v1619_v19 = vunpack.c.l.s8.bf16 %v965_v11 }
 0x2bc   : > { %4922 = vmatpush3.bf16.msra.mxu1 %v1595_v25  ;;  %4901 = vmatprep.subr.bf16.mxu0 %v1588_v26  ;;  %v961_v25 = vld [vmem:[%s6087_s17 + $0x810] sm:$0xff]  ;;  %v1635_v26 = vunpack.c.l.s8.bf16 %v973_v14 }
 0x2bd   : > { %4923 = vmatprep.subr.bf16.mxu1 %v1604_v27  ;;  %v4599_v38 = vpop.f32.mrb[32].mxu0  ;;  %v969_v27 = vld [vmem:[%s6087_s17 + $0x850] sm:$0xff]  ;;  %v1611_v28 = vunpack.c.l.s8.bf16 %v961_v25 }
 0x2be   : > { %v4621_v13 = vpop.f32.mrb[32].mxu1  ;;  %v4600_v24 = vpop.f32.mrb[33].mxu0  ;;  %v1627_v15 = vunpack.c.l.s8.bf16 %v969_v27  ;;  %v1628_v37 = vunpack.c.h.s8.bf16 %v969_v27 }
 0x2bf   : > { %v4622_v41 = vpop.f32.mrb[33].mxu1  ;;  %v4601_v42 = vadd.f32 %v4600_v24, %v4599_v38  ;;  %v4602_v21 = vpop.f32.mrb[34].mxu0  ;;  %4902 = vmatpush3.bf16.msra.mxu0 %v1580_v16  ;;  %v1620_v16 = vunpack.c.h.s8.bf16 %v965_v11  ;;  %v1637_v24 = vunpack.c.l.s8.bf16 %v974_v8 }
 0x2c0   : > { %v4623_v44 = vadd.f32 %v4622_v41, %v4621_v13  ;;  %4924 = vmatpush3.bf16.msra.mxu1 %v1596_v33  ;;  %v4624_v9 = vpop.f32.mrb[34].mxu1  ;;  %v4603_v32 = vpop.f32.mrb[35].mxu0  ;;  %4903 = vmatprep.subr.bf16.mxu0 %v1589_v34  ;;  %v1636_v33 = vunpack.c.h.s8.bf16 %v973_v14  ;;  %v966_v34 = vld [vmem:[%s6087_s17 + $0x838] sm:$0xff] }
 0x2c1   : > { %4925 = vmatprep.subr.bf16.mxu1 %v1605_v36  ;;  %v4625_v22 = vpop.f32.mrb[35].mxu1  ;;  %v2554_v52 = vadd.f32 %v4601_v42, %v6582_v35  ;;  %v967_v35 = vld [vmem:[%s6087_s17 + $0x840] sm:$0xff]  ;;  %v1612_v36 = vunpack.c.h.s8.bf16 %v961_v25  ;;  %v1621_v38 = vunpack.c.l.s8.bf16 %v966_v34  ;;  %v962_v13 = vld [vmem:[%s6087_s17 + $0x818] sm:$0xff]  ;;  %v1622_v53 = vunpack.c.h.s8.bf16 %v966_v34  ;;  %v989_v25 = vld [vmem:[%s6087_s17 + $0x8f0] sm:$0xff] }
 0x2c2   : > { %v1623_v47 = vunpack.c.l.s8.bf16 %v967_v35  ;;  %v1624_v20 = vunpack.c.h.s8.bf16 %v967_v35  ;;  %v970_v41 = vld [vmem:[%s6087_s17 + $0x858] sm:$0xff]  ;;  %v6646_v35 = vld [vmem:[%s6080_s30 + $0x118] sm:$0xff]  ;;  %v1614_v7 = vunpack.c.h.s8.bf16 %v962_v13 }
 0x2c3   : > { %v6615_v23 = vadd.f32 %v4623_v44, %v2554_v52  ;;  %4904 = vmatpush3.bf16.msra.mxu0 %v1581_v45 }
 0x2c4   : > { %4926 = vmatpush3.bf16.msra.mxu1 %v1597_v46  ;;  %4905 = vmatprep.subr.bf16.mxu0 %v1590_v49  ;;  %v1613_v49 = vunpack.c.l.s8.bf16 %v962_v13  ;;  %v990_v13 = vld [vmem:[%s6087_s17 + $0x8f8] sm:$0xff] }
 0x2c5   : > { %4927 = vmatprep.subr.bf16.mxu1 %v1606_v50  ;;  %v1629_v50 = vunpack.c.l.s8.bf16 %v970_v41 }
 0x2c7   : > { %4906 = vmatpush3.bf16.msra.mxu0 %v1582_v30 }
 0x2c8   : > { %4928 = vmatpush3.bf16.msra.mxu1 %v1598_v40  ;;  %4935 = vmatprep.subr.bf16.mxu0 %v1615_v57  ;;  %v979_v57 = vld [vmem:[%s6087_s17 + $0x8a0] sm:$0xff] }
 0x2c9   : > { %4957 = vmatprep.subr.bf16.mxu1 %v1631_v59  ;;  %v6643_v59 = vld [vmem:[%s6080_s30 + $0x110] sm:$0xff] }
 0x2ca   : > { %3112 = vmatmul.mubr.bf16.vlgmr.msra.gmra.mrb[60].mxu0 %v665_v60  ;;  %v1630_v60 = vunpack.c.h.s8.bf16 %v970_v41 }
 0x2cb   : > { %3152 = vmatmul.mubr.bf16.vlgmr.msra.gmra.mrb[60].mxu1 %v667_v61  ;;  %4936 = vmatpush3.bf16.msra.mxu0 %v1607_v62  ;;  %v1647_v61 = vunpack.c.l.s8.bf16 %v979_v57  ;;  %v975_v62 = vld [vmem:[%s6087_s17 + $0x880] sm:$0xff] }
 0x2cc   : > { %4958 = vmatpush3.bf16.msra.mxu1 %v1623_v47  ;;  %4937 = vmatprep.subr.bf16.mxu0 %v1616_v31  ;;  %v1663_v47 = vunpack.c.l.s8.bf16 %v987_v58  ;;  %v541_v31 = vcombine.high %v6643_v59, %v6643_v59  ;;  %v1640_v39 = vunpack.c.h.s8.bf16 %v975_v62 }
 0x2cd   : > { %4959 = vmatprep.subr.bf16.mxu1 %v1632_v12  ;;  %3191 = vmatprep.mubr.bf16.mxu0 %v670_v0  ;;  %v542_v12 = vcombine.high %v6646_v35, %v6646_v35  ;;  %v1639_v0 = vunpack.c.l.s8.bf16 %v975_v62  ;;  %v1003_v62 = vld [vmem:[%s6087_s17 + $0x960] sm:$0xff] }
 0x2ce   : > { %3231 = vmatprep.mubr.bf16.mxu1 %v672_v1 }
 0x2cf   : > { %4938 = vmatpush3.bf16.msra.mxu0 %v1608_v51  ;;  %v1648_v51 = vunpack.c.h.s8.bf16 %v979_v57  ;;  %v676_v55 = vpack.c.bf16 %v542_v12, %v542_v12 }
 0x2d0   : > { %4960 = vmatpush3.bf16.msra.mxu1 %v1624_v20  ;;  %4939 = vmatprep.subr.bf16.mxu0 %v1617_v2  ;;  %v1664_v20 = vunpack.c.h.s8.bf16 %v987_v58  ;;  %v980_v2 = vld [vmem:[%s6087_s17 + $0x8a8] sm:$0xff]  ;;  %v1670_v58 = vunpack.c.h.s8.bf16 %v990_v13 }
 0x2d1   : > { %4961 = vmatprep.subr.bf16.mxu1 %v1633_v4  ;;  %v674_v4 = vpack.c.bf16 %v541_v31, %v541_v31 }
 0x2d3   : > { %4940 = vmatpush3.bf16.msra.mxu0 %v1609_v56  ;;  %v1649_v56 = vunpack.c.l.s8.bf16 %v980_v2 }
 0x2d4   : > { %4962 = vmatpush3.bf16.msra.mxu1 %v1625_v5  ;;  %4941 = vmatprep.subr.bf16.mxu0 %v1618_v6  ;;  %v976_v5 = vld [vmem:[%s6087_s17 + $0x888] sm:$0xff]  ;;  %v1665_v6 = vunpack.c.l.s8.bf16 %v988_v3 }
 0x2d5   : > { %4963 = vmatprep.subr.bf16.mxu1 %v1634_v10  ;;  %v984_v10 = vld [vmem:[%s6087_s17 + $0x8c8] sm:$0xff]  ;;  %v1641_v11 = vunpack.c.l.s8.bf16 %v976_v5 }
 0x2d6   : > { %v1657_v14 = vunpack.c.l.s8.bf16 %v984_v10  ;;  %v1658_v27 = vunpack.c.h.s8.bf16 %v984_v10 }
 0x2d7   : > { %4942 = vmatpush3.bf16.msra.mxu0 %v1610_v17  ;;  %v1650_v17 = vunpack.c.h.s8.bf16 %v980_v2  ;;  %v673_v2 = vpack.c.bf16 %v6643_v59, %v6643_v59 }
 0x2d8   : > { %4964 = vmatpush3.bf16.msra.mxu1 %v1626_v18  ;;  %4943 = vmatprep.subr.bf16.mxu0 %v1619_v19  ;;  %v1666_v18 = vunpack.c.h.s8.bf16 %v988_v3  ;;  %v981_v19 = vld [vmem:[%s6087_s17 + $0x8b0] sm:$0xff]  ;;  %v675_v3 = vpack.c.bf16 %v6646_v35, %v6646_v35 }
 0x2d9   : > { %4965 = vmatprep.subr.bf16.mxu1 %v1635_v26  ;;  %v1642_v26 = vunpack.c.h.s8.bf16 %v976_v5  ;;  %v1004_v5 = vld [vmem:[%s6087_s17 + $0x968] sm:$0xff] }
 0x2db   : > { %4944 = vmatpush3.bf16.msra.mxu0 %v1611_v28  ;;  %v1651_v28 = vunpack.c.l.s8.bf16 %v981_v19 }
 0x2dc   : > { %4966 = vmatpush3.bf16.msra.mxu1 %v1627_v15  ;;  %4945 = vmatprep.subr.bf16.mxu0 %v1620_v16  ;;  %v977_v15 = vld [vmem:[%s6087_s17 + $0x890] sm:$0xff]  ;;  %v1667_v16 = vunpack.c.l.s8.bf16 %v989_v25 }
 0x2dd   : > { %4967 = vmatprep.subr.bf16.mxu1 %v1636_v33  ;;  %v4643_v42 = vpop.f32.mrb[36].mxu0  ;;  %v985_v33 = vld [vmem:[%s6087_s17 + $0x8d0] sm:$0xff]  ;;  %v1643_v34 = vunpack.c.l.s8.bf16 %v977_v15 }
 0x2de   : > { %v4665_v21 = vpop.f32.mrb[36].mxu1  ;;  %v4644_v44 = vpop.f32.mrb[37].mxu0  ;;  %v1659_v8 = vunpack.c.l.s8.bf16 %v985_v33  ;;  %v1660_v41 = vunpack.c.h.s8.bf16 %v985_v33 }
 0x2df   : > { %v4666_v45 = vpop.f32.mrb[37].mxu1  ;;  %v4645_v46 = vadd.f32 %v4644_v44, %v4643_v42  ;;  %v4646_v9 = vpop.f32.mrb[38].mxu0  ;;  %4946 = vmatpush3.bf16.msra.mxu0 %v1612_v36  ;;  %v1652_v36 = vunpack.c.h.s8.bf16 %v981_v19  ;;  %v1669_v44 = vunpack.c.l.s8.bf16 %v990_v13 }
 0x2e0   : > { %v4667_v32 = vadd.f32 %v4666_v45, %v4665_v21  ;;  %4968 = vmatpush3.bf16.msra.mxu1 %v1628_v37  ;;  %v4668_v22 = vpop.f32.mrb[38].mxu1  ;;  %v4647_v52 = vpop.f32.mrb[39].mxu0  ;;  %4947 = vmatprep.subr.bf16.mxu0 %v1621_v38  ;;  %v1668_v37 = vunpack.c.h.s8.bf16 %v989_v25  ;;  %v982_v38 = vld [vmem:[%s6087_s17 + $0x8b8] sm:$0xff] }
 0x2e1   : > { %4969 = vmatprep.subr.bf16.mxu1 %v1637_v24  ;;  %v4669_v30 = vpop.f32.mrb[39].mxu1  ;;  %v2634_v40 = vadd.f32 %v4645_v46, %v6615_v23  ;;  %v983_v23 = vld [vmem:[%s6087_s17 + $0x8c0] sm:$0xff]  ;;  %v1644_v24 = vunpack.c.h.s8.bf16 %v977_v15  ;;  %v1653_v42 = vunpack.c.l.s8.bf16 %v982_v38  ;;  %v978_v21 = vld [vmem:[%s6087_s17 + $0x898] sm:$0xff]  ;;  %v1654_v57 = vunpack.c.h.s8.bf16 %v982_v38  ;;  %v1005_v15 = vld [vmem:[%s6087_s17 + $0x970] sm:$0xff] }
 0x2e2   : > { %v1655_v1 = vunpack.c.l.s8.bf16 %v983_v23  ;;  %v1656_v29 = vunpack.c.h.s8.bf16 %v983_v23  ;;  %v986_v45 = vld [vmem:[%s6087_s17 + $0x8d8] sm:$0xff]  ;;  %v1646_v12 = vunpack.c.h.s8.bf16 %v978_v21 }
 0x2e3   : > { %v6648_v43 = vadd.f32 %v4667_v32, %v2634_v40  ;;  %4948 = vmatpush3.bf16.msra.mxu0 %v1613_v49  ;;  %v6679_v23 = vld [vmem:[%s6080_s30 + $0x128] sm:$0xff] }
 0x2e4   : > { %4970 = vmatpush3.bf16.msra.mxu1 %v1629_v50  ;;  %4949 = vmatprep.subr.bf16.mxu0 %v1622_v53  ;;  %v1645_v53 = vunpack.c.l.s8.bf16 %v978_v21  ;;  %v1006_v21 = vld [vmem:[%s6087_s17 + $0x978] sm:$0xff] }
 0x2e5   : > { %4971 = vmatprep.subr.bf16.mxu1 %v1638_v54  ;;  %v1661_v54 = vunpack.c.l.s8.bf16 %v986_v45 }
 0x2e7   : > { %4950 = vmatpush3.bf16.msra.mxu0 %v1614_v7 }
 0x2e8   : > { %4972 = vmatpush3.bf16.msra.mxu1 %v1630_v60  ;;  %4979 = vmatprep.subr.bf16.mxu0 %v1647_v61  ;;  %v995_v61 = vld [vmem:[%s6087_s17 + $0x920] sm:$0xff] }
 0x2e9   : > { %5001 = vmatprep.subr.bf16.mxu1 %v1663_v47  ;;  %v6676_v47 = vld [vmem:[%s6080_s30 + $0x120] sm:$0xff] }
 0x2ea   : > { %3192 = vmatmul.mubr.bf16.vlgmr.msra.gmra.mrb[64].mxu0 %v669_v48  ;;  %v1662_v48 = vunpack.c.h.s8.bf16 %v986_v45 }
 0x2eb   : > { %3232 = vmatmul.mubr.bf16.vlgmr.msra.gmra.mrb[64].mxu1 %v671_v63  ;;  %4980 = vmatpush3.bf16.msra.mxu0 %v1639_v0  ;;  %v1679_v63 = vunpack.c.l.s8.bf16 %v995_v61  ;;  %v991_v0 = vld [vmem:[%s6087_s17 + $0x900] sm:$0xff] }
 0x2ec   : > { %5002 = vmatpush3.bf16.msra.mxu1 %v1655_v1  ;;  %4981 = vmatprep.subr.bf16.mxu0 %v1648_v51  ;;  %v1695_v1 = vunpack.c.l.s8.bf16 %v1003_v62  ;;  %v543_v51 = vcombine.high %v6676_v47, %v6676_v47  ;;  %v1672_v59 = vunpack.c.h.s8.bf16 %v991_v0 }
 0x2ed   : > { %5003 = vmatprep.subr.bf16.mxu1 %v1664_v20  ;;  %3271 = vmatprep.mubr.bf16.mxu0 %v674_v4  ;;  %v544_v20 = vcombine.high %v6679_v23, %v6679_v23  ;;  %v1671_v4 = vunpack.c.l.s8.bf16 %v991_v0  ;;  %v1019_v0 = vld [vmem:[%s6087_s17 + $0x9e0] sm:$0xff] }
 0x2ee   : > { %3311 = vmatprep.mubr.bf16.mxu1 %v676_v55 }
 0x2ef   : > { %4982 = vmatpush3.bf16.msra.mxu0 %v1640_v39  ;;  %v1680_v39 = vunpack.c.h.s8.bf16 %v995_v61  ;;  %v680_v10 = vpack.c.bf16 %v544_v20, %v544_v20 }
 0x2f0   : > { %5004 = vmatpush3.bf16.msra.mxu1 %v1656_v29  ;;  %4983 = vmatprep.subr.bf16.mxu0 %v1649_v56  ;;  %v1696_v29 = vunpack.c.h.s8.bf16 %v1003_v62  ;;  %v996_v56 = vld [vmem:[%s6087_s17 + $0x928] sm:$0xff]  ;;  %v1702_v62 = vunpack.c.h.s8.bf16 %v1006_v21 }
 0x2f1   : > { %5005 = vmatprep.subr.bf16.mxu1 %v1665_v6  ;;  %v678_v6 = vpack.c.bf16 %v543_v51, %v543_v51 }
 0x2f3   : > { %4984 = vmatpush3.bf16.msra.mxu0 %v1641_v11  ;;  %v1681_v11 = vunpack.c.l.s8.bf16 %v996_v56 }
 0x2f4   : > { %5006 = vmatpush3.bf16.msra.mxu1 %v1657_v14  ;;  %4985 = vmatprep.subr.bf16.mxu0 %v1650_v17  ;;  %v992_v14 = vld [vmem:[%s6087_s17 + $0x908] sm:$0xff]  ;;  %v1697_v17 = vunpack.c.l.s8.bf16 %v1004_v5 }
 0x2f5   : > { %5007 = vmatprep.subr.bf16.mxu1 %v1666_v18  ;;  %v1000_v18 = vld [vmem:[%s6087_s17 + $0x948] sm:$0xff]  ;;  %v1673_v19 = vunpack.c.l.s8.bf16 %v992_v14 }
 0x2f6   : > { %v1689_v25 = vunpack.c.l.s8.bf16 %v1000_v18  ;;  %v1690_v33 = vunpack.c.h.s8.bf16 %v1000_v18 }
 0x2f7   : > { %4986 = vmatpush3.bf16.msra.mxu0 %v1642_v26  ;;  %v1682_v26 = vunpack.c.h.s8.bf16 %v996_v56  ;;  %v677_v56 = vpack.c.bf16 %v6676_v47, %v6676_v47 }
 0x2f8   : > { %5008 = vmatpush3.bf16.msra.mxu1 %v1658_v27  ;;  %4987 = vmatprep.subr.bf16.mxu0 %v1651_v28  ;;  %v1698_v27 = vunpack.c.h.s8.bf16 %v1004_v5  ;;  %v997_v28 = vld [vmem:[%s6087_s17 + $0x930] sm:$0xff]  ;;  %v679_v5 = vpack.c.bf16 %v6679_v23, %v6679_v23 }
 0x2f9   : > { %5009 = vmatprep.subr.bf16.mxu1 %v1667_v16  ;;  %v1674_v16 = vunpack.c.h.s8.bf16 %v992_v14  ;;  %v1020_v14 = vld [vmem:[%s6087_s17 + $0x9e8] sm:$0xff] }
 0x2fb   : > { %4988 = vmatpush3.bf16.msra.mxu0 %v1643_v34  ;;  %v1683_v34 = vunpack.c.l.s8.bf16 %v997_v28 }
 0x2fc   : > { %5010 = vmatpush3.bf16.msra.mxu1 %v1659_v8  ;;  %4989 = vmatprep.subr.bf16.mxu0 %v1652_v36  ;;  %v993_v8 = vld [vmem:[%s6087_s17 + $0x910] sm:$0xff]  ;;  %v1699_v36 = vunpack.c.l.s8.bf16 %v1005_v15 }
 0x2fd   : > { %5011 = vmatprep.subr.bf16.mxu1 %v1668_v37  ;;  %v4687_v46 = vpop.f32.mrb[40].mxu0  ;;  %v1001_v37 = vld [vmem:[%s6087_s17 + $0x950] sm:$0xff]  ;;  %v1675_v38 = vunpack.c.l.s8.bf16 %v993_v8 }
 0x2fe   : > { %v4709_v9 = vpop.f32.mrb[40].mxu1  ;;  %v4688_v32 = vpop.f32.mrb[41].mxu0  ;;  %v1691_v13 = vunpack.c.l.s8.bf16 %v1001_v37  ;;  %v1692_v45 = vunpack.c.h.s8.bf16 %v1001_v37 }
 0x2ff   : > { %v4710_v49 = vpop.f32.mrb[41].mxu1  ;;  %v4689_v50 = vadd.f32 %v4688_v32, %v4687_v46  ;;  %v4690_v22 = vpop.f32.mrb[42].mxu0  ;;  %4990 = vmatpush3.bf16.msra.mxu0 %v1644_v24  ;;  %v1684_v24 = vunpack.c.h.s8.bf16 %v997_v28  ;;  %v1701_v32 = vunpack.c.l.s8.bf16 %v1006_v21 }
 0x300   : > { %v4711_v52 = vadd.f32 %v4710_v49, %v4709_v9  ;;  %5012 = vmatpush3.bf16.msra.mxu1 %v1660_v41  ;;  %v4712_v30 = vpop.f32.mrb[42].mxu1  ;;  %v4691_v40 = vpop.f32.mrb[43].mxu0  ;;  %4991 = vmatprep.subr.bf16.mxu0 %v1653_v42  ;;  %v1700_v41 = vunpack.c.h.s8.bf16 %v1005_v15  ;;  %v998_v42 = vld [vmem:[%s6087_s17 + $0x938] sm:$0xff] }
 0x301   : > { %5013 = vmatprep.subr.bf16.mxu1 %v1669_v44  ;;  %v4713_v7 = vpop.f32.mrb[43].mxu1  ;;  %v2714_v60 = vadd.f32 %v4689_v50, %v6648_v43  ;;  %v999_v43 = vld [vmem:[%s6087_s17 + $0x940] sm:$0xff]  ;;  %v1676_v44 = vunpack.c.h.s8.bf16 %v993_v8  ;;  %v1685_v46 = vunpack.c.l.s8.bf16 %v998_v42  ;;  %v994_v9 = vld [vmem:[%s6087_s17 + $0x918] sm:$0xff]  ;;  %v1686_v61 = vunpack.c.h.s8.bf16 %v998_v42  ;;  %v1021_v8 = vld [vmem:[%s6087_s17 + $0x9f0] sm:$0xff] }
 0x302   : > { %v1687_v55 = vunpack.c.l.s8.bf16 %v999_v43  ;;  %v1688_v35 = vunpack.c.h.s8.bf16 %v999_v43  ;;  %v1002_v49 = vld [vmem:[%s6087_s17 + $0x958] sm:$0xff]  ;;  %v6712_v43 = vld [vmem:[%s6080_s30 + $0x138] sm:$0xff]  ;;  %v1678_v20 = vunpack.c.h.s8.bf16 %v994_v9 }
 0x303   : > { %v6681_v31 = vadd.f32 %v4711_v52, %v2714_v60  ;;  %4992 = vmatpush3.bf16.msra.mxu0 %v1645_v53 }
 0x304   : > { %5014 = vmatpush3.bf16.msra.mxu1 %v1661_v54  ;;  %4993 = vmatprep.subr.bf16.mxu0 %v1654_v57  ;;  %v1677_v57 = vunpack.c.l.s8.bf16 %v994_v9  ;;  %v1022_v9 = vld [vmem:[%s6087_s17 + $0x9f8] sm:$0xff] }
 0x305   : > { %5015 = vmatprep.subr.bf16.mxu1 %v1670_v58  ;;  %v1693_v58 = vunpack.c.l.s8.bf16 %v1002_v49 }
 0x307   : > { %4994 = vmatpush3.bf16.msra.mxu0 %v1646_v12 }
 0x308   : > { %5016 = vmatpush3.bf16.msra.mxu1 %v1662_v48  ;;  %5023 = vmatprep.subr.bf16.mxu0 %v1679_v63  ;;  %v1011_v63 = vld [vmem:[%s6087_s17 + $0x9a0] sm:$0xff] }
 0x309   : > { %5045 = vmatprep.subr.bf16.mxu1 %v1695_v1  ;;  %v6709_v1 = vld [vmem:[%s6080_s30 + $0x130] sm:$0xff] }
 0x30a   : > { %3272 = vmatmul.mubr.bf16.vlgmr.msra.gmra.mrb[68].mxu0 %v673_v2  ;;  %v1694_v2 = vunpack.c.h.s8.bf16 %v1002_v49 }
 0x30b   : > { %3312 = vmatmul.mubr.bf16.vlgmr.msra.gmra.mrb[68].mxu1 %v675_v3  ;;  %5024 = vmatpush3.bf16.msra.mxu0 %v1671_v4  ;;  %v1711_v3 = vunpack.c.l.s8.bf16 %v1011_v63  ;;  %v1007_v4 = vld [vmem:[%s6087_s17 + $0x980] sm:$0xff] }
 0x30c   : > { %5046 = vmatpush3.bf16.msra.mxu1 %v1687_v55  ;;  %5025 = vmatprep.subr.bf16.mxu0 %v1680_v39  ;;  %v1727_v55 = vunpack.c.l.s8.bf16 %v1019_v0  ;;  %v545_v39 = vcombine.high %v6709_v1, %v6709_v1  ;;  %v1704_v47 = vunpack.c.h.s8.bf16 %v1007_v4 }
 0x30d   : > { %5047 = vmatprep.subr.bf16.mxu1 %v1696_v29  ;;  %3351 = vmatprep.mubr.bf16.mxu0 %v678_v6  ;;  %v546_v29 = vcombine.high %v6712_v43, %v6712_v43  ;;  %v1703_v6 = vunpack.c.l.s8.bf16 %v1007_v4  ;;  %v1035_v4 = vld [vmem:[%s6087_s17 + $0xa60] sm:$0xff] }
 0x30e   : > { %3391 = vmatprep.mubr.bf16.mxu1 %v680_v10 }
 0x30f   : > { %5026 = vmatpush3.bf16.msra.mxu0 %v1672_v59  ;;  %v1712_v59 = vunpack.c.h.s8.bf16 %v1011_v63  ;;  %v684_v18 = vpack.c.bf16 %v546_v29, %v546_v29 }
 0x310   : > { %5048 = vmatpush3.bf16.msra.mxu1 %v1688_v35  ;;  %5027 = vmatprep.subr.bf16.mxu0 %v1681_v11  ;;  %v1728_v35 = vunpack.c.h.s8.bf16 %v1019_v0  ;;  %v1012_v11 = vld [vmem:[%s6087_s17 + $0x9a8] sm:$0xff]  ;;  %v1734_v0 = vunpack.c.h.s8.bf16 %v1022_v9 }
 0x311   : > { %5049 = vmatprep.subr.bf16.mxu1 %v1697_v17  ;;  %v682_v17 = vpack.c.bf16 %v545_v39, %v545_v39 }
 0x313   : > { %5028 = vmatpush3.bf16.msra.mxu0 %v1673_v19  ;;  %v1713_v19 = vunpack.c.l.s8.bf16 %v1012_v11 }
 0x314   : > { %5050 = vmatpush3.bf16.msra.mxu1 %v1689_v25  ;;  %5029 = vmatprep.subr.bf16.mxu0 %v1682_v26  ;;  %v1008_v25 = vld [vmem:[%s6087_s17 + $0x988] sm:$0xff]  ;;  %v1729_v26 = vunpack.c.l.s8.bf16 %v1020_v14 }
 0x315   : > { %5051 = vmatprep.subr.bf16.mxu1 %v1698_v27  ;;  %v1016_v27 = vld [vmem:[%s6087_s17 + $0x9c8] sm:$0xff]  ;;  %v1705_v28 = vunpack.c.l.s8.bf16 %v1008_v25 }
 0x316   : > { %v1721_v15 = vunpack.c.l.s8.bf16 %v1016_v27  ;;  %v1722_v37 = vunpack.c.h.s8.bf16 %v1016_v27 }
 0x317   : > { %5030 = vmatpush3.bf16.msra.mxu0 %v1674_v16  ;;  %v1714_v16 = vunpack.c.h.s8.bf16 %v1012_v11  ;;  %v681_v11 = vpack.c.bf16 %v6709_v1, %v6709_v1 }
 0x318   : > { %5052 = vmatpush3.bf16.msra.mxu1 %v1690_v33  ;;  %5031 = vmatprep.subr.bf16.mxu0 %v1683_v34  ;;  %v1730_v33 = vunpack.c.h.s8.bf16 %v1020_v14  ;;  %v1013_v34 = vld [vmem:[%s6087_s17 + $0x9b0] sm:$0xff]  ;;  %v683_v14 = vpack.c.bf16 %v6712_v43, %v6712_v43 }
 0x319   : > { %5053 = vmatprep.subr.bf16.mxu1 %v1699_v36  ;;  %v1706_v36 = vunpack.c.h.s8.bf16 %v1008_v25  ;;  %v1036_v25 = vld [vmem:[%s6087_s17 + $0xa68] sm:$0xff] }
 0x31b   : > { %5032 = vmatpush3.bf16.msra.mxu0 %v1675_v38  ;;  %v1715_v38 = vunpack.c.l.s8.bf16 %v1013_v34 }
 0x31c   : > { %5054 = vmatpush3.bf16.msra.mxu1 %v1691_v13  ;;  %5033 = vmatprep.subr.bf16.mxu0 %v1684_v24  ;;  %v1009_v13 = vld [vmem:[%s6087_s17 + $0x990] sm:$0xff]  ;;  %v1731_v24 = vunpack.c.l.s8.bf16 %v1021_v8 }
 0x31d   : > { %5055 = vmatprep.subr.bf16.mxu1 %v1700_v41  ;;  %v4731_v50 = vpop.f32.mrb[44].mxu0  ;;  %v1017_v41 = vld [vmem:[%s6087_s17 + $0x9d0] sm:$0xff]  ;;  %v1707_v42 = vunpack.c.l.s8.bf16 %v1009_v13 }
 0x31e   : > { %v4753_v22 = vpop.f32.mrb[44].mxu1  ;;  %v4732_v52 = vpop.f32.mrb[45].mxu0  ;;  %v1723_v21 = vunpack.c.l.s8.bf16 %v1017_v41  ;;  %v1724_v49 = vunpack.c.h.s8.bf16 %v1017_v41 }
 0x31f   : > { %v4754_v53 = vpop.f32.mrb[45].mxu1  ;;  %v4733_v54 = vadd.f32 %v4732_v52, %v4731_v50  ;;  %v4734_v30 = vpop.f32.mrb[46].mxu0  ;;  %5034 = vmatpush3.bf16.msra.mxu0 %v1676_v44  ;;  %v1716_v44 = vunpack.c.h.s8.bf16 %v1013_v34  ;;  %v1733_v52 = vunpack.c.l.s8.bf16 %v1022_v9 }
 0x320   : > { %v4755_v40 = vadd.f32 %v4754_v53, %v4753_v22  ;;  %5056 = vmatpush3.bf16.msra.mxu1 %v1692_v45  ;;  %v4756_v7 = vpop.f32.mrb[46].mxu1  ;;  %v4735_v60 = vpop.f32.mrb[47].mxu0  ;;  %5035 = vmatprep.subr.bf16.mxu0 %v1685_v46  ;;  %v1732_v45 = vunpack.c.h.s8.bf16 %v1021_v8  ;;  %v1014_v46 = vld [vmem:[%s6087_s17 + $0x9b8] sm:$0xff] }
 0x321   : > { %5057 = vmatprep.subr.bf16.mxu1 %v1701_v32  ;;  %v4757_v12 = vpop.f32.mrb[47].mxu1  ;;  %v2794_v48 = vadd.f32 %v4733_v54, %v6681_v31  ;;  %v1015_v31 = vld [vmem:[%s6087_s17 + $0x9c0] sm:$0xff]  ;;  %v1708_v32 = vunpack.c.h.s8.bf16 %v1009_v13  ;;  %v1717_v50 = vunpack.c.l.s8.bf16 %v1014_v46  ;;  %v1010_v22 = vld [vmem:[%s6087_s17 + $0x998] sm:$0xff]  ;;  %v1718_v63 = vunpack.c.h.s8.bf16 %v1014_v46  ;;  %v1037_v13 = vld [vmem:[%s6087_s17 + $0xa70] sm:$0xff] }
 0x322   : > { %v1719_v10 = vunpack.c.l.s8.bf16 %v1015_v31  ;;  %v1720_v23 = vunpack.c.h.s8.bf16 %v1015_v31  ;;  %v1018_v53 = vld [vmem:[%s6087_s17 + $0x9d8] sm:$0xff]  ;;  %v1710_v29 = vunpack.c.h.s8.bf16 %v1010_v22 }
 0x323   : > { %v6714_v51 = vadd.f32 %v4755_v40, %v2794_v48  ;;  %5036 = vmatpush3.bf16.msra.mxu0 %v1677_v57  ;;  %v6745_v31 = vld [vmem:[%s6080_s30 + $0x148] sm:$0xff] }
 0x324   : > { %5058 = vmatpush3.bf16.msra.mxu1 %v1693_v58  ;;  %5037 = vmatprep.subr.bf16.mxu0 %v1686_v61  ;;  %v1709_v61 = vunpack.c.l.s8.bf16 %v1010_v22  ;;  %v1038_v22 = vld [vmem:[%s6087_s17 + $0xa78] sm:$0xff] }
 0x325   : > { %5059 = vmatprep.subr.bf16.mxu1 %v1702_v62  ;;  %v1725_v62 = vunpack.c.l.s8.bf16 %v1018_v53 }
 0x327   : > { %5038 = vmatpush3.bf16.msra.mxu0 %v1678_v20 }
 0x328   : > { %5060 = vmatpush3.bf16.msra.mxu1 %v1694_v2  ;;  %5067 = vmatprep.subr.bf16.mxu0 %v1711_v3  ;;  %v1027_v3 = vld [vmem:[%s6087_s17 + $0xa20] sm:$0xff] }
 0x329   : > { %5089 = vmatprep.subr.bf16.mxu1 %v1727_v55  ;;  %v6742_v55 = vld [vmem:[%s6080_s30 + $0x140] sm:$0xff] }
 0x32a   : > { %3352 = vmatmul.mubr.bf16.vlgmr.msra.gmra.mrb[72].mxu0 %v677_v56  ;;  %v1726_v56 = vunpack.c.h.s8.bf16 %v1018_v53 }
 0x32b   : > { %3392 = vmatmul.mubr.bf16.vlgmr.msra.gmra.mrb[72].mxu1 %v679_v5  ;;  %5068 = vmatpush3.bf16.msra.mxu0 %v1703_v6  ;;  %v1743_v5 = vunpack.c.l.s8.bf16 %v1027_v3  ;;  %v1023_v6 = vld [vmem:[%s6087_s17 + $0xa00] sm:$0xff] }
 0x32c   : > { %5090 = vmatpush3.bf16.msra.mxu1 %v1719_v10  ;;  %5069 = vmatprep.subr.bf16.mxu0 %v1712_v59  ;;  %v1759_v10 = vunpack.c.l.s8.bf16 %v1035_v4  ;;  %v547_v59 = vcombine.high %v6742_v55, %v6742_v55  ;;  %v1736_v1 = vunpack.c.h.s8.bf16 %v1023_v6 }
 0x32d   : > { %5091 = vmatprep.subr.bf16.mxu1 %v1728_v35  ;;  %3431 = vmatprep.mubr.bf16.mxu0 %v682_v17  ;;  %v548_v35 = vcombine.high %v6745_v31, %v6745_v31  ;;  %v1735_v17 = vunpack.c.l.s8.bf16 %v1023_v6  ;;  %v1051_v6 = vld [vmem:[%s6087_s17 + $0xae0] sm:$0xff] }
 0x32e   : > { %3471 = vmatprep.mubr.bf16.mxu1 %v684_v18 }
 0x32f   : > { %5070 = vmatpush3.bf16.msra.mxu0 %v1704_v47  ;;  %v1744_v47 = vunpack.c.h.s8.bf16 %v1027_v3  ;;  %v688_v27 = vpack.c.bf16 %v548_v35, %v548_v35 }
 0x330   : > { %5092 = vmatpush3.bf16.msra.mxu1 %v1720_v23  ;;  %5071 = vmatprep.subr.bf16.mxu0 %v1713_v19  ;;  %v1760_v23 = vunpack.c.h.s8.bf16 %v1035_v4  ;;  %v1028_v19 = vld [vmem:[%s6087_s17 + $0xa28] sm:$0xff]  ;;  %v1766_v4 = vunpack.c.h.s8.bf16 %v1038_v22 }
 0x331   : > { %5093 = vmatprep.subr.bf16.mxu1 %v1729_v26  ;;  %v686_v26 = vpack.c.bf16 %v547_v59, %v547_v59 }
 0x333   : > { %5072 = vmatpush3.bf16.msra.mxu0 %v1705_v28  ;;  %v1745_v28 = vunpack.c.l.s8.bf16 %v1028_v19 }
 0x334   : > { %5094 = vmatpush3.bf16.msra.mxu1 %v1721_v15  ;;  %5073 = vmatprep.subr.bf16.mxu0 %v1714_v16  ;;  %v1024_v15 = vld [vmem:[%s6087_s17 + $0xa08] sm:$0xff]  ;;  %v1761_v16 = vunpack.c.l.s8.bf16 %v1036_v25 }
 0x335   : > { %5095 = vmatprep.subr.bf16.mxu1 %v1730_v33  ;;  %v1032_v33 = vld [vmem:[%s6087_s17 + $0xa48] sm:$0xff]  ;;  %v1737_v34 = vunpack.c.l.s8.bf16 %v1024_v15 }
 0x336   : > { %v1753_v8 = vunpack.c.l.s8.bf16 %v1032_v33  ;;  %v1754_v41 = vunpack.c.h.s8.bf16 %v1032_v33 }
 0x337   : > { %5074 = vmatpush3.bf16.msra.mxu0 %v1706_v36  ;;  %v1746_v36 = vunpack.c.h.s8.bf16 %v1028_v19  ;;  %v685_v19 = vpack.c.bf16 %v6742_v55, %v6742_v55 }
 0x338   : > { %5096 = vmatpush3.bf16.msra.mxu1 %v1722_v37  ;;  %5075 = vmatprep.subr.bf16.mxu0 %v1715_v38  ;;  %v1762_v37 = vunpack.c.h.s8.bf16 %v1036_v25  ;;  %v1029_v38 = vld [vmem:[%s6087_s17 + $0xa30] sm:$0xff]  ;;  %v687_v25 = vpack.c.bf16 %v6745_v31, %v6745_v31 }
 0x339   : > { %5097 = vmatprep.subr.bf16.mxu1 %v1731_v24  ;;  %v1738_v24 = vunpack.c.h.s8.bf16 %v1024_v15  ;;  %v1052_v15 = vld [vmem:[%s6087_s17 + $0xae8] sm:$0xff] }
 0x33b   : > { %5076 = vmatpush3.bf16.msra.mxu0 %v1707_v42  ;;  %v1747_v42 = vunpack.c.l.s8.bf16 %v1029_v38 }
 0x33c   : > { %5098 = vmatpush3.bf16.msra.mxu1 %v1723_v21  ;;  %5077 = vmatprep.subr.bf16.mxu0 %v1716_v44  ;;  %v1025_v21 = vld [vmem:[%s6087_s17 + $0xa10] sm:$0xff]  ;;  %v1763_v44 = vunpack.c.l.s8.bf16 %v1037_v13 }
 0x33d   : > { %5099 = vmatprep.subr.bf16.mxu1 %v1732_v45  ;;  %v4775_v54 = vpop.f32.mrb[48].mxu0  ;;  %v1033_v45 = vld [vmem:[%s6087_s17 + $0xa50] sm:$0xff]  ;;  %v1739_v46 = vunpack.c.l.s8.bf16 %v1025_v21 }
 0x33e   : > { %v4797_v30 = vpop.f32.mrb[48].mxu1  ;;  %v4776_v40 = vpop.f32.mrb[49].mxu0  ;;  %v1755_v9 = vunpack.c.l.s8.bf16 %v1033_v45  ;;  %v1756_v53 = vunpack.c.h.s8.bf16 %v1033_v45 }
 0x33f   : > { %v4798_v57 = vpop.f32.mrb[49].mxu1  ;;  %v4777_v58 = vadd.f32 %v4776_v40, %v4775_v54  ;;  %v4778_v7 = vpop.f32.mrb[50].mxu0  ;;  %5078 = vmatpush3.bf16.msra.mxu0 %v1708_v32  ;;  %v1748_v32 = vunpack.c.h.s8.bf16 %v1029_v38  ;;  %v1765_v40 = vunpack.c.l.s8.bf16 %v1038_v22 }
 0x340   : > { %v4799_v60 = vadd.f32 %v4798_v57, %v4797_v30  ;;  %5100 = vmatpush3.bf16.msra.mxu1 %v1724_v49  ;;  %v4800_v12 = vpop.f32.mrb[50].mxu1  ;;  %v4779_v48 = vpop.f32.mrb[51].mxu0  ;;  %5079 = vmatprep.subr.bf16.mxu0 %v1717_v50  ;;  %v1764_v49 = vunpack.c.h.s8.bf16 %v1037_v13  ;;  %v1030_v50 = vld [vmem:[%s6087_s17 + $0xa38] sm:$0xff] }
 0x341   : > { %5101 = vmatprep.subr.bf16.mxu1 %v1733_v52  ;;  %v4801_v20 = vpop.f32.mrb[51].mxu1  ;;  %v2874_v2 = vadd.f32 %v4777_v58, %v6714_v51  ;;  %v1031_v51 = vld [vmem:[%s6087_s17 + $0xa40] sm:$0xff]  ;;  %v1740_v52 = vunpack.c.h.s8.bf16 %v1025_v21  ;;  %v1749_v54 = vunpack.c.l.s8.bf16 %v1030_v50  ;;  %v1026_v30 = vld [vmem:[%s6087_s17 + $0xa18] sm:$0xff]  ;;  %v1750_v3 = vunpack.c.h.s8.bf16 %v1030_v50  ;;  %v1053_v21 = vld [vmem:[%s6087_s17 + $0xaf0] sm:$0xff] }
 0x342   : > { %v1751_v18 = vunpack.c.l.s8.bf16 %v1031_v51  ;;  %v1752_v43 = vunpack.c.h.s8.bf16 %v1031_v51  ;;  %v1034_v57 = vld [vmem:[%s6087_s17 + $0xa58] sm:$0xff]  ;;  %v6778_v51 = vld [vmem:[%s6080_s30 + $0x158] sm:$0xff]  ;;  %v1742_v35 = vunpack.c.h.s8.bf16 %v1026_v30 }
 0x343   : > { %v6747_v39 = vadd.f32 %v4799_v60, %v2874_v2  ;;  %5080 = vmatpush3.bf16.msra.mxu0 %v1709_v61 }
 0x344   : > { %5102 = vmatpush3.bf16.msra.mxu1 %v1725_v62  ;;  %5081 = vmatprep.subr.bf16.mxu0 %v1718_v63  ;;  %v1741_v63 = vunpack.c.l.s8.bf16 %v1026_v30  ;;  %v1054_v30 = vld [vmem:[%s6087_s17 + $0xaf8] sm:$0xff] }
 0x345   : > { %5103 = vmatprep.subr.bf16.mxu1 %v1734_v0  ;;  %v1757_v0 = vunpack.c.l.s8.bf16 %v1034_v57 }
 0x347   : > { %5082 = vmatpush3.bf16.msra.mxu0 %v1710_v29 }
 0x348   : > { %5104 = vmatpush3.bf16.msra.mxu1 %v1726_v56  ;;  %5111 = vmatprep.subr.bf16.mxu0 %v1743_v5  ;;  %v1043_v5 = vld [vmem:[%s6087_s17 + $0xaa0] sm:$0xff] }
 0x349   : > { %5133 = vmatprep.subr.bf16.mxu1 %v1759_v10  ;;  %v6775_v10 = vld [vmem:[%s6080_s30 + $0x150] sm:$0xff] }
 0x34a   : > { %3432 = vmatmul.mubr.bf16.vlgmr.msra.gmra.mrb[76].mxu0 %v681_v11  ;;  %v1758_v11 = vunpack.c.h.s8.bf16 %v1034_v57 }
 0x34b   : > { %3472 = vmatmul.mubr.bf16.vlgmr.msra.gmra.mrb[76].mxu1 %v683_v14  ;;  %5112 = vmatpush3.bf16.msra.mxu0 %v1735_v17  ;;  %v1775_v14 = vunpack.c.l.s8.bf16 %v1043_v5  ;;  %v1039_v17 = vld [vmem:[%s6087_s17 + $0xa80] sm:$0xff] }
 0x34c   : > { %5134 = vmatpush3.bf16.msra.mxu1 %v1751_v18  ;;  %5113 = vmatprep.subr.bf16.mxu0 %v1744_v47  ;;  %v1791_v18 = vunpack.c.l.s8.bf16 %v1051_v6  ;;  %v549_v47 = vcombine.high %v6775_v10, %v6775_v10  ;;  %v1768_v55 = vunpack.c.h.s8.bf16 %v1039_v17 }
 0x34d   : > { %5135 = vmatprep.subr.bf16.mxu1 %v1760_v23  ;;  %3511 = vmatprep.mubr.bf16.mxu0 %v686_v26  ;;  %v550_v23 = vcombine.high %v6778_v51, %v6778_v51  ;;  %v1767_v26 = vunpack.c.l.s8.bf16 %v1039_v17  ;;  %v1067_v17 = vld [vmem:[%s6087_s17 + $0xb60] sm:$0xff] }
 0x34e   : > { %3551 = vmatprep.mubr.bf16.mxu1 %v688_v27 }
 0x34f   : > { %5114 = vmatpush3.bf16.msra.mxu0 %v1736_v1  ;;  %v1776_v1 = vunpack.c.h.s8.bf16 %v1043_v5  ;;  %v692_v33 = vpack.c.bf16 %v550_v23, %v550_v23 }
 0x350   : > { %5136 = vmatpush3.bf16.msra.mxu1 %v1752_v43  ;;  %5115 = vmatprep.subr.bf16.mxu0 %v1745_v28  ;;  %v1792_v43 = vunpack.c.h.s8.bf16 %v1051_v6  ;;  %v1044_v28 = vld [vmem:[%s6087_s17 + $0xaa8] sm:$0xff]  ;;  %v1798_v6 = vunpack.c.h.s8.bf16 %v1054_v30 }
 0x351   : > { %5137 = vmatprep.subr.bf16.mxu1 %v1761_v16  ;;  %v690_v16 = vpack.c.bf16 %v549_v47, %v549_v47 }
 0x353   : > { %5116 = vmatpush3.bf16.msra.mxu0 %v1737_v34  ;;  %v1777_v34 = vunpack.c.l.s8.bf16 %v1044_v28 }
 0x354   : > { %5138 = vmatpush3.bf16.msra.mxu1 %v1753_v8  ;;  %5117 = vmatprep.subr.bf16.mxu0 %v1746_v36  ;;  %v1040_v8 = vld [vmem:[%s6087_s17 + $0xa88] sm:$0xff]  ;;  %v1793_v36 = vunpack.c.l.s8.bf16 %v1052_v15 }
 0x355   : > { %5139 = vmatprep.subr.bf16.mxu1 %v1762_v37  ;;  %v1048_v37 = vld [vmem:[%s6087_s17 + $0xac8] sm:$0xff]  ;;  %v1769_v38 = vunpack.c.l.s8.bf16 %v1040_v8 }
 0x356   : > { %v1785_v13 = vunpack.c.l.s8.bf16 %v1048_v37  ;;  %v1786_v45 = vunpack.c.h.s8.bf16 %v1048_v37 }
 0x357   : > { %5118 = vmatpush3.bf16.msra.mxu0 %v1738_v24  ;;  %v1778_v24 = vunpack.c.h.s8.bf16 %v1044_v28  ;;  %v689_v28 = vpack.c.bf16 %v6775_v10, %v6775_v10 }
 0x358   : > { %5140 = vmatpush3.bf16.msra.mxu1 %v1754_v41  ;;  %5119 = vmatprep.subr.bf16.mxu0 %v1747_v42  ;;  %v1794_v41 = vunpack.c.h.s8.bf16 %v1052_v15  ;;  %v1045_v42 = vld [vmem:[%s6087_s17 + $0xab0] sm:$0xff]  ;;  %v691_v15 = vpack.c.bf16 %v6778_v51, %v6778_v51 }
 0x359   : > { %5141 = vmatprep.subr.bf16.mxu1 %v1763_v44  ;;  %v1770_v44 = vunpack.c.h.s8.bf16 %v1040_v8  ;;  %v1068_v8 = vld [vmem:[%s6087_s17 + $0xb68] sm:$0xff] }
 0x35b   : > { %5120 = vmatpush3.bf16.msra.mxu0 %v1739_v46  ;;  %v1779_v46 = vunpack.c.l.s8.bf16 %v1045_v42 }
 0x35c   : > { %5142 = vmatpush3.bf16.msra.mxu1 %v1755_v9  ;;  %5121 = vmatprep.subr.bf16.mxu0 %v1748_v32  ;;  %v1041_v9 = vld [vmem:[%s6087_s17 + $0xa90] sm:$0xff]  ;;  %v1795_v32 = vunpack.c.l.s8.bf16 %v1053_v21 }
 0x35d   : > { %5143 = vmatprep.subr.bf16.mxu1 %v1764_v49  ;;  %v4819_v58 = vpop.f32.mrb[52].mxu0  ;;  %v1049_v49 = vld [vmem:[%s6087_s17 + $0xad0] sm:$0xff]  ;;  %v1771_v50 = vunpack.c.l.s8.bf16 %v1041_v9 }
 0x35e   : > { %v4841_v7 = vpop.f32.mrb[52].mxu1  ;;  %v4820_v60 = vpop.f32.mrb[53].mxu0  ;;  %v1787_v22 = vunpack.c.l.s8.bf16 %v1049_v49  ;;  %v1788_v57 = vunpack.c.h.s8.bf16 %v1049_v49 }
 0x35f   : > { %v4842_v61 = vpop.f32.mrb[53].mxu1  ;;  %v4821_v62 = vadd.f32 %v4820_v60, %v4819_v58  ;;  %v4822_v12 = vpop.f32.mrb[54].mxu0  ;;  %5122 = vmatpush3.bf16.msra.mxu0 %v1740_v52  ;;  %v1780_v52 = vunpack.c.h.s8.bf16 %v1045_v42  ;;  %v1797_v60 = vunpack.c.l.s8.bf16 %v1054_v30 }
 0x360   : > { %v4843_v48 = vadd.f32 %v4842_v61, %v4841_v7  ;;  %5144 = vmatpush3.bf16.msra.mxu1 %v1756_v53  ;;  %v4844_v20 = vpop.f32.mrb[54].mxu1  ;;  %v4823_v2 = vpop.f32.mrb[55].mxu0  ;;  %5123 = vmatprep.subr.bf16.mxu0 %v1749_v54  ;;  %v1796_v53 = vunpack.c.h.s8.bf16 %v1053_v21  ;;  %v1046_v54 = vld [vmem:[%s6087_s17 + $0xab8] sm:$0xff] }
 0x361   : > { %5145 = vmatprep.subr.bf16.mxu1 %v1765_v40  ;;  %v4845_v29 = vpop.f32.mrb[55].mxu1  ;;  %v2954_v56 = vadd.f32 %v4821_v62, %v6747_v39  ;;  %v1047_v39 = vld [vmem:[%s6087_s17 + $0xac0] sm:$0xff]  ;;  %v1772_v40 = vunpack.c.h.s8.bf16 %v1041_v9  ;;  %v1781_v58 = vunpack.c.l.s8.bf16 %v1046_v54  ;;  %v1042_v7 = vld [vmem:[%s6087_s17 + $0xa98] sm:$0xff]  ;;  %v1782_v5 = vunpack.c.h.s8.bf16 %v1046_v54  ;;  %v1069_v9 = vld [vmem:[%s6087_s17 + $0xb70] sm:$0xff] }
 0x362   : > { %v1783_v27 = vunpack.c.l.s8.bf16 %v1047_v39  ;;  %v1784_v31 = vunpack.c.h.s8.bf16 %v1047_v39  ;;  %v1050_v61 = vld [vmem:[%s6087_s17 + $0xad8] sm:$0xff]  ;;  %v1774_v23 = vunpack.c.h.s8.bf16 %v1042_v7 }
 0x363   : > { %v6780_v59 = vadd.f32 %v4843_v48, %v2954_v56  ;;  %5124 = vmatpush3.bf16.msra.mxu0 %v1741_v63  ;;  %v6811_v39 = vld [vmem:[%s6080_s30 + $0x168] sm:$0xff] }
 0x364   : > { %5146 = vmatpush3.bf16.msra.mxu1 %v1757_v0  ;;  %5125 = vmatprep.subr.bf16.mxu0 %v1750_v3  ;;  %v1773_v3 = vunpack.c.l.s8.bf16 %v1042_v7  ;;  %v1070_v7 = vld [vmem:[%s6087_s17 + $0xb78] sm:$0xff] }
 0x365   : > { %5147 = vmatprep.subr.bf16.mxu1 %v1766_v4  ;;  %v1789_v4 = vunpack.c.l.s8.bf16 %v1050_v61 }
 0x367   : > { %5126 = vmatpush3.bf16.msra.mxu0 %v1742_v35 }
 0x368   : > { %5148 = vmatpush3.bf16.msra.mxu1 %v1758_v11  ;;  %5155 = vmatprep.subr.bf16.mxu0 %v1775_v14  ;;  %v1059_v14 = vld [vmem:[%s6087_s17 + $0xb20] sm:$0xff] }
 0x369   : > { %5177 = vmatprep.subr.bf16.mxu1 %v1791_v18  ;;  %v6808_v18 = vld [vmem:[%s6080_s30 + $0x160] sm:$0xff] }
 0x36a   : > { %3512 = vmatmul.mubr.bf16.vlgmr.msra.gmra.mrb[80].mxu0 %v685_v19  ;;  %v1790_v19 = vunpack.c.h.s8.bf16 %v1050_v61 }
 0x36b   : > { %3552 = vmatmul.mubr.bf16.vlgmr.msra.gmra.mrb[80].mxu1 %v687_v25  ;;  %5156 = vmatpush3.bf16.msra.mxu0 %v1767_v26  ;;  %v1807_v25 = vunpack.c.l.s8.bf16 %v1059_v14  ;;  %v1055_v26 = vld [vmem:[%s6087_s17 + $0xb00] sm:$0xff] }
 0x36c   : > { %5178 = vmatpush3.bf16.msra.mxu1 %v1783_v27  ;;  %5157 = vmatprep.subr.bf16.mxu0 %v1776_v1  ;;  %v1823_v27 = vunpack.c.l.s8.bf16 %v1067_v17  ;;  %v551_v1 = vcombine.high %v6808_v18, %v6808_v18  ;;  %v1800_v10 = vunpack.c.h.s8.bf16 %v1055_v26 }
 0x36d   : > { %5179 = vmatprep.subr.bf16.mxu1 %v1792_v43  ;;  %3591 = vmatprep.mubr.bf16.mxu0 %v690_v16  ;;  %v552_v43 = vcombine.high %v6811_v39, %v6811_v39  ;;  %v1799_v16 = vunpack.c.l.s8.bf16 %v1055_v26  ;;  %v1083_v26 = vld [vmem:[%s6087_s17 + $0xbe0] sm:$0xff] }
 0x36e   : > { %3631 = vmatprep.mubr.bf16.mxu1 %v692_v33 }
 0x36f   : > { %5158 = vmatpush3.bf16.msra.mxu0 %v1768_v55  ;;  %v1808_v55 = vunpack.c.h.s8.bf16 %v1059_v14  ;;  %v696_v37 = vpack.c.bf16 %v552_v43, %v552_v43 }
 0x370   : > { %5180 = vmatpush3.bf16.msra.mxu1 %v1784_v31  ;;  %5159 = vmatprep.subr.bf16.mxu0 %v1777_v34  ;;  %v1824_v31 = vunpack.c.h.s8.bf16 %v1067_v17  ;;  %v1060_v34 = vld [vmem:[%s6087_s17 + $0xb28] sm:$0xff]  ;;  %v1830_v17 = vunpack.c.h.s8.bf16 %v1070_v7 }
 0x371   : > { %5181 = vmatprep.subr.bf16.mxu1 %v1793_v36  ;;  %v694_v36 = vpack.c.bf16 %v551_v1, %v551_v1 }
 0x373   : > { %5160 = vmatpush3.bf16.msra.mxu0 %v1769_v38  ;;  %v1809_v38 = vunpack.c.l.s8.bf16 %v1060_v34 }
 0x374   : > { %5182 = vmatpush3.bf16.msra.mxu1 %v1785_v13  ;;  %5161 = vmatprep.subr.bf16.mxu0 %v1778_v24  ;;  %v1056_v13 = vld [vmem:[%s6087_s17 + $0xb08] sm:$0xff]  ;;  %v1825_v24 = vunpack.c.l.s8.bf16 %v1068_v8 }
 0x375   : > { %5183 = vmatprep.subr.bf16.mxu1 %v1794_v41  ;;  %v1064_v41 = vld [vmem:[%s6087_s17 + $0xb48] sm:$0xff]  ;;  %v1801_v42 = vunpack.c.l.s8.bf16 %v1056_v13 }
 0x376   : > { %v1817_v21 = vunpack.c.l.s8.bf16 %v1064_v41  ;;  %v1818_v49 = vunpack.c.h.s8.bf16 %v1064_v41 }
 0x377   : > { %5162 = vmatpush3.bf16.msra.mxu0 %v1770_v44  ;;  %v1810_v44 = vunpack.c.h.s8.bf16 %v1060_v34  ;;  %v693_v34 = vpack.c.bf16 %v6808_v18, %v6808_v18 }
 0x378   : > { %5184 = vmatpush3.bf16.msra.mxu1 %v1786_v45  ;;  %5163 = vmatprep.subr.bf16.mxu0 %v1779_v46  ;;  %v1826_v45 = vunpack.c.h.s8.bf16 %v1068_v8  ;;  %v1061_v46 = vld [vmem:[%s6087_s17 + $0xb30] sm:$0xff]  ;;  %v695_v8 = vpack.c.bf16 %v6811_v39, %v6811_v39 }
 0x379   : > { %5185 = vmatprep.subr.bf16.mxu1 %v1795_v32  ;;  %v1802_v32 = vunpack.c.h.s8.bf16 %v1056_v13  ;;  %v1084_v13 = vld [vmem:[%s6087_s17 + $0xbe8] sm:$0xff] }
 0x37b   : > { %5164 = vmatpush3.bf16.msra.mxu0 %v1771_v50  ;;  %v1811_v50 = vunpack.c.l.s8.bf16 %v1061_v46 }
 0x37c   : > { %5186 = vmatpush3.bf16.msra.mxu1 %v1787_v22  ;;  %5165 = vmatprep.subr.bf16.mxu0 %v1780_v52  ;;  %v1057_v22 = vld [vmem:[%s6087_s17 + $0xb10] sm:$0xff]  ;;  %v1827_v52 = vunpack.c.l.s8.bf16 %v1069_v9 }
 0x37d   : > { %5187 = vmatprep.subr.bf16.mxu1 %v1796_v53  ;;  %v4863_v62 = vpop.f32.mrb[56].mxu0  ;;  %v1065_v53 = vld [vmem:[%s6087_s17 + $0xb50] sm:$0xff]  ;;  %v1803_v54 = vunpack.c.l.s8.bf16 %v1057_v22 }
 0x37e   : > { %v4885_v12 = vpop.f32.mrb[56].mxu1  ;;  %v4864_v48 = vpop.f32.mrb[57].mxu0  ;;  %v1819_v30 = vunpack.c.l.s8.bf16 %v1065_v53  ;;  %v1820_v61 = vunpack.c.h.s8.bf16 %v1065_v53 }
 0x37f   : > { %v4886_v63 = vpop.f32.mrb[57].mxu1  ;;  %v4865_v0 = vadd.f32 %v4864_v48, %v4863_v62  ;;  %v4866_v20 = vpop.f32.mrb[58].mxu0  ;;  %5166 = vmatpush3.bf16.msra.mxu0 %v1772_v40  ;;  %v1812_v40 = vunpack.c.h.s8.bf16 %v1061_v46  ;;  %v1829_v48 = vunpack.c.l.s8.bf16 %v1070_v7 }
 0x380   : > { %v4887_v2 = vadd.f32 %v4886_v63, %v4885_v12  ;;  %5188 = vmatpush3.bf16.msra.mxu1 %v1788_v57  ;;  %v4888_v29 = vpop.f32.mrb[58].mxu1  ;;  %v4867_v56 = vpop.f32.mrb[59].mxu0  ;;  %5167 = vmatprep.subr.bf16.mxu0 %v1781_v58  ;;  %v1828_v57 = vunpack.c.h.s8.bf16 %v1069_v9  ;;  %v1062_v58 = vld [vmem:[%s6087_s17 + $0xb38] sm:$0xff] }
 0x381   : > { %5189 = vmatprep.subr.bf16.mxu1 %v1797_v60  ;;  %v4889_v35 = vpop.f32.mrb[59].mxu1  ;;  %v3034_v11 = vadd.f32 %v4865_v0, %v6780_v59  ;;  %v1063_v59 = vld [vmem:[%s6087_s17 + $0xb40] sm:$0xff]  ;;  %v1804_v60 = vunpack.c.h.s8.bf16 %v1057_v22  ;;  %v1813_v62 = vunpack.c.l.s8.bf16 %v1062_v58  ;;  %v1058_v12 = vld [vmem:[%s6087_s17 + $0xb18] sm:$0xff]  ;;  %v1814_v14 = vunpack.c.h.s8.bf16 %v1062_v58  ;;  %v1085_v22 = vld [vmem:[%s6087_s17 + $0xbf0] sm:$0xff] }
 0x382   : > { %v1815_v33 = vunpack.c.l.s8.bf16 %v1063_v59  ;;  %v1816_v51 = vunpack.c.h.s8.bf16 %v1063_v59  ;;  %v1066_v63 = vld [vmem:[%s6087_s17 + $0xb58] sm:$0xff]  ;;  %v6844_v59 = vld [vmem:[%s6080_s30 + $0x178] sm:$0xff]  ;;  %v1806_v43 = vunpack.c.h.s8.bf16 %v1058_v12 }
 0x383   : > { %v6813_v47 = vadd.f32 %v4887_v2, %v3034_v11  ;;  %5168 = vmatpush3.bf16.msra.mxu0 %v1773_v3 }
 0x384   : > { %5190 = vmatpush3.bf16.msra.mxu1 %v1789_v4  ;;  %5169 = vmatprep.subr.bf16.mxu0 %v1782_v5  ;;  %v1805_v5 = vunpack.c.l.s8.bf16 %v1058_v12  ;;  %v1086_v12 = vld [vmem:[%s6087_s17 + $0xbf8] sm:$0xff] }
 0x385   : > { %5191 = vmatprep.subr.bf16.mxu1 %v1798_v6  ;;  %v1821_v6 = vunpack.c.l.s8.bf16 %v1066_v63 }
 0x387   : > { %5170 = vmatpush3.bf16.msra.mxu0 %v1774_v23 }
 0x388   : > { %5192 = vmatpush3.bf16.msra.mxu1 %v1790_v19  ;;  %5199 = vmatprep.subr.bf16.mxu0 %v1807_v25  ;;  %v1075_v25 = vld [vmem:[%s6087_s17 + $0xba0] sm:$0xff] }
 0x389   : > { %5221 = vmatprep.subr.bf16.mxu1 %v1823_v27  ;;  %v6841_v27 = vld [vmem:[%s6080_s30 + $0x170] sm:$0xff] }
 0x38a   : > { %3592 = vmatmul.mubr.bf16.vlgmr.msra.gmra.mrb[84].mxu0 %v689_v28  ;;  %v1822_v28 = vunpack.c.h.s8.bf16 %v1066_v63 }
 0x38b   : > { %3632 = vmatmul.mubr.bf16.vlgmr.msra.gmra.mrb[84].mxu1 %v691_v15  ;;  %5200 = vmatpush3.bf16.msra.mxu0 %v1799_v16  ;;  %v1839_v15 = vunpack.c.l.s8.bf16 %v1075_v25  ;;  %v1071_v16 = vld [vmem:[%s6087_s17 + $0xb80] sm:$0xff] }
 0x38c   : > { %5222 = vmatpush3.bf16.msra.mxu1 %v1815_v33  ;;  %5201 = vmatprep.subr.bf16.mxu0 %v1808_v55  ;;  %v1855_v33 = vunpack.c.l.s8.bf16 %v1083_v26  ;;  %v553_v55 = vcombine.high %v6841_v27, %v6841_v27  ;;  %v1832_v18 = vunpack.c.h.s8.bf16 %v1071_v16 }
 0x38d   : > { %5223 = vmatprep.subr.bf16.mxu1 %v1824_v31  ;;  %3671 = vmatprep.mubr.bf16.mxu0 %v694_v36  ;;  %v554_v31 = vcombine.high %v6844_v59, %v6844_v59  ;;  %v1831_v36 = vunpack.c.l.s8.bf16 %v1071_v16  ;;  %v1091_v16 = vld [vmem:[%s6087_s17 + $0xc20] sm:$0xff] }
 0x38e   : > { %3711 = vmatprep.mubr.bf16.mxu1 %v696_v37 }
 0x38f   : > { %5202 = vmatpush3.bf16.msra.mxu0 %v1800_v10  ;;  %v1840_v10 = vunpack.c.h.s8.bf16 %v1075_v25  ;;  %v700_v41 = vpack.c.bf16 %v554_v31, %v554_v31 }
 0x390   : > { %5224 = vmatpush3.bf16.msra.mxu1 %v1816_v51  ;;  %5203 = vmatprep.subr.bf16.mxu0 %v1809_v38  ;;  %v1856_v51 = vunpack.c.h.s8.bf16 %v1083_v26  ;;  %v1076_v38 = vld [vmem:[%s6087_s17 + $0xba8] sm:$0xff]  ;;  %v1862_v26 = vunpack.c.h.s8.bf16 %v1086_v12 }
 0x391   : > { %5225 = vmatprep.subr.bf16.mxu1 %v1825_v24  ;;  %v698_v24 = vpack.c.bf16 %v553_v55, %v553_v55 }
 0x393   : > { %5204 = vmatpush3.bf16.msra.mxu0 %v1801_v42  ;;  %v1841_v42 = vunpack.c.l.s8.bf16 %v1076_v38 }
 0x394   : > { %5226 = vmatpush3.bf16.msra.mxu1 %v1817_v21  ;;  %5205 = vmatprep.subr.bf16.mxu0 %v1810_v44  ;;  %v1072_v21 = vld [vmem:[%s6087_s17 + $0xb88] sm:$0xff]  ;;  %v1857_v44 = vunpack.c.l.s8.bf16 %v1084_v13 }
 0x395   : > { %5227 = vmatprep.subr.bf16.mxu1 %v1826_v45  ;;  %v1080_v45 = vld [vmem:[%s6087_s17 + $0xbc8] sm:$0xff]  ;;  %v1833_v46 = vunpack.c.l.s8.bf16 %v1072_v21 }
 0x396   : > { %v1849_v9 = vunpack.c.l.s8.bf16 %v1080_v45  ;;  %v1850_v53 = vunpack.c.h.s8.bf16 %v1080_v45 }
 0x397   : > { %5206 = vmatpush3.bf16.msra.mxu0 %v1802_v32  ;;  %v1842_v32 = vunpack.c.h.s8.bf16 %v1076_v38  ;;  %v1092_v38 = vld [vmem:[%s6087_s17 + $0xc28] sm:$0xff] }
 0x398   : > { %5228 = vmatpush3.bf16.msra.mxu1 %v1818_v49  ;;  %5207 = vmatprep.subr.bf16.mxu0 %v1811_v50  ;;  %v1858_v49 = vunpack.c.h.s8.bf16 %v1084_v13  ;;  %v1077_v50 = vld [vmem:[%s6087_s17 + $0xbb0] sm:$0xff] }
 0x399   : > { %5229 = vmatprep.subr.bf16.mxu1 %v1827_v52  ;;  %v1834_v52 = vunpack.c.h.s8.bf16 %v1072_v21  ;;  %v1089_v21 = vld [vmem:[%s6087_s17 + $0xc10] sm:$0xff] }
 0x39b   : > { %5208 = vmatpush3.bf16.msra.mxu0 %v1803_v54  ;;  %v1843_v54 = vunpack.c.l.s8.bf16 %v1077_v50 }
 0x39c   : > { %5230 = vmatpush3.bf16.msra.mxu1 %v1819_v30  ;;  %5209 = vmatprep.subr.bf16.mxu0 %v1812_v40  ;;  %v1073_v30 = vld [vmem:[%s6087_s17 + $0xb90] sm:$0xff]  ;;  %v1859_v40 = vunpack.c.l.s8.bf16 %v1085_v22 }
 0x39d   : > { %5231 = vmatprep.subr.bf16.mxu1 %v1828_v57  ;;  %v4907_v0 = vpop.f32.mrb[60].mxu0  ;;  %v1081_v57 = vld [vmem:[%s6087_s17 + $0xbd0] sm:$0xff]  ;;  %v1835_v58 = vunpack.c.l.s8.bf16 %v1073_v30 }
 0x39e   : > { %v4929_v20 = vpop.f32.mrb[60].mxu1  ;;  %v4908_v2 = vpop.f32.mrb[61].mxu0  ;;  %v1851_v7 = vunpack.c.l.s8.bf16 %v1081_v57  ;;  %v1852_v63 = vunpack.c.h.s8.bf16 %v1081_v57 }
 0x39f   : > { %v4930_v3 = vpop.f32.mrb[61].mxu1  ;;  %v4909_v4 = vadd.f32 %v4908_v2, %v4907_v0  ;;  %v4910_v29 = vpop.f32.mrb[62].mxu0  ;;  %5210 = vmatpush3.bf16.msra.mxu0 %v1804_v60  ;;  %v1844_v60 = vunpack.c.h.s8.bf16 %v1077_v50  ;;  %v1861_v2 = vunpack.c.l.s8.bf16 %v1086_v12 }
 0x3a0   : > { %v4931_v56 = vadd.f32 %v4930_v3, %v4929_v20  ;;  %5232 = vmatpush3.bf16.msra.mxu1 %v1820_v61  ;;  %v4932_v35 = vpop.f32.mrb[62].mxu1  ;;  %v4911_v11 = vpop.f32.mrb[63].mxu0  ;;  %5211 = vmatprep.subr.bf16.mxu0 %v1813_v62  ;;  %v1860_v61 = vunpack.c.h.s8.bf16 %v1085_v22  ;;  %v1078_v62 = vld [vmem:[%s6087_s17 + $0xbb8] sm:$0xff] }
 0x3a1   : > { %5233 = vmatprep.subr.bf16.mxu1 %v1829_v48  ;;  %v4933_v23 = vpop.f32.mrb[63].mxu1  ;;  %v3114_v19 = vadd.f32 %v4909_v4, %v6813_v47  ;;  %v1079_v47 = vld [vmem:[%s6087_s17 + $0xbc0] sm:$0xff]  ;;  %v1836_v48 = vunpack.c.h.s8.bf16 %v1073_v30  ;;  %v1845_v0 = vunpack.c.l.s8.bf16 %v1078_v62  ;;  %v1074_v20 = vld [vmem:[%s6087_s17 + $0xb98] sm:$0xff]  ;;  %v1846_v25 = vunpack.c.h.s8.bf16 %v1078_v62 }
 0x3a2   : > { %v1847_v37 = vunpack.c.l.s8.bf16 %v1079_v47  ;;  %v1848_v39 = vunpack.c.h.s8.bf16 %v1079_v47  ;;  %v1082_v3 = vld [vmem:[%s6087_s17 + $0xbd8] sm:$0xff]  ;;  %v1838_v47 = vunpack.c.h.s8.bf16 %v1074_v20 }
 0x3a3   : > { %v6846_v1 = vadd.f32 %v4931_v56, %v3114_v19  ;;  %5212 = vmatpush3.bf16.msra.mxu0 %v1805_v5  ;;  %v1854_v55 = vunpack.c.h.s8.bf16 %v1082_v3 }
 0x3a4   : > { %5234 = vmatpush3.bf16.msra.mxu1 %v1821_v6  ;;  %5213 = vmatprep.subr.bf16.mxu0 %v1814_v14  ;;  %v1837_v14 = vunpack.c.l.s8.bf16 %v1074_v20 }
 0x3a5   : > { %5235 = vmatprep.subr.bf16.mxu1 %v1830_v17  ;;  %v1853_v17 = vunpack.c.l.s8.bf16 %v1082_v3 }
 0x3a7   : > { %5214 = vmatpush3.bf16.msra.mxu0 %v1806_v43 }
 0x3a8   : > { %5236 = vmatpush3.bf16.msra.mxu1 %v1822_v28  ;;  %5243 = vmatprep.subr.bf16.mxu0 %v1839_v15  ;;  %v6871_v28 = vld [vmem:[%s6080_s30 + $0x180] sm:$0xff] }
 0x3a9   : > { %5265 = vmatprep.subr.bf16.mxu1 %v1855_v33  ;;  %v555_v31 = vcombine.high %v6871_v28, %v6871_v28 }
 0x3aa   : > { %3672 = vmatmul.mubr.bf16.vlgmr.msra.gmra.mrb[88].mxu0 %v693_v34  ;;  %v1871_v34 = vunpack.c.l.s8.bf16 %v1091_v16 }
 0x3ab   : > { %3712 = vmatmul.mubr.bf16.vlgmr.msra.gmra.mrb[88].mxu1 %v695_v8  ;;  %5244 = vmatpush3.bf16.msra.mxu0 %v1831_v36  ;;  %v1087_v8 = vld [vmem:[%s6087_s17 + $0xc00] sm:$0xff]  ;;  %v697_v36 = vpack.c.bf16 %v6841_v27, %v6841_v27  ;;  %v1873_v27 = vunpack.c.l.s8.bf16 %v1092_v38 }
 0x3ac   : > { %5266 = vmatpush3.bf16.msra.mxu1 %v1847_v37  ;;  %5245 = vmatprep.subr.bf16.mxu0 %v1840_v10  ;;  %v1863_v37 = vunpack.c.l.s8.bf16 %v1087_v8  ;;  %v702_v10 = vpack.c.bf16 %v555_v31, %v555_v31  ;;  %v1864_v13 = vunpack.c.h.s8.bf16 %v1087_v8 }
 0x3ad   : > { %5267 = vmatprep.subr.bf16.mxu1 %v1856_v51  ;;  %3751 = vmatprep.mubr.bf16.mxu0 %v698_v24  ;;  %v1872_v51 = vunpack.c.h.s8.bf16 %v1091_v16  ;;  %v1088_v24 = vld [vmem:[%s6087_s17 + $0xc08] sm:$0xff] }
 0x3ae   : > { %3791 = vmatprep.mubr.bf16.mxu1 %v700_v41  ;;  %v1874_v41 = vunpack.c.h.s8.bf16 %v1092_v38 }
 0x3af   : > { %5246 = vmatpush3.bf16.msra.mxu0 %v1832_v18  ;;  %v1093_v18 = vld [vmem:[%s6087_s17 + $0xc30] sm:$0xff] }
 0x3b0   : > { %5268 = vmatpush3.bf16.msra.mxu1 %v1848_v39  ;;  %5247 = vmatprep.subr.bf16.mxu0 %v1841_v42  ;;  %v1866_v39 = vunpack.c.h.s8.bf16 %v1088_v24  ;;  %v1875_v42 = vunpack.c.l.s8.bf16 %v1093_v18  ;;  %v1876_v45 = vunpack.c.h.s8.bf16 %v1093_v18 }
 0x3b1   : > { %5269 = vmatprep.subr.bf16.mxu1 %v1857_v44  ;;  %v1867_v44 = vunpack.c.l.s8.bf16 %v1089_v21 }
 0x3b3   : > { %5248 = vmatpush3.bf16.msra.mxu0 %v1833_v46  ;;  %v1094_v46 = vld [vmem:[%s6087_s17 + $0xc38] sm:$0xff] }
 0x3b4   : > { %5270 = vmatpush3.bf16.msra.mxu1 %v1849_v9  ;;  %5249 = vmatprep.subr.bf16.mxu0 %v1842_v32  ;;  %v1868_v9 = vunpack.c.h.s8.bf16 %v1089_v21  ;;  %v1877_v32 = vunpack.c.l.s8.bf16 %v1094_v46 }
 0x3b5   : > { %5271 = vmatprep.subr.bf16.mxu1 %v1858_v49  ;;  %v1090_v49 = vld [vmem:[%s6087_s17 + $0xc18] sm:$0xff] }
 0x3b6   : > { %v1869_v57 = vunpack.c.l.s8.bf16 %v1090_v49 }
 0x3b7   : > { %5250 = vmatpush3.bf16.msra.mxu0 %v1834_v52 }
 0x3b8   : > { %5272 = vmatpush3.bf16.msra.mxu1 %v1850_v53  ;;  %5251 = vmatprep.subr.bf16.mxu0 %v1843_v54 }
 0x3b9   : > { %5273 = vmatprep.subr.bf16.mxu1 %v1859_v40 }
 0x3bb   : > { %5252 = vmatpush3.bf16.msra.mxu0 %v1835_v58 }
 0x3bc   : > { %5274 = vmatpush3.bf16.msra.mxu1 %v1851_v7  ;;  %5253 = vmatprep.subr.bf16.mxu0 %v1844_v60  ;;  %v1878_v60 = vunpack.c.h.s8.bf16 %v1094_v46 }
 0x3bd   : > { %5275 = vmatprep.subr.bf16.mxu1 %v1860_v61  ;;  %v4951_v4 = vpop.f32.mrb[64].mxu0 }
 0x3be   : > { %v4973_v29 = vpop.f32.mrb[64].mxu1  ;;  %v4952_v56 = vpop.f32.mrb[65].mxu0 }
 0x3bf   : > { %v4974_v5 = vpop.f32.mrb[65].mxu1  ;;  %v4953_v6 = vadd.f32 %v4952_v56, %v4951_v4  ;;  %v4954_v35 = vpop.f32.mrb[66].mxu0  ;;  %5254 = vmatpush3.bf16.msra.mxu0 %v1836_v48  ;;  %v1870_v48 = vunpack.c.h.s8.bf16 %v1090_v49 }
 0x3c0   : > { %v4975_v11 = vadd.f32 %v4974_v5, %v4973_v29  ;;  %5276 = vmatpush3.bf16.msra.mxu1 %v1852_v63  ;;  %v4976_v23 = vpop.f32.mrb[66].mxu1  ;;  %v4955_v19 = vpop.f32.mrb[67].mxu0  ;;  %5255 = vmatprep.subr.bf16.mxu0 %v1845_v0  ;;  %v701_v63 = vpack.c.bf16 %v6871_v28, %v6871_v28 }
 0x3c1   : > { %5277 = vmatprep.subr.bf16.mxu1 %v1861_v2  ;;  %v4977_v43 = vpop.f32.mrb[67].mxu1  ;;  %v3194_v15 = vadd.f32 %v4953_v6, %v6846_v1  ;;  %v699_v1 = vpack.c.bf16 %v6844_v59, %v6844_v59  ;;  %v1865_v59 = vunpack.c.l.s8.bf16 %v1088_v24 }
 0x3c3   : > { %v3234_v33 = vadd.f32 %v4975_v11, %v3194_v15  ;;  %5256 = vmatpush3.bf16.msra.mxu0 %v1837_v14 }
 0x3c4   : > { %5278 = vmatpush3.bf16.msra.mxu1 %v1853_v17  ;;  %5257 = vmatprep.subr.bf16.mxu0 %v1846_v25 }
 0x3c5   : > { %5279 = vmatprep.subr.bf16.mxu1 %v1862_v26 }
 0x3c7   : > { %5258 = vmatpush3.bf16.msra.mxu0 %v1838_v47 }
 0x3c8   : > { %5280 = vmatpush3.bf16.msra.mxu1 %v1854_v55  ;;  %5287 = vmatprep.subr.bf16.mxu0 %v1871_v34 }
 0x3ca   : > { %3752 = vmatmul.mubr.bf16.vlgmr.msra.gmra.mrb[92].mxu0 %v697_v36 }
 0x3cb   : > { %3792 = vmatmul.mubr.bf16.vlgmr.msra.gmra.mrb[92].mxu1 %v699_v1  ;;  %5288 = vmatpush3.bf16.msra.mxu0 %v1863_v37 }
 0x3cc   : > { %3831 = vmatprep.mubr.bf16.mxu0 %v702_v10  ;;  %5289 = vmatprep.subr.bf16.mxu0 %v1872_v51 }
 0x3cf   : > { %5290 = vmatpush3.bf16.msra.mxu0 %v1864_v13 }
 0x3d0   : > { %5291 = vmatprep.subr.bf16.mxu0 %v1873_v27 }
 0x3d3   : > { %5292 = vmatpush3.bf16.msra.mxu0 %v1865_v59 }
 0x3d4   : > { %5293 = vmatprep.subr.bf16.mxu0 %v1874_v41 }
 0x3d7   : > { %5294 = vmatpush3.bf16.msra.mxu0 %v1866_v39 }
 0x3d8   : > { %5295 = vmatprep.subr.bf16.mxu0 %v1875_v42 }
 0x3db   : > { %5296 = vmatpush3.bf16.msra.mxu0 %v1867_v44 }
 0x3dc   : > { %5297 = vmatprep.subr.bf16.mxu0 %v1876_v45 }
 0x3dd   : > { %v4995_v50 = vpop.f32.mrb[68].mxu0 }
 0x3de   : > { %v5017_v22 = vpop.f32.mrb[68].mxu1  ;;  %v4996_v52 = vpop.f32.mrb[69].mxu0 }
 0x3df   : > { %v5018_v53 = vpop.f32.mrb[69].mxu1  ;;  %v4997_v54 = vadd.f32 %v4996_v52, %v4995_v50  ;;  %v4998_v30 = vpop.f32.mrb[70].mxu0  ;;  %5298 = vmatpush3.bf16.msra.mxu0 %v1868_v9 }
 0x3e0   : > { %v5019_v40 = vadd.f32 %v5018_v53, %v5017_v22  ;;  %v5020_v58 = vpop.f32.mrb[70].mxu1  ;;  %v4999_v7 = vpop.f32.mrb[71].mxu0  ;;  %5299 = vmatprep.subr.bf16.mxu0 %v1877_v32 }
 0x3e1   : > { %v5021_v61 = vpop.f32.mrb[71].mxu1  ;;  %v3274_v62 = vadd.f32 %v4997_v54, %v3234_v33 }
 0x3e3   : > { %v3314_v12 = vadd.f32 %v5019_v40, %v3274_v62  ;;  %5300 = vmatpush3.bf16.msra.mxu0 %v1869_v57 }
 0x3e4   : > { %5301 = vmatprep.subr.bf16.mxu0 %v1878_v60 }
 0x3e7   : > { %5302 = vmatpush3.bf16.msra.mxu0 %v1870_v48 }
 0x3ea   : > { %3832 = vmatmul.mubr.bf16.vlgmr.msra.gmra.mrb[96].mxu0 %v701_v63 }
 0x3fd   : > { %v5039_v0 = vpop.f32.mrb[72].mxu0 }
 0x3fe   : > { %v5061_v20 = vpop.f32.mrb[72].mxu1  ;;  %v5040_v2 = vpop.f32.mrb[73].mxu0 }
 0x3ff   : > { %v5062_v3 = vpop.f32.mrb[73].mxu1  ;;  %v5041_v4 = vadd.f32 %v5040_v2, %v5039_v0  ;;  %v5042_v29 = vpop.f32.mrb[74].mxu0 }
 0x400   : > { %v5063_v56 = vadd.f32 %v5062_v3, %v5061_v20  ;;  %v5064_v5 = vpop.f32.mrb[74].mxu1  ;;  %v5043_v6 = vpop.f32.mrb[75].mxu0 }
 0x401   : > { %v5065_v35 = vpop.f32.mrb[75].mxu1  ;;  %v3354_v11 = vadd.f32 %v5041_v4, %v3314_v12 }
 0x403   : > { %v3394_v14 = vadd.f32 %v5063_v56, %v3354_v11 }
 0x41d   : > { %v5083_v17 = vpop.f32.mrb[76].mxu0 }
 0x41e   : > { %v5105_v23 = vpop.f32.mrb[76].mxu1  ;;  %v5084_v19 = vpop.f32.mrb[77].mxu0 }
 0x41f   : > { %v5106_v25 = vpop.f32.mrb[77].mxu1  ;;  %v5085_v26 = vadd.f32 %v5084_v19, %v5083_v17  ;;  %v5086_v43 = vpop.f32.mrb[78].mxu0  ;;  %v408_v17 = vld [vmem:[#allocation2] sm:$0xf] }
 0x420   : > { %v5107_v28 = vadd.f32 %v5106_v25, %v5105_v23  ;;  %v5108_v15 = vpop.f32.mrb[78].mxu1  ;;  %v5087_v16 = vpop.f32.mrb[79].mxu0  ;;  %v5784_v43 = vmov (!%p4207_p4), 0.0  }
 0x421   : > { %v5109_v33 = vpop.f32.mrb[79].mxu1  ;;  %v3434_v47 = vadd.f32 %v5085_v26, %v3394_v14  ;;  %v5505_v26 = vld [vmem:[%s6970_s4] sm:$0xff] (!%p4207_p4)   ;;  %5323 = vmatprep.subr.bf16.mxu0 (!%p4207_p4), %v5784_v43  ;;  %5343 = vmatprep.subr.bf16.mxu1 (!%p4207_p4), %v5784_v43  ;;  %v5507_v15 = vld [vmem:[%s6970_s4 + $0x10] sm:$0xff] (!%p4207_p4)  }
 0x422   : > { %5324 = vmatpush3.bf16.msra.mxu0 (!%p4207_p4), %v5505_v26  ;;  %5339 = vmatprep.mubr.msk.bf16.mxu0 (!%p4207_p4), %vm5785_vm0, %v5784_v43  ;;  %v5513_v16 = vld [vmem:[%s6972_s6] sm:$0xff] (!%p4207_p4)   ;;  %v5508_v33 = vld [vmem:[%s6970_s4 + $0x18] sm:$0xff] (!%p4207_p4)  }
 0x423   : > { %v3474_v55 = vadd.f32 %v5107_v28, %v3434_v47  ;;  %v5506_v28 = vld [vmem:[%s6970_s4 + $0x8] sm:$0xff] (!%p4207_p4)   ;;  %5325 = vmatprep.subr.bf16.mxu0 (!%p4207_p4), %v5784_v43  ;;  %5351 = vmatprep.mubr.msk.bf16.mxu1 (!%p4207_p4), %vm5785_vm0, %v5784_v43 }
 0x424   : > { %5344 = vmatpush3.bf16.msra.mxu1 (!%p4207_p4), %v5513_v16  ;;  %v5514_v47 = vld [vmem:[%s6972_s6 + $0x8] sm:$0xff] (!%p4207_p4)  }
 0x425   : > { %5345 = vmatprep.subr.bf16.mxu1 (!%p4207_p4), %v5784_v43 }
 0x426   : > { %5326 = vmatpush3.bf16.msra.mxu0 (!%p4207_p4), %v5506_v28 }
 0x427   : > { %5327 = vmatprep.subr.bf16.mxu0 (!%p4207_p4), %v5784_v43 }
 0x428   : > { %5346 = vmatpush3.bf16.msra.mxu1 (!%p4207_p4), %v5514_v47 }
 0x429   : > { %5347 = vmatprep.subr.bf16.mxu1 (!%p4207_p4), %v5784_v43 }
 0x42a   : > { %5328 = vmatpush3.bf16.msra.mxu0 (!%p4207_p4), %v5507_v15 }
 0x42b   : > { %5329 = vmatprep.subr.bf16.mxu0 (!%p4207_p4), %v5784_v43 }
 0x42e   : > { %5330 = vmatpush3.bf16.msra.mxu0 (!%p4207_p4), %v5508_v33 }
 0x42f   : > { %5331 = vmatprep.subr.bf16.mxu0 (!%p4207_p4), %v5784_v43 }
 0x43d   : > { %v5127_v31 = vpop.f32.mrb[80].mxu0 }
 0x43e   : > { %v5149_v34 = vpop.f32.mrb[80].mxu1  ;;  %v5128_v8 = vpop.f32.mrb[81].mxu0 }
 0x43f   : > { %v5150_v36 = vpop.f32.mrb[81].mxu1  ;;  %v5129_v1 = vadd.f32 %v5128_v8, %v5127_v31  ;;  %v5130_v37 = vpop.f32.mrb[82].mxu0 }
 0x440   : > { %v5151_v10 = vadd.f32 %v5150_v36, %v5149_v34  ;;  %v5152_v51 = vpop.f32.mrb[82].mxu1  ;;  %v5131_v38 = vpop.f32.mrb[83].mxu0  ;;  %v4208_v34 = vld [vmem:[#allocation8] ss:$0 sm:$0xff] (!%p4207_p4)  ;;  %v5510_v36 = vld [vmem:[%s6970_s4 + $0x28] sm:$0xff] (!%p4207_p4)  }
 0x441   : > { %v5153_v13 = vpop.f32.mrb[83].mxu1  ;;  %v3514_v27 = vadd.f32 %v5129_v1, %v3474_v55  ;;  %v5509_v55 = vld [vmem:[%s6970_s4 + $0x20] sm:$0xff] (!%p4207_p4)   ;;  %v4209_v1 = vld [vmem:[#allocation9] ss:$0 sm:$0xff] (!%p4207_p4)  ;;  %v5512_v38 = vld [vmem:[%s6970_s4 + $0x38] sm:$0xff] (!%p4207_p4)  }
 0x442   : > { %5332 = vmatpush3.bf16.msra.mxu0 (!%p4207_p4), %v5509_v55 }
 0x443   : > { %v3554_v24 = vadd.f32 %v5151_v10, %v3514_v27  ;;  %5333 = vmatprep.subr.bf16.mxu0 (!%p4207_p4), %v5784_v43  ;;  %v5511_v10 = vld [vmem:[%s6970_s4 + $0x30] sm:$0xff] (!%p4207_p4)  }
 0x444   : > { %v5515_v27 = vld [vmem:[%s6972_s6 + $0x10] sm:$0xff] (!%p4207_p4)  }
 0x445   : > { %5348 = vmatpush3.bf16.msra.mxu1 (!%p4207_p4), %v5515_v27 }
 0x446   : > { %5334 = vmatpush3.bf16.msra.mxu0 (!%p4207_p4), %v5510_v36  ;;  %5349 = vmatprep.subr.bf16.mxu1 (!%p4207_p4), %v5784_v43 }
 0x447   : > { %5335 = vmatprep.subr.bf16.mxu0 (!%p4207_p4), %v5784_v43 }
 0x44a   : > { %5336 = vmatpush3.bf16.msra.mxu0 (!%p4207_p4), %v5511_v10 }
 0x44b   : > { %5337 = vmatprep.subr.bf16.mxu0 (!%p4207_p4), %v5784_v43 }
 0x44e   : > { %5338 = vmatpush3.bf16.msra.mxu0 (!%p4207_p4), %v5512_v38 }
 0x45d   : > { %v5171_v59 = vpop.f32.mrb[84].mxu0 }
 0x45e   : > { %v5193_v41 = vpop.f32.mrb[84].mxu1  ;;  %v5172_v18 = vpop.f32.mrb[85].mxu0 }
 0x45f   : > { %v5194_v39 = vpop.f32.mrb[85].mxu1  ;;  %v5173_v42 = vadd.f32 %v5172_v18, %v5171_v59  ;;  %v5174_v21 = vpop.f32.mrb[86].mxu0  ;;  %v4210_v59 = vld [vmem:[#allocation11] ss:$0 sm:$0xff] (!%p4207_p4) }
 0x460   : > { %v5195_v44 = vadd.f32 %v5194_v39, %v5193_v41  ;;  %v5196_v45 = vpop.f32.mrb[86].mxu1  ;;  %v5175_v46 = vpop.f32.mrb[87].mxu0 }
 0x461   : > { %v5197_v9 = vpop.f32.mrb[87].mxu1  ;;  %v3594_v32 = vadd.f32 %v5173_v42, %v3554_v24  ;;  %v5516_v24 = vld [vmem:[%s6972_s6 + $0x18] sm:$0xff] (!%p4207_p4)  }
 0x462   : > { %5350 = vmatpush3.bf16.msra.mxu1 (!%p4207_p4), %v5516_v24  ;;  %v4219_v46 = vld [vmem:[#allocation12] ss:$0 sm:$0xff] (!%p4207_p4) }
 0x463   : > { %v3634_v49 = vadd.f32 %v5195_v44, %v3594_v32 }
 0x47d   : > { %v5215_v50 = vpop.f32.mrb[88].mxu0 }
 0x47e   : > { %v5237_v22 = vpop.f32.mrb[88].mxu1  ;;  %v5216_v52 = vpop.f32.mrb[89].mxu0 }
 0x47f   : > { %v5238_v53 = vpop.f32.mrb[89].mxu1  ;;  %v5217_v54 = vadd.f32 %v5216_v52, %v5215_v50  ;;  %v5218_v30 = vpop.f32.mrb[90].mxu0 }
 0x480   : > { %v5239_v40 = vadd.f32 %v5238_v53, %v5237_v22  ;;  %v5240_v57 = vpop.f32.mrb[90].mxu1  ;;  %v5219_v58 = vpop.f32.mrb[91].mxu0 }
 0x481   : > { %v5241_v7 = vpop.f32.mrb[91].mxu1  ;;  %v3674_v60 = vadd.f32 %v5217_v54, %v3634_v49 }
 0x483   : > { %v3714_v61 = vadd.f32 %v5239_v40, %v3674_v60 }
 0x49d   : > { %v5259_v62 = vpop.f32.mrb[92].mxu0 }
 0x49e   : > { %v5281_v12 = vpop.f32.mrb[92].mxu1  ;;  %v5260_v48 = vpop.f32.mrb[93].mxu0 }
 0x49f   : > { %v5282_v63 = vpop.f32.mrb[93].mxu1  ;;  %v5261_v0 = vadd.f32 %v5260_v48, %v5259_v62  ;;  %v5262_v20 = vpop.f32.mrb[94].mxu0 }
 0x4a0   : > { %v5283_v2 = vadd.f32 %v5282_v63, %v5281_v12  ;;  %v5284_v3 = vpop.f32.mrb[94].mxu1  ;;  %v5263_v4 = vpop.f32.mrb[95].mxu0 }
 0x4a1   : > { %v5285_v29 = vpop.f32.mrb[95].mxu1  ;;  %v3754_v56 = vadd.f32 %v5261_v0, %v3714_v61 }
 0x4a3   : > { %v3794_v5 = vadd.f32 %v5283_v2, %v3754_v56 }
 0x4bd   : > { %v5303_v6 = vpop.f32.mrb[96].mxu0 }
 0x4be   : > { %v5304_v35 = vpop.f32.mrb[97].mxu0 }
 0x4bf   : > { %v5305_v11 = vadd.f32 %v5304_v35, %v5303_v6  ;;  %v5306_v14 = vpop.f32.mrb[98].mxu0  ;;  %3844 = sbr.rel (%p4207_p4) target bundleno = 1986 (0x7c2), region = 84 }
 0x4c0   : > { %v5307_v23 = vpop.f32.mrb[99].mxu0 }
 0x4c1   : > { %v3834_v19 = vadd.f32 %v5305_v11, %v3794_v5 }
 0x4c3   : > { %v3839_v25 = vadd.f32 %v3834_v19, %v408_v17 }
 0x4c5   : > { %3840 = vst [vmem:[#allocation2] sm:$0xf] %v3839_v25 }
 0x4cc   : > { %v3845_v31 = vld [vmem:[#allocation2] sm:$0xf] }
 0x4cd   : > { %v3853_v8 = vmul.f32 %v4208_v34, %v3845_v31 }
 0x4cf   : > { %v3861_v37 = vadd.f32 %v4209_v1, %v3853_v8 }
 0x4d1   : > { %v3862_v51 = vmax.f32 %v3861_v37, 0.0 }
 0x4d3   : > { %v3863_v13 = vpack.c.bf16 %v3862_v51, %v3862_v51 }
 0x4d5   : > { %5340 = vmatmul.mubr.bf16.vlgmr.msra.gmra.mrb[0].mxu0 %v3863_v13 }
 0x5a8   : > { %v3969_v41 = vpop.f32.mrb[0].mxu0 }
 0x5a9   : > { %v3970_v18 = vadd.f32 %v4210_v59, %v3969_v41  ;;  %v5341_v39 = vpop.f32.mrb[1].mxu0 }
 0x5aa   : > { %v3972_v42 = vpop.f32.mrb[2].mxu0 }
 0x5ab   : > { %v3975_v21 = vmax.f32 %v3970_v18, 0.0  ;;  %v5342_v44 = vpop.f32.mrb[3].mxu0 }
 0x5ad   : > { %v3976_v45 = vpack.c.bf16 %v3975_v21, %v3975_v21 }
 0x5af   : > { %5352 = vmatmul.mubr.msk.bf16.vlgmr.msra.gmra.mrb[0].mxu1 %vm4016_vm1, %v3976_v45 }
 0x682   : > { %v4054_v9 = vpop.f32.mrb[0].mxu1 }
 0x683   : > { %v4055_v32 = vadd.f32 %v4219_v46, %v4054_v9  ;;  %v5353_v49 = vpop.f32.mrb[1].mxu1 }
 0x684   : > { %v4057_v50 = vpop.f32.mrb[2].mxu1 }
 0x685   : > { %v5354_v22 = vpop.f32.mrb[3].mxu1  ;;  %v4061_v52 = vsel %vm4060_vm2, %v4055_v32, -inf }
 0x686   : > { %4062 = vmax.xlane.f32.xlu0 %v4061_v52 }
 0x713   : > { %v4063_v53 = vpop.xlane.xlu0 %4062 }
 0x714   : > { %v4064_v54 = vsub.f32 %v4055_v32, %v4063_v53 }
 0x716   : > { %v4065_v30 = vmul.f32 1.442695, %v4064_v54 }
 0x718   : > { %5517 = vpow2.f32 %v4065_v30 }
 0x722   : > { %v5518_v40 = vpop.eup %5517 }
 0x723   : > { %v4067_v57 = vsel %vm4060_vm2, %v5518_v40, 0.0 }
 0x724   : > { %4068 = vadd.xlane.f32.xlu0 %v4067_v57 }
 0x7b1   : > { %v4069_v58 = vpop.xlane.xlu0 %4068 }
 0x7b2   : > { %5519 = vlog2.f32 %v4069_v58 }
 0x7bc   : > { %v5520_v7 = vpop.eup %5519 }
 0x7bd   : > { %v4071_v60 = vmul.f32 0.6931472, %v5520_v7 }
 0x7bf   : > { %v4072_v61 = vsub.f32 %v4064_v54, %v4071_v60 }
 0x7c1   : > { %4073 = vst.msk [vmem:[#allocation14] sm:$0xf] %vm4060_vm2, %v4072_v61 }
 0x7c2 PF: > { %p5412_p12 = scmp.eq.s32.totalorder %s5853_s11, 1  ;;  %s5786_s23 = smov [#allocation14]  }
 0x7c3   : > { %s4081_s24 = sshll.u32 %s5786_s23, 4  ;;  %s4082_s24 = int_to_ptr.vmem [resolvable:$true] %s4081_s24 }
 0x7c4   : > { %s5693_s0 = scalar_lea.vmem %s4082_s24, 64  ;;  %p5700_p5 = scmp.lt.s32.totalorder %s4082_s24, %s4082_s24 }
 0x7c5   : > { %p5694_p8 = scmp.ne.s32.totalorder %s4082_s24, %s5693_s0  ;;  %p5701_p10 = scmp.lt.s32.totalorder %s5693_s0, %s5693_s0 }
 0x7c7   : > { %p5695_p0 = pnand %p5694_p8, %p5412_p12  ;;  %p5702_p6 = por %p5701_p10, %p5700_p5 }
 0x7c9   : > { %p5696_p2 = pneg %p5695_p0 }
 0x7cb   : > { %p5703_p13 = pnand %p5702_p6, %p5696_p2 }
 0x7cd   : > { %5706 = shalt.err (!%p5703_p13)
}
 0x7ce   : > { %s5707_s21 = scalar_lea.hbm %s6974_s8, 64 }
 0x7cf   : > { %p5708_p9 = scmp.ne.s32.totalorder %s6974_s8, %s5707_s21  ;;  %p5713_p1 = scmp.lt.u32.totalorder %s5707_s21, %s6974_s8 }
 0x7d1   : > { %p5709_p11 = pnand %p5708_p9, %p5412_p12 }
 0x7d3   : > { %p5710_p3 = pneg %p5709_p11 }
 0x7d5   : > { %p5715_p7 = pnand %p5713_p1, %p5710_p3 }
 0x7d7   : > { %5718 = shalt.err (!%p5715_p7)
}
 0x7d8   : > { %5380 = dma.vmem_to_hbm [thread:$0]  (%p5412_p12), %s4082_s24, 64, %s6974_s8, [#allocation5]  }
 0x7d9   : > { %5756 = dma.done.wait (%p5412_p12), [#allocation5], 64  }
 0x7da   : > { %5758 = vsyncadd (%p5412_p12), [#allocation5], 4294967232 }
 0x7db PF: > { %p24_p4 = scmp.ge.s32.totalorder %s5977_s25, 4   ;;  %s6993_s27 = smov %s5765_s28 }
 0x7dc   : > { %s6994_s28 = smov %s5769_s29  ;;  %s6995_s29 = smov %s5989_s18 }
 0x7dd   : > { %s6996_s30 = smov %s5977_s25  ;;  %26 = sbr.rel (!%p24_p4) target bundleno = 10 (0xa), region = 126 }
 0x7e4   :  { %4094 = vsyncpa [#allocation4], 1 }
 0x7e5   :  { %4096 = vsyncpa [#allocation4 + $0x1], 1 }
 0x7e6   :  { %4097 = vsyncpa [#allocation7], 1 }
 0x7e7   :  { %4099 = vsyncpa [#allocation7 + $0x1], 1 }
 0x7e8   :  { %4100 = vsyncpa [#allocation10], 1 }
 0x7e9   :  { %4101 = vsyncpa [#allocation13], 1 }
 0x7ea   :  { %4102 = vsyncpa [#allocation5], 1 }
 0x7eb   :  { %4104 = vsyncpa [#allocation5 + $0x1], 1 }

</bundles_post_ra>
